<compile_context>
chip_gen: v6e
topology: v6e:2x2x1
jax: 0.10.0
libtpu: 0.0.40
codegen_flags: <defaults>
</compile_context>

<pallas_src>
import jax
import jax.numpy as jnp
from jax.experimental import pallas as pl
from jax.experimental.pallas import tpu as pltpu

LATENT_DIMS = 16
IN_DIM = 28 * 28 * 3            # 2352
IN_DIM_PAD = 2432               # 19 * 128, lane-clean K for the first matmul
H1 = 512
H2 = 256

TM_MAX = 512                    # max batch tile (amortizes per-step overhead)


def _round_up(x, m):
    return (x + m - 1) // m * m


def _choose_tm(batch):
    """Batch tile size: multiple of 16 (bf16 sublane packing); up to TM_MAX;
    for moderate batches keep >= 2 grid steps so both v7x TCs get work."""
    b16 = _round_up(batch, 16)
    if b16 <= 128:
        return b16                       # single small tile
    half = _round_up((b16 + 1) // 2, 128)
    return max(128, min(TM_MAX, half))


def encoder_kernel(x_ref, w1_ref, b1_ref, w2_ref, b2_ref,
                   wmu_ref, bmu_ref, wlv_ref, blv_ref, eps_ref,
                   z_ref, klrow_ref):
    # x tile: (tm, IN_DIM_PAD) already bf16 (streamed at half the HBM bytes).
    h1 = jnp.dot(x_ref[...], w1_ref[...], preferred_element_type=jnp.float32)
    h1 = jnp.maximum(h1 + b1_ref[...], 0.0)

    h2 = jnp.dot(h1.astype(jnp.bfloat16), w2_ref[...],
                 preferred_element_type=jnp.float32)
    h2 = jnp.maximum(h2 + b2_ref[...], 0.0)
    h2b = h2.astype(jnp.bfloat16)

    mu = jnp.dot(h2b, wmu_ref[...],
                 preferred_element_type=jnp.float32) + bmu_ref[...]
    log_var = jnp.dot(h2b, wlv_ref[...],
                      preferred_element_type=jnp.float32) + blv_ref[...]

    std = jnp.exp(0.5 * log_var)        # one transcendental ...
    var = std * std                     # ... reused for exp(log_var)

    # Per-row KL partial; sum over rows (and dropping of padded rows) happens
    # outside the kernel.
    klrow_ref[...] = -0.5 * jnp.sum(1.0 + log_var - mu * mu - var,
                                    axis=-1, keepdims=True)

    # Reparametrization trick: z = mu + exp(log_var / 2) * eps
    z_ref[...] = mu + std * eps_ref[...]


def init_params(key):
    """torch.nn.Linear-style init; weights stored transposed (in, out), f32."""
    def linear(k, fan_in, fan_out):
        kw, kb = jax.random.split(k)
        bound = 1.0 / jnp.sqrt(fan_in)
        w = jax.random.uniform(kw, (fan_in, fan_out), jnp.float32, -bound, bound)
        b = jax.random.uniform(kb, (1, fan_out), jnp.float32, -bound, bound)
        return w, b

    k1, k2, k3 = jax.random.split(key, 3)
    w1, b1 = linear(k1, IN_DIM, H1)
    w2, b2 = linear(k2, H1, H2)
    w3, b3 = linear(k3, H2, 2 * LATENT_DIMS)
    return (w1, b1, w2, b2, w3, b3)


def prepare_params(params):
    """One-time conversion to kernel layout: bf16 weights, K padded to 2432,
    to_mean_logvar split into mu / log_var halves (biases stay f32)."""
    w1, b1, w2, b2, w3, b3 = params
    w1p = jnp.pad(w1.astype(jnp.bfloat16), ((0, IN_DIM_PAD - IN_DIM), (0, 0)))
    w2p = w2.astype(jnp.bfloat16)
    wmu = w3[:, :LATENT_DIMS].astype(jnp.bfloat16)
    wlv = w3[:, LATENT_DIMS:].astype(jnp.bfloat16)
    bmu = b3[:, :LATENT_DIMS].astype(jnp.float32)
    blv = b3[:, LATENT_DIMS:].astype(jnp.float32)
    return (w1p, b1.astype(jnp.float32), w2p, b2.astype(jnp.float32),
            wmu, bmu, wlv, blv)


def encoder_forward(x_nchw, prepared, eps):
    """x_nchw: (B, 3, 28, 28) f32; eps: (B, LATENT_DIMS) f32.
    Returns (z (B, LATENT_DIMS) f32, kl scalar f32)."""
    w1p, b1, w2p, b2, wmu, bmu, wlv, blv = prepared
    B = x_nchw.shape[0]

    # NCHW flatten (== torch.flatten(x, start_dim=1)), cast to bf16 so the
    # padded copy written to HBM — and the kernel's dominant DMA stream — is
    # half-size.  The zero feature-pad keeps x / W1 lane-clean (K = 19*128).
    x_flat = x_nchw.reshape(B, -1).astype(jnp.bfloat16)

    tm = _choose_tm(B)
    b_pad = _round_up(B, tm)
    grid_b = b_pad // tm

    x_p = jnp.pad(x_flat, ((0, b_pad - B), (0, IN_DIM_PAD - IN_DIM)))
    eps_p = jnp.pad(eps.astype(jnp.float32), ((0, b_pad - B), (0, 0)))

    resident = lambda i: (0, 0)   # weights/biases: same block every grid step
    tiled = lambda i: (i, 0)      # per-batch-tile blocks

    weight_elems = IN_DIM_PAD * H1 + H1 * H2 + 2 * H2 * LATENT_DIMS
    flops = 2 * b_pad * weight_elems
    bytes_accessed = (
        b_pad * IN_DIM_PAD * 2                    # x (bf16)
        + 2 * weight_elems                        # bf16 weights
        + 4 * (H1 + H2 + 2 * LATENT_DIMS)         # f32 biases
        + b_pad * LATENT_DIMS * 4 * 2             # eps in + z out (f32)
        + b_pad * 4)                              # per-row KL out (f32)

    z_p, klrow = pl.pallas_call(
        encoder_kernel,
        grid=(grid_b,),
        in_specs=[
            pl.BlockSpec((tm, IN_DIM_PAD), tiled),       # x (bf16, streamed)
            pl.BlockSpec((IN_DIM_PAD, H1), resident),    # w1 (bf16, resident)
            pl.BlockSpec((1, H1), resident),             # b1
            pl.BlockSpec((H1, H2), resident),            # w2 (bf16, resident)
            pl.BlockSpec((1, H2), resident),             # b2
            pl.BlockSpec((H2, LATENT_DIMS), resident),   # w_mu (bf16)
            pl.BlockSpec((1, LATENT_DIMS), resident),    # b_mu
            pl.BlockSpec((H2, LATENT_DIMS), resident),   # w_logvar (bf16)
            pl.BlockSpec((1, LATENT_DIMS), resident),    # b_logvar
            pl.BlockSpec((tm, LATENT_DIMS), tiled),      # eps
        ],
        out_specs=(
            pl.BlockSpec((tm, LATENT_DIMS), tiled),      # z
            pl.BlockSpec((tm, 1), tiled),                # per-row KL partial
        ),
        out_shape=(
            jax.ShapeDtypeStruct((b_pad, LATENT_DIMS), jnp.float32),
            jax.ShapeDtypeStruct((b_pad, 1), jnp.float32),
        ),
        compiler_params=pltpu.CompilerParams(
            dimension_semantics=("parallel",)),
        cost_estimate=pl.CostEstimate(
            flops=flops,
            transcendentals=b_pad * LATENT_DIMS,
            bytes_accessed=bytes_accessed),
    )(x_p, w1p, b1, w2p, b2, wmu, bmu, wlv, blv, eps_p)

    z = z_p[:B]
    kl = jnp.sum(klrow[:B])
    return z, kl


def encoder_reference(x_nchw, params_f32, eps):
    """Pure-JAX reference mirroring the kernel's bf16 weight/activation casts."""
    w1, b1, w2, b2, w3, b3 = params_f32
    q = lambda a: a.astype(jnp.bfloat16).astype(jnp.float32)
    B = x_nchw.shape[0]
    x = q(x_nchw.reshape(B, -1).astype(jnp.float32))
    h1 = jnp.maximum(x @ q(w1) + b1, 0.0)
    h2 = jnp.maximum(q(h1) @ q(w2) + b2, 0.0)
    ml = q(h2) @ q(w3) + b3
    mu, lv = ml[:, :LATENT_DIMS], ml[:, LATENT_DIMS:]
    kl = -0.5 * jnp.sum(1.0 + lv - mu * mu - jnp.exp(lv))
    z = mu + jnp.exp(0.5 * lv) * eps
    return z, kl


if __name__ == "__main__":
    key = jax.random.PRNGKey(0)
    k_params, k_x, k_eps = jax.random.split(key, 3)

    params = init_params(k_params)
    prepared = prepare_params(params)

    # --- small batch (B=2), single batch tile ---------------------------------
    B = 2
    x = jax.random.normal(k_x, (B, 3, 28, 28), jnp.float32)
    # eps ~ N(0,1) with log_var's shape (torch.randn_like), generated
    # deterministically outside the kernel and passed in.
    eps = jax.random.normal(k_eps, (B, LATENT_DIMS), jnp.float32)

    z, kl = encoder_forward(x, prepared, eps)
    jax.block_until_ready((z, kl))

    z_ref, kl_ref = encoder_reference(x, params, eps)
    assert z.shape == (B, LATENT_DIMS) and z.dtype == jnp.float32
    assert jnp.isfinite(kl)
    assert jnp.allclose(z, z_ref, rtol=2e-2, atol=2e-2)
    assert jnp.allclose(kl, kl_ref, rtol=2e-2, atol=2e-2)

    # --- larger, non-multiple batch (exercises the 2-step grid + padding) -----
    B2 = 200
    kx2, ke2 = jax.random.split(jax.random.PRNGKey(1))
    x2 = jax.random.normal(kx2, (B2, 3, 28, 28), jnp.float32)
    eps2 = jax.random.normal(ke2, (B2, LATENT_DIMS), jnp.float32)

    z2, kl2 = encoder_forward(x2, prepared, eps2)
    jax.block_until_ready((z2, kl2))

    z2_ref, kl2_ref = encoder_reference(x2, params, eps2)
    assert z2.shape == (B2, LATENT_DIMS)
    assert jnp.allclose(z2, z2_ref, rtol=2e-2, atol=2e-2)
    assert jnp.allclose(kl2, kl2_ref, rtol=2e-2, atol=2e-2)

    print("KERNEL_OK")
</pallas_src>

<mosaic_0001>
module attributes {stable_mosaic.version = 11 : i64} {
  func.func @encoder_kernel(%arg0: i32, %arg1: memref<16x2432xbf16, #tpu.memory_space<vmem>>, %arg2: memref<2432x512xbf16, #tpu.memory_space<vmem>>, %arg3: memref<1x512xf32, #tpu.memory_space<vmem>>, %arg4: memref<512x256xbf16, #tpu.memory_space<vmem>>, %arg5: memref<1x256xf32, #tpu.memory_space<vmem>>, %arg6: memref<256x16xbf16, #tpu.memory_space<vmem>>, %arg7: memref<1x16xf32, #tpu.memory_space<vmem>>, %arg8: memref<256x16xbf16, #tpu.memory_space<vmem>>, %arg9: memref<1x16xf32, #tpu.memory_space<vmem>>, %arg10: memref<16x16xf32, #tpu.memory_space<vmem>>, %arg11: memref<16x16xf32, #tpu.memory_space<vmem>>, %arg12: memref<16x1xf32, #tpu.memory_space<vmem>>) attributes {dimension_semantics = [#tpu.dimension_semantics<parallel>], iteration_bounds = array<i64: 1>, scalar_prefetch = 0 : i64, scratch_operands = 0 : i64, tpu.core_type = #tpu.core_type<tc>, window_params = [{transform_indices = @transform_0, window_bounds = array<i64: 16, 2432>}, {pipeline_mode = #tpu.pipeline_mode<synchronous>, transform_indices = @transform_1, window_bounds = array<i64: 2432, 512>}, {pipeline_mode = #tpu.pipeline_mode<synchronous>, transform_indices = @transform_2, window_bounds = array<i64: 1, 512>}, {pipeline_mode = #tpu.pipeline_mode<synchronous>, transform_indices = @transform_3, window_bounds = array<i64: 512, 256>}, {pipeline_mode = #tpu.pipeline_mode<synchronous>, transform_indices = @transform_4, window_bounds = array<i64: 1, 256>}, {pipeline_mode = #tpu.pipeline_mode<synchronous>, transform_indices = @transform_5, window_bounds = array<i64: 256, 16>}, {pipeline_mode = #tpu.pipeline_mode<synchronous>, transform_indices = @transform_6, window_bounds = array<i64: 1, 16>}, {pipeline_mode = #tpu.pipeline_mode<synchronous>, transform_indices = @transform_7, window_bounds = array<i64: 256, 16>}, {pipeline_mode = #tpu.pipeline_mode<synchronous>, transform_indices = @transform_8, window_bounds = array<i64: 1, 16>}, {transform_indices = @transform_9, window_bounds = array<i64: 16, 16>}, {transform_indices = @transform_10, window_bounds = array<i64: 16, 16>}, {transform_indices = @transform_11, window_bounds = array<i64: 16, 1>}]} {
    %c0 = arith.constant 0 : index
    %c0_0 = arith.constant 0 : index
    %0 = vector.load %arg1[%c0, %c0_0] : memref<16x2432xbf16, #tpu.memory_space<vmem>>, vector<16x2432xbf16>
    %c0_1 = arith.constant 0 : index
    %c0_2 = arith.constant 0 : index
    %1 = vector.load %arg2[%c0_1, %c0_2] : memref<2432x512xbf16, #tpu.memory_space<vmem>>, vector<2432x512xbf16>
    %cst = arith.constant dense<0.000000e+00> : vector<16x512xf32>
    %2 = tpu.matmul %0, %1, %cst {dimension_numbers = #tpu.dot_dimension_numbers<[1], [0], [0], [1], [0, 0, 1, 1], [], []>} : vector<16x2432xbf16>, vector<2432x512xbf16>, vector<16x512xf32> -> vector<16x512xf32>
    %c0_3 = arith.constant 0 : index
    %c0_4 = arith.constant 0 : index
    %3 = vector.load %arg3[%c0_3, %c0_4] : memref<1x512xf32, #tpu.memory_space<vmem>>, vector<1x512xf32>
    %4 = vector.broadcast %3 : vector<1x512xf32> to vector<16x512xf32>
    %5 = arith.addf %2, %4 : vector<16x512xf32>
    %cst_5 = arith.constant 0.000000e+00 : f32
    %6 = vector.broadcast %cst_5 : f32 to vector<16x512xf32>
    %7 = arith.maximumf %5, %6 : vector<16x512xf32>
    %8 = arith.truncf %7 : vector<16x512xf32> to vector<16x512xbf16>
    %c0_6 = arith.constant 0 : index
    %c0_7 = arith.constant 0 : index
    %9 = vector.load %arg4[%c0_6, %c0_7] : memref<512x256xbf16, #tpu.memory_space<vmem>>, vector<512x256xbf16>
    %cst_8 = arith.constant dense<0.000000e+00> : vector<16x256xf32>
    %10 = tpu.matmul %8, %9, %cst_8 {dimension_numbers = #tpu.dot_dimension_numbers<[1], [0], [0], [1], [0, 0, 1, 1], [], []>} : vector<16x512xbf16>, vector<512x256xbf16>, vector<16x256xf32> -> vector<16x256xf32>
    %c0_9 = arith.constant 0 : index
    %c0_10 = arith.constant 0 : index
    %11 = vector.load %arg5[%c0_9, %c0_10] : memref<1x256xf32, #tpu.memory_space<vmem>>, vector<1x256xf32>
    %12 = vector.broadcast %11 : vector<1x256xf32> to vector<16x256xf32>
    %13 = arith.addf %10, %12 : vector<16x256xf32>
    %cst_11 = arith.constant 0.000000e+00 : f32
    %14 = vector.broadcast %cst_11 : f32 to vector<16x256xf32>
    %15 = arith.maximumf %13, %14 : vector<16x256xf32>
    %16 = arith.truncf %15 : vector<16x256xf32> to vector<16x256xbf16>
    %c0_12 = arith.constant 0 : index
    %c0_13 = arith.constant 0 : index
    %17 = vector.load %arg6[%c0_12, %c0_13] : memref<256x16xbf16, #tpu.memory_space<vmem>>, vector<256x16xbf16>
    %cst_14 = arith.constant dense<0.000000e+00> : vector<16x16xf32>
    %18 = tpu.matmul %16, %17, %cst_14 {dimension_numbers = #tpu.dot_dimension_numbers<[1], [0], [0], [1], [0, 0, 1, 1], [], []>} : vector<16x256xbf16>, vector<256x16xbf16>, vector<16x16xf32> -> vector<16x16xf32>
    %c0_15 = arith.constant 0 : index
    %c0_16 = arith.constant 0 : index
    %19 = vector.load %arg7[%c0_15, %c0_16] : memref<1x16xf32, #tpu.memory_space<vmem>>, vector<1x16xf32>
    %20 = vector.broadcast %19 : vector<1x16xf32> to vector<16x16xf32>
    %21 = arith.addf %18, %20 : vector<16x16xf32>
    %c0_17 = arith.constant 0 : index
    %c0_18 = arith.constant 0 : index
    %22 = vector.load %arg8[%c0_17, %c0_18] : memref<256x16xbf16, #tpu.memory_space<vmem>>, vector<256x16xbf16>
    %cst_19 = arith.constant dense<0.000000e+00> : vector<16x16xf32>
    %23 = tpu.matmul %16, %22, %cst_19 {dimension_numbers = #tpu.dot_dimension_numbers<[1], [0], [0], [1], [0, 0, 1, 1], [], []>} : vector<16x256xbf16>, vector<256x16xbf16>, vector<16x16xf32> -> vector<16x16xf32>
    %c0_20 = arith.constant 0 : index
    %c0_21 = arith.constant 0 : index
    %24 = vector.load %arg9[%c0_20, %c0_21] : memref<1x16xf32, #tpu.memory_space<vmem>>, vector<1x16xf32>
    %25 = vector.broadcast %24 : vector<1x16xf32> to vector<16x16xf32>
    %26 = arith.addf %23, %25 : vector<16x16xf32>
    %cst_22 = arith.constant 5.000000e-01 : f32
    %27 = vector.broadcast %cst_22 : f32 to vector<16x16xf32>
    %28 = arith.mulf %27, %26 : vector<16x16xf32>
    %29 = math.exp %28 : vector<16x16xf32>
    %30 = arith.mulf %29, %29 : vector<16x16xf32>
    %cst_23 = arith.constant 1.000000e+00 : f32
    %31 = vector.broadcast %cst_23 : f32 to vector<16x16xf32>
    %32 = arith.addf %31, %26 : vector<16x16xf32>
    %33 = arith.mulf %21, %21 : vector<16x16xf32>
    %34 = arith.subf %32, %33 : vector<16x16xf32>
    %35 = arith.subf %34, %30 : vector<16x16xf32>
    %cst_24 = arith.constant dense<0.000000e+00> : vector<16xf32>
    %36 = vector.multi_reduction <add>, %35, %cst_24 [1] : vector<16x16xf32> to vector<16xf32>
    %37 = vector.shape_cast %36 : vector<16xf32> to vector<16x1xf32>
    %cst_25 = arith.constant -5.000000e-01 : f32
    %38 = vector.broadcast %cst_25 : f32 to vector<16x1xf32>
    %39 = arith.mulf %38, %37 : vector<16x1xf32>
    %c0_26 = arith.constant 0 : index
    %c0_27 = arith.constant 0 : index
    %40 = vector.load %arg12[%c0_26, %c0_27] : memref<16x1xf32, #tpu.memory_space<vmem>>, vector<16x1xf32>
    tpu.vector_store %arg12[%c0_26, %c0_27], %39 {strides = array<i32>} : memref<16x1xf32, #tpu.memory_space<vmem>>, vector<16x1xf32>,
    %c0_28 = arith.constant 0 : index
    %c0_29 = arith.constant 0 : index
    %41 = vector.load %arg10[%c0_28, %c0_29] : memref<16x16xf32, #tpu.memory_space<vmem>>, vector<16x16xf32>
    %42 = arith.mulf %29, %41 : vector<16x16xf32>
    %43 = arith.addf %21, %42 : vector<16x16xf32>
    %c0_30 = arith.constant 0 : index
    %c0_31 = arith.constant 0 : index
    %44 = vector.load %arg11[%c0_30, %c0_31] : memref<16x16xf32, #tpu.memory_space<vmem>>, vector<16x16xf32>
    tpu.vector_store %arg11[%c0_30, %c0_31], %43 {strides = array<i32>} : memref<16x16xf32, #tpu.memory_space<vmem>>, vector<16x16xf32>,
    return
  }
  func.func @transform_0(%arg0: i32) -> (i32, i32) {
    %c0_i32 = arith.constant 0 : i32
    %c0_i32_0 = arith.constant 0 : i32
    return %arg0, %c0_i32 : i32, i32
  }
  func.func @transform_1(%arg0: i32) -> (i32, i32) {
    %c0_i32 = arith.constant 0 : i32
    %c0_i32_0 = arith.constant 0 : i32
    %c0_i32_1 = arith.constant 0 : i32
    return %c0_i32, %c0_i32_0 : i32, i32
  }
  func.func @transform_2(%arg0: i32) -> (i32, i32) {
    %c0_i32 = arith.constant 0 : i32
    %c0_i32_0 = arith.constant 0 : i32
    %c0_i32_1 = arith.constant 0 : i32
    return %c0_i32, %c0_i32_0 : i32, i32
  }
  func.func @transform_3(%arg0: i32) -> (i32, i32) {
    %c0_i32 = arith.constant 0 : i32
    %c0_i32_0 = arith.constant 0 : i32
    %c0_i32_1 = arith.constant 0 : i32
    return %c0_i32, %c0_i32_0 : i32, i32
  }
  func.func @transform_4(%arg0: i32) -> (i32, i32) {
    %c0_i32 = arith.constant 0 : i32
    %c0_i32_0 = arith.constant 0 : i32
    %c0_i32_1 = arith.constant 0 : i32
    return %c0_i32, %c0_i32_0 : i32, i32
  }
  func.func @transform_5(%arg0: i32) -> (i32, i32) {
    %c0_i32 = arith.constant 0 : i32
    %c0_i32_0 = arith.constant 0 : i32
    %c0_i32_1 = arith.constant 0 : i32
    return %c0_i32, %c0_i32_0 : i32, i32
  }
  func.func @transform_6(%arg0: i32) -> (i32, i32) {
    %c0_i32 = arith.constant 0 : i32
    %c0_i32_0 = arith.constant 0 : i32
    %c0_i32_1 = arith.constant 0 : i32
    return %c0_i32, %c0_i32_0 : i32, i32
  }
  func.func @transform_7(%arg0: i32) -> (i32, i32) {
    %c0_i32 = arith.constant 0 : i32
    %c0_i32_0 = arith.constant 0 : i32
    %c0_i32_1 = arith.constant 0 : i32
    return %c0_i32, %c0_i32_0 : i32, i32
  }
  func.func @transform_8(%arg0: i32) -> (i32, i32) {
    %c0_i32 = arith.constant 0 : i32
    %c0_i32_0 = arith.constant 0 : i32
    %c0_i32_1 = arith.constant 0 : i32
    return %c0_i32, %c0_i32_0 : i32, i32
  }
  func.func @transform_9(%arg0: i32) -> (i32, i32) {
    %c0_i32 = arith.constant 0 : i32
    %c0_i32_0 = arith.constant 0 : i32
    return %arg0, %c0_i32 : i32, i32
  }
  func.func @transform_10(%arg0: i32) -> (i32, i32) {
    %c0_i32 = arith.constant 0 : i32
    %c0_i32_0 = arith.constant 0 : i32
    return %arg0, %c0_i32 : i32, i32
  }
  func.func @transform_11(%arg0: i32) -> (i32, i32) {
    %c0_i32 = arith.constant 0 : i32
    %c0_i32_0 = arith.constant 0 : i32
    return %arg0, %c0_i32 : i32, i32
  }
}

</mosaic_0001>

<bundles_post_ra>
// kernel: tpu_custom_call.1
= control target key start
LH: loop header
LB: loop body
LE: loop exit
PB: predicated region body
PF: predicated region fallthrough
CT: control target
= control target key end

     0   :  { %17 = vsyncpa [#allocation3], 0  ;;  %s8084_s0 = inlined_call_operand.hbm [shape: bf16[16,2432], index: 0, kind: input, shape index: {}]   ;;  %s8085_s1 = inlined_call_operand.hbm [shape: bf16[2432,512], index: 1, kind: input, shape index: {}]   ;;  %s8086_s2 = inlined_call_operand.hbm [shape: f32[1,512], index: 2, kind: input, shape index: {}]   ;;  %s8087_s3 = inlined_call_operand.hbm [shape: bf16[512,256], index: 3, kind: input, shape index: {}]   ;;  %s8088_s4 = inlined_call_operand.hbm [shape: f32[1,256], index: 4, kind: input, shape index: {}]   ;;  %s8089_s5 = inlined_call_operand.vmem [shape: bf16[256,16], index: 5, kind: input, shape index: {}]   ;;  %s8090_s6 = inlined_call_operand.hbm [shape: f32[1,16], index: 6, kind: input, shape index: {}]   ;;  %s8091_s7 = inlined_call_operand.vmem [shape: bf16[256,16], index: 7, kind: input, shape index: {}]   ;;  %s8092_s8 = inlined_call_operand.hbm [shape: f32[1,16], index: 8, kind: input, shape index: {}]   ;;  %s8093_s9 = inlined_call_operand.hbm [shape: f32[16,16], index: 9, kind: input, shape index: {}]   ;;  %s8094_s10 = inlined_call_operand.hbm [shape: f32[16,16], index: 10, kind: output, shape index: {0}]   ;;  %s8095_s11 = inlined_call_operand.vmem [shape: f32[16,1], index: 11, kind: output, shape index: {1}]  }
   0x1   :  { %18 = vsyncpa [#allocation6], 0 }
   0x2   :  { %19 = vsyncpa [#allocation9], 0 }
   0x3   :  { %20 = vsyncpa [#allocation12], 0 }
   0x4   :  { %21 = vsyncpa [#allocation15], 0 }
   0x5   :  { %22 = vsyncpa [#allocation4], 0  ;;  %s7768_s17 = smov [#allocation5]  }
   0x6   :  { %s40_s18 = sshll.u32 %s7768_s17, 4  ;;  %s41_s18 = int_to_ptr.vmem [resolvable:$true] %s40_s18 }
   0x7   :  { %s7584_s19 = scalar_lea.vmem %s41_s18, 77824  ;;  %p7589_p1 = scmp.lt.s32.totalorder %s41_s18, %s41_s18 }
   0x8   :  { %p7585_p0 = scmp.ne.s32.totalorder %s41_s18, %s7584_s19  ;;  %p7590_p2 = scmp.lt.s32.totalorder %s7584_s19, %s7584_s19 }
   0xa   :  { %p7591_p3 = por %p7590_p2, %p7589_p1 }
   0xc   :  { %p7592_p4 = pnand %p7591_p3, %p7585_p0 }
   0xe   :  { %7595 = shalt.err (!%p7592_p4)
}
   0xf   :  { %s7769_s20 = smov 256   ;;  %s7770_s21 = smov 16  }
  0x10   :  { %46 = dma.hbm_to_vmem [thread:$0]  %s8085_s1, 77824, %s41_s18, [#allocation6], %s7769_s20, %s7769_s20, %s7770_s21  }
  0x11   :  { %s7771_s24 = smov [#allocation8]  }
  0x12   :  { %s62_s25 = sshll.u32 %s7771_s24, 4  ;;  %s63_s25 = int_to_ptr.vmem [resolvable:$true] %s62_s25 }
  0x13   :  { %s7604_s26 = scalar_lea.vmem %s63_s25, 8192  ;;  %p7609_p6 = scmp.lt.s32.totalorder %s63_s25, %s63_s25 }
  0x14   :  { %p7605_p5 = scmp.ne.s32.totalorder %s63_s25, %s7604_s26  ;;  %p7610_p7 = scmp.lt.s32.totalorder %s7604_s26, %s7604_s26 }
  0x16   :  { %p7611_p8 = por %p7610_p7, %p7609_p6 }
  0x18   :  { %p7612_p9 = pnand %p7611_p8, %p7605_p5 }
  0x1a   :  { %7615 = shalt.err (!%p7612_p9)
}
  0x1b   :  { %s7772_s27 = smov 128   ;;  %s7773_s28 = smov 8  }
  0x1c   :  { %68 = dma.hbm_to_vmem [thread:$0]  %s8087_s3, 8192, %s63_s25, [#allocation9], %s7772_s27, %s7772_s27, %s7773_s28  }
  0x1d   :  { %s7774_s1 = smov [#allocation11]   ;;  %s7775_s13 = smov [#allocation2]  }
  0x1e   :  { %s87_s12 = sshll.u32 %s7774_s1, 4  ;;  %s28_s14 = sshll.u32 %s7775_s13, 4  ;;  %s88_s12 = int_to_ptr.vmem [resolvable:$true] %s87_s12  ;;  %s29_s14 = int_to_ptr.vmem [resolvable:$true] %s28_s14 }
  0x1f   :  { %s7624_s15 = scalar_lea.vmem %s88_s12, 16  ;;  %s7628_s16 = scalar_lea.vmem %s88_s12, 32 }
  0x20   :  { %p7625_p10 = scmp.ne.s32.totalorder %s88_s12, %s7624_s15  ;;  %p7629_p11 = scmp.lt.s32.totalorder %s88_s12, %s88_s12 }
  0x21   :  { %p7630_p12 = scmp.lt.s32.totalorder %s7628_s16, %s7624_s15 }
  0x23   :  { %p7631_p13 = por %p7630_p12, %p7629_p11 }
  0x25   :  { %p7632_p0 = pnand %p7631_p13, %p7625_p10 }
  0x27   :  { %7635 = shalt.err (!%p7632_p0)
}
  0x28   :  { %90 = dma.hbm_to_vmem [thread:$0]  %s8090_s6, 16, %s88_s12, [#allocation12]  }
  0x29   :  { %s7644_s19 = scalar_lea.vmem %s29_s14, 2432  ;;  %p7649_p2 = scmp.lt.s32.totalorder %s29_s14, %s29_s14 }
  0x2a   :  { %p7645_p1 = scmp.ne.s32.totalorder %s29_s14, %s7644_s19  ;;  %p7650_p3 = scmp.lt.s32.totalorder %s7644_s19, %s7644_s19 }
  0x2c   :  { %p7651_p4 = por %p7650_p3, %p7649_p2 }
  0x2e   :  { %p7652_p5 = pnand %p7651_p4, %p7645_p1 }
  0x30   :  { %7655 = shalt.err (!%p7652_p5)
}
  0x31   :  { %s7776_s3 = smov 1216   ;;  %s7777_s20 = smov 76  }
  0x32   :  { %34 = dma.hbm_to_vmem [thread:$0]  %s8084_s0, 2432, %s29_s14, [#allocation3], %s7776_s3, %s7776_s3, %s7777_s20  }
  0x33   :  { %s7778_s23 = smov [#allocation7]   ;;  %s7779_s25 = smov [#allocation10]  }
  0x34   :  { %s53_s24 = sshll.u32 %s7778_s23, 4  ;;  %s75_s26 = sshll.u32 %s7779_s25, 4  ;;  %s54_s24 = int_to_ptr.vmem [resolvable:$true] %s53_s24  ;;  %s76_s26 = int_to_ptr.vmem [resolvable:$true] %s75_s26 }
  0x35   :  { %s7664_s6 = scalar_lea.vmem %s54_s24, 64  ;;  %p7669_p7 = scmp.lt.s32.totalorder %s54_s24, %s54_s24 }
  0x36   :  { %p7665_p6 = scmp.ne.s32.totalorder %s54_s24, %s7664_s6  ;;  %p7670_p8 = scmp.lt.s32.totalorder %s7664_s6, %s7664_s6 }
  0x38   :  { %p7671_p9 = por %p7670_p8, %p7669_p7 }
  0x3a   :  { %p7672_p10 = pnand %p7671_p9, %p7665_p6 }
  0x3c   :  { %7675 = shalt.err (!%p7672_p10)
}
  0x3d   :  { %56 = dma.hbm_to_vmem [thread:$0]  %s8086_s2, 64, %s54_s24, [#allocation6]  }
  0x3e   :  { %s7684_s1 = scalar_lea.vmem %s76_s26, 32  ;;  %p7689_p12 = scmp.lt.s32.totalorder %s76_s26, %s76_s26 }
  0x3f   :  { %p7685_p11 = scmp.ne.s32.totalorder %s76_s26, %s7684_s1  ;;  %p7690_p13 = scmp.lt.s32.totalorder %s7684_s1, %s7684_s1 }
  0x41   :  { %p7691_p0 = por %p7690_p13, %p7689_p12 }
  0x43   :  { %p7692_p1 = pnand %p7691_p0, %p7685_p11 }
  0x45   :  { %7695 = shalt.err (!%p7692_p1)
}
  0x46   :  { %78 = dma.hbm_to_vmem [thread:$0]  %s8088_s4, 32, %s76_s26, [#allocation9]  }
  0x47   :  { %s7780_s13 = smov [#allocation13]   ;;  %s7781_s15 = smov [#allocation14]  }
  0x48   :  { %s99_s14 = sshll.u32 %s7780_s13, 4  ;;  %s108_s16 = sshll.u32 %s7781_s15, 4  ;;  %s100_s14 = int_to_ptr.vmem [resolvable:$true] %s99_s14  ;;  %s109_s16 = int_to_ptr.vmem [resolvable:$true] %s108_s16 }
  0x49   :  { %s7704_s17 = scalar_lea.vmem %s100_s14, 16  ;;  %s7708_s2 = scalar_lea.vmem %s100_s14, 32 }
  0x4a   :  { %p7705_p2 = scmp.ne.s32.totalorder %s100_s14, %s7704_s17  ;;  %p7709_p3 = scmp.lt.s32.totalorder %s100_s14, %s100_s14 }
  0x4b   :  { %p7710_p4 = scmp.lt.s32.totalorder %s7708_s2, %s7704_s17 }
  0x4d   :  { %p7711_p5 = por %p7710_p4, %p7709_p3 }
  0x4f   :  { %p7712_p6 = pnand %p7711_p5, %p7705_p2 }
  0x51   :  { %7715 = shalt.err (!%p7712_p6)
}
  0x52   :  { %102 = dma.hbm_to_vmem [thread:$0]  %s8092_s8, 16, %s100_s14, [#allocation12]  }
  0x53   :  { %s7724_s3 = scalar_lea.vmem %s109_s16, 256  ;;  %p7729_p8 = scmp.lt.s32.totalorder %s109_s16, %s109_s16 }
  0x54   :  { %p7725_p7 = scmp.ne.s32.totalorder %s109_s16, %s7724_s3  ;;  %p7730_p9 = scmp.lt.s32.totalorder %s7724_s3, %s7724_s3 }
  0x56   :  { %p7731_p10 = por %p7730_p9, %p7729_p8 }
  0x58   :  { %p7732_p11 = pnand %p7731_p10, %p7725_p7 }
  0x5a   :  { %7735 = shalt.err (!%p7732_p11)
}
  0x5b   :  { %114 = dma.hbm_to_vmem [thread:$0]  %s8093_s9, 256, %s109_s16, [#allocation15], %s7772_s27, %s7772_s27, %s7773_s28  }
  0x5c   :  { %7756 = dma.done.wait [#allocation3], 2432  }
  0x5d   :  { %7757 = vsyncadd [#allocation3], 4294964864 }
  0x5e   :  { %7758 = dma.done.wait [#allocation6], 77888  }
  0x5f   :  { %7759 = vsyncadd [#allocation6], 4294889408 }
  0x60   :  { %7760 = dma.done.wait [#allocation9], 8224  }
  0x61   :  { %7761 = vsyncadd [#allocation9], 4294959072 }
  0x62   :  { %7762 = dma.done.wait [#allocation12], 32  }
  0x63   :  { %7763 = vsyncadd [#allocation12], 4294967264 }
  0x64   :  { %7764 = dma.done.wait [#allocation15], 256  }
  0x65   :  { %7765 = vsyncadd [#allocation15], 4294967040  ;;  %v6484_v0 = vld [vmem:[#allocation5 + $0xe4] ss:$16 sps:$4 sm:$0xff]   ;;  %v6488_v2 = vld [vmem:[#allocation5 + $0xe0] ss:$16 sps:$4 sm:$0xff]  }
  0x66   :  { %v6486_v1 = vld [vmem:[#allocation5 + $0x2e4] ss:$16 sps:$4 sm:$0xff]   ;;  %3926 = vmatprep.subr.bf16.mxu0 %v6484_v0  ;;  %v6489_v3 = vld [vmem:[#allocation5 + $0x2e0] ss:$16 sps:$4 sm:$0xff]   ;;  %v6582_v49 = vld [vmem:[#allocation2 + $0x4] ss:$76 sps:$4 sm:$0xff]  }
  0x67   :  { %3969 = vmatprep.subr.bf16.mxu1 %v6486_v1  ;;  %v6490_v4 = vld [vmem:[#allocation5 + $0xc4] ss:$16 sps:$4 sm:$0xff]   ;;  %3927 = vmatpush1.bf16.msra.mxu0 %v6488_v2  ;;  %v6494_v6 = vld [vmem:[#allocation5 + $0xc0] ss:$16 sps:$4 sm:$0xff]   ;;  %vm5654_vm0 = vcmask 130048  }
  0x68   :  { %3970 = vmatpush1.bf16.msra.mxu1 %v6489_v3  ;;  %v6492_v5 = vld [vmem:[#allocation5 + $0x2c4] ss:$16 sps:$4 sm:$0xff]   ;;  %3928 = vmatprep.subr.bf16.mxu0 %v6490_v4  ;;  %v6495_v7 = vld [vmem:[#allocation5 + $0x2c0] ss:$16 sps:$4 sm:$0xff]  }
  0x69   :  { %3971 = vmatprep.subr.bf16.mxu1 %v6492_v5  ;;  %v6496_v8 = vld [vmem:[#allocation5 + $0xa4] ss:$16 sps:$4 sm:$0xff]   ;;  %v6500_v10 = vld [vmem:[#allocation5 + $0xa0] ss:$16 sps:$4 sm:$0xff]   ;;  %3958 = vmatprep.mubr.bf16.mxu0 %v6582_v49 }
  0x6a   :  { %v6498_v9 = vld [vmem:[#allocation5 + $0x2a4] ss:$16 sps:$4 sm:$0xff]   ;;  %v6501_v11 = vld [vmem:[#allocation5 + $0x2a0] ss:$16 sps:$4 sm:$0xff]  }
  0x6b   :  { %3929 = vmatpush1.bf16.msra.mxu0 %v6494_v6  ;;  %v6502_v12 = vld [vmem:[#allocation5 + $0x84] ss:$16 sps:$4 sm:$0xff]   ;;  %v6506_v14 = vld [vmem:[#allocation5 + $0x80] ss:$16 sps:$4 sm:$0xff]  }
  0x6c   :  { %3972 = vmatpush1.bf16.msra.mxu1 %v6495_v7  ;;  %3930 = vmatprep.subr.bf16.mxu0 %v6496_v8  ;;  %v6504_v13 = vld [vmem:[#allocation5 + $0x284] ss:$16 sps:$4 sm:$0xff]   ;;  %v6507_v15 = vld [vmem:[#allocation5 + $0x280] ss:$16 sps:$4 sm:$0xff]  }
  0x6d   :  { %3973 = vmatprep.subr.bf16.mxu1 %v6498_v9  ;;  %v6508_v16 = vld [vmem:[#allocation5 + $0x64] ss:$16 sps:$4 sm:$0xff]   ;;  %v6512_v18 = vld [vmem:[#allocation5 + $0x60] ss:$16 sps:$4 sm:$0xff]  }
  0x6e   :  { %v6510_v17 = vld [vmem:[#allocation5 + $0x264] ss:$16 sps:$4 sm:$0xff]   ;;  %v6513_v19 = vld [vmem:[#allocation5 + $0x260] ss:$16 sps:$4 sm:$0xff]  }
  0x6f   :  { %3931 = vmatpush1.bf16.msra.mxu0 %v6500_v10  ;;  %v6514_v20 = vld [vmem:[#allocation5 + $0x44] ss:$16 sps:$4 sm:$0xff]   ;;  %v6518_v22 = vld [vmem:[#allocation5 + $0x40] ss:$16 sps:$4 sm:$0xff]  }
  0x70   :  { %3974 = vmatpush1.bf16.msra.mxu1 %v6501_v11  ;;  %3932 = vmatprep.subr.bf16.mxu0 %v6502_v12  ;;  %v6516_v21 = vld [vmem:[#allocation5 + $0x244] ss:$16 sps:$4 sm:$0xff]   ;;  %v6519_v23 = vld [vmem:[#allocation5 + $0x240] ss:$16 sps:$4 sm:$0xff]  }
  0x71   :  { %3975 = vmatprep.subr.bf16.mxu1 %v6504_v13  ;;  %v6520_v24 = vld [vmem:[#allocation5 + $0x24] ss:$16 sps:$4 sm:$0xff]   ;;  %v6524_v26 = vld [vmem:[#allocation5 + $0x20] ss:$16 sps:$4 sm:$0xff]  }
  0x72   :  { %v6522_v25 = vld [vmem:[#allocation5 + $0x224] ss:$16 sps:$4 sm:$0xff]   ;;  %v6525_v27 = vld [vmem:[#allocation5 + $0x220] ss:$16 sps:$4 sm:$0xff]  }
  0x73   :  { %3933 = vmatpush1.bf16.msra.mxu0 %v6506_v14  ;;  %v6526_v28 = vld [vmem:[#allocation5 + $0x4] ss:$16 sps:$4 sm:$0xff]   ;;  %v6530_v30 = vld [vmem:[#allocation5] ss:$16 sps:$4 sm:$0xff]  }
  0x74   :  { %3976 = vmatpush1.bf16.msra.mxu1 %v6507_v15  ;;  %3934 = vmatprep.subr.bf16.mxu0 %v6508_v16  ;;  %v6528_v29 = vld [vmem:[#allocation5 + $0x204] ss:$16 sps:$4 sm:$0xff]   ;;  %v6531_v31 = vld [vmem:[#allocation5 + $0x200] ss:$16 sps:$4 sm:$0xff]  }
  0x75   :  { %3977 = vmatprep.subr.bf16.mxu1 %v6510_v17  ;;  %v6532_v32 = vld [vmem:[#allocation5 + $0x1e4] ss:$16 sps:$4 sm:$0xff]   ;;  %v6536_v34 = vld [vmem:[#allocation5 + $0x1e0] ss:$16 sps:$4 sm:$0xff]  }
  0x76   :  { %v6534_v33 = vld [vmem:[#allocation5 + $0x3e4] ss:$16 sps:$4 sm:$0xff]   ;;  %v6537_v35 = vld [vmem:[#allocation5 + $0x3e0] ss:$16 sps:$4 sm:$0xff]  }
  0x77   :  { %3935 = vmatpush1.bf16.msra.mxu0 %v6512_v18  ;;  %v6538_v36 = vld [vmem:[#allocation5 + $0x1c4] ss:$16 sps:$4 sm:$0xff]   ;;  %v6542_v38 = vld [vmem:[#allocation5 + $0x1c0] ss:$16 sps:$4 sm:$0xff]  }
  0x78   :  { %3978 = vmatpush1.bf16.msra.mxu1 %v6513_v19  ;;  %3936 = vmatprep.subr.bf16.mxu0 %v6514_v20  ;;  %v6540_v37 = vld [vmem:[#allocation5 + $0x3c4] ss:$16 sps:$4 sm:$0xff]   ;;  %v6543_v39 = vld [vmem:[#allocation5 + $0x3c0] ss:$16 sps:$4 sm:$0xff]  }
  0x79   :  { %3979 = vmatprep.subr.bf16.mxu1 %v6516_v21  ;;  %v6544_v40 = vld [vmem:[#allocation5 + $0x1a4] ss:$16 sps:$4 sm:$0xff]   ;;  %v6548_v42 = vld [vmem:[#allocation5 + $0x1a0] ss:$16 sps:$4 sm:$0xff]  }
  0x7a   :  { %v6546_v41 = vld [vmem:[#allocation5 + $0x3a4] ss:$16 sps:$4 sm:$0xff]   ;;  %v6549_v43 = vld [vmem:[#allocation5 + $0x3a0] ss:$16 sps:$4 sm:$0xff]  }
  0x7b   :  { %3937 = vmatpush1.bf16.msra.mxu0 %v6518_v22  ;;  %v6550_v44 = vld [vmem:[#allocation5 + $0x184] ss:$16 sps:$4 sm:$0xff]   ;;  %v6554_v46 = vld [vmem:[#allocation5 + $0x180] ss:$16 sps:$4 sm:$0xff]  }
  0x7c   :  { %3980 = vmatpush1.bf16.msra.mxu1 %v6519_v23  ;;  %3938 = vmatprep.subr.bf16.mxu0 %v6520_v24  ;;  %v6552_v45 = vld [vmem:[#allocation5 + $0x384] ss:$16 sps:$4 sm:$0xff]   ;;  %v6555_v47 = vld [vmem:[#allocation5 + $0x380] ss:$16 sps:$4 sm:$0xff]  }
  0x7d   :  { %3981 = vmatprep.subr.bf16.mxu1 %v6522_v25  ;;  %v6556_v48 = vld [vmem:[#allocation5 + $0x164] ss:$16 sps:$4 sm:$0xff]   ;;  %v6560_v52 = vld [vmem:[#allocation5 + $0x160] ss:$16 sps:$4 sm:$0xff]  }
  0x7e   :  { %v6558_v50 = vld [vmem:[#allocation5 + $0x364] ss:$16 sps:$4 sm:$0xff]   ;;  %v6561_v53 = vld [vmem:[#allocation5 + $0x360] ss:$16 sps:$4 sm:$0xff]  }
  0x7f   :  { %3939 = vmatpush1.bf16.msra.mxu0 %v6524_v26  ;;  %v6585_v51 = vld [vmem:[#allocation2 + $0xc] ss:$76 sps:$4 sm:$0xff]   ;;  %v6583_v5 = vld [vmem:[#allocation2 + $0x8] ss:$76 sps:$4 sm:$0xff]  }
  0x80   :  { %3982 = vmatpush1.bf16.msra.mxu1 %v6525_v27  ;;  %3940 = vmatprep.subr.bf16.mxu0 %v6526_v28  ;;  %v6562_v54 = vld [vmem:[#allocation5 + $0x144] ss:$16 sps:$4 sm:$0xff]   ;;  %v6566_v56 = vld [vmem:[#allocation5 + $0x140] ss:$16 sps:$4 sm:$0xff]  }
  0x81   :  { %3983 = vmatprep.subr.bf16.mxu1 %v6528_v29  ;;  %4001 = vmatprep.mubr.bf16.mxu1 %v6585_v51  ;;  %v6564_v55 = vld [vmem:[#allocation5 + $0x344] ss:$16 sps:$4 sm:$0xff]   ;;  %v6567_v57 = vld [vmem:[#allocation5 + $0x340] ss:$16 sps:$4 sm:$0xff]  }
  0x82   :  { %v6568_v58 = vld [vmem:[#allocation5 + $0x124] ss:$16 sps:$4 sm:$0xff]   ;;  %v6572_v60 = vld [vmem:[#allocation5 + $0x120] ss:$16 sps:$4 sm:$0xff]  }
  0x83   :  { %3941 = vmatpush1.bf16.msra.mxu0 %v6530_v30  ;;  %v6570_v59 = vld [vmem:[#allocation5 + $0x324] ss:$16 sps:$4 sm:$0xff]   ;;  %v6573_v61 = vld [vmem:[#allocation5 + $0x320] ss:$16 sps:$4 sm:$0xff]  }
  0x84   :  { %3984 = vmatpush1.bf16.msra.mxu1 %v6531_v31  ;;  %3942 = vmatprep.subr.bf16.mxu0 %v6532_v32  ;;  %v6574_v62 = vld [vmem:[#allocation5 + $0x104] ss:$16 sps:$4 sm:$0xff]   ;;  %v6578_v0 = vld [vmem:[#allocation5 + $0x100] ss:$16 sps:$4 sm:$0xff]  }
  0x85   :  { %3985 = vmatprep.subr.bf16.mxu1 %v6534_v33  ;;  %v6576_v63 = vld [vmem:[#allocation5 + $0x304] ss:$16 sps:$4 sm:$0xff]   ;;  %v6579_v1 = vld [vmem:[#allocation5 + $0x300] ss:$16 sps:$4 sm:$0xff]  }
  0x86   :  { %v6588_v2 = vld [vmem:[#allocation5 + $0x4e4] ss:$16 sps:$4 sm:$0xff]   ;;  %v6586_v6 = vld [vmem:[#allocation5 + $0x4e0] ss:$16 sps:$4 sm:$0xff]  }
  0x87   :  { %3943 = vmatpush2.bf16.msra.mxu0 %v6536_v34  ;;  %v6591_v3 = vld [vmem:[#allocation5 + $0x6e4] ss:$16 sps:$4 sm:$0xff]   ;;  %v6589_v7 = vld [vmem:[#allocation5 + $0x6e0] ss:$16 sps:$4 sm:$0xff]   ;;  %v6684_v34 = vld [vmem:[#allocation2 + $0x14] ss:$76 sps:$4 sm:$0xff]  }
  0x88   :  { %3986 = vmatpush2.bf16.msra.mxu1 %v6537_v35  ;;  %3944 = vmatprep.subr.bf16.mxu0 %v6538_v36  ;;  %v6580_v4 = vld [vmem:[#allocation2] ss:$76 sps:$4 sm:$0xff]   ;;  %v6592_v10 = vld [vmem:[#allocation5 + $0x4c0] ss:$16 sps:$4 sm:$0xff]  }
  0x89   :  { %3987 = vmatprep.subr.bf16.mxu1 %v6540_v37  ;;  %v6594_v8 = vld [vmem:[#allocation5 + $0x4c4] ss:$16 sps:$4 sm:$0xff]   ;;  %v6595_v11 = vld [vmem:[#allocation5 + $0x6c0] ss:$16 sps:$4 sm:$0xff]  }
  0x8a   :  { %v6597_v9 = vld [vmem:[#allocation5 + $0x6c4] ss:$16 sps:$4 sm:$0xff]   ;;  %v6598_v14 = vld [vmem:[#allocation5 + $0x4a0] ss:$16 sps:$4 sm:$0xff]  }
  0x8b   :  { %3945 = vmatpush2.bf16.msra.mxu0 %v6542_v38  ;;  %v6600_v12 = vld [vmem:[#allocation5 + $0x4a4] ss:$16 sps:$4 sm:$0xff]   ;;  %v6601_v15 = vld [vmem:[#allocation5 + $0x6a0] ss:$16 sps:$4 sm:$0xff]  }
  0x8c   :  { %3988 = vmatpush2.bf16.msra.mxu1 %v6543_v39  ;;  %3946 = vmatprep.subr.bf16.mxu0 %v6544_v40  ;;  %v6603_v13 = vld [vmem:[#allocation5 + $0x6a4] ss:$16 sps:$4 sm:$0xff]   ;;  %v6604_v18 = vld [vmem:[#allocation5 + $0x480] ss:$16 sps:$4 sm:$0xff]  }
  0x8d   :  { %3989 = vmatprep.subr.bf16.mxu1 %v6546_v41  ;;  %v6606_v16 = vld [vmem:[#allocation5 + $0x484] ss:$16 sps:$4 sm:$0xff]   ;;  %v6607_v19 = vld [vmem:[#allocation5 + $0x680] ss:$16 sps:$4 sm:$0xff]  }
  0x8e   :  { %v6609_v17 = vld [vmem:[#allocation5 + $0x684] ss:$16 sps:$4 sm:$0xff]   ;;  %v6610_v22 = vld [vmem:[#allocation5 + $0x460] ss:$16 sps:$4 sm:$0xff]  }
  0x8f   :  { %3947 = vmatpush2.bf16.msra.mxu0 %v6548_v42  ;;  %v6612_v20 = vld [vmem:[#allocation5 + $0x464] ss:$16 sps:$4 sm:$0xff]   ;;  %v6613_v23 = vld [vmem:[#allocation5 + $0x660] ss:$16 sps:$4 sm:$0xff]  }
  0x90   :  { %3990 = vmatpush2.bf16.msra.mxu1 %v6549_v43  ;;  %3948 = vmatprep.subr.bf16.mxu0 %v6550_v44  ;;  %v6615_v21 = vld [vmem:[#allocation5 + $0x664] ss:$16 sps:$4 sm:$0xff]   ;;  %v6616_v26 = vld [vmem:[#allocation5 + $0x440] ss:$16 sps:$4 sm:$0xff]  }
  0x91   :  { %3991 = vmatprep.subr.bf16.mxu1 %v6552_v45  ;;  %v6618_v24 = vld [vmem:[#allocation5 + $0x444] ss:$16 sps:$4 sm:$0xff]   ;;  %v6619_v27 = vld [vmem:[#allocation5 + $0x640] ss:$16 sps:$4 sm:$0xff]  }
  0x92   :  { %v6621_v25 = vld [vmem:[#allocation5 + $0x644] ss:$16 sps:$4 sm:$0xff]   ;;  %v6622_v30 = vld [vmem:[#allocation5 + $0x420] ss:$16 sps:$4 sm:$0xff]  }
  0x93   :  { %3949 = vmatpush2.bf16.msra.mxu0 %v6554_v46  ;;  %v6624_v28 = vld [vmem:[#allocation5 + $0x424] ss:$16 sps:$4 sm:$0xff]   ;;  %v6625_v31 = vld [vmem:[#allocation5 + $0x620] ss:$16 sps:$4 sm:$0xff]  }
  0x94   :  { %3992 = vmatpush2.bf16.msra.mxu1 %v6555_v47  ;;  %3950 = vmatprep.subr.bf16.mxu0 %v6556_v48  ;;  %v6627_v29 = vld [vmem:[#allocation5 + $0x624] ss:$16 sps:$4 sm:$0xff]   ;;  %v6628_v36 = vld [vmem:[#allocation5 + $0x400] ss:$16 sps:$4 sm:$0xff]  }
  0x95   :  { %3993 = vmatprep.subr.bf16.mxu1 %v6558_v50  ;;  %v6630_v32 = vld [vmem:[#allocation5 + $0x404] ss:$16 sps:$4 sm:$0xff]   ;;  %v6631_v37 = vld [vmem:[#allocation5 + $0x600] ss:$16 sps:$4 sm:$0xff]  }
  0x96   :  { %v6633_v33 = vld [vmem:[#allocation5 + $0x604] ss:$16 sps:$4 sm:$0xff]   ;;  %v6634_v40 = vld [vmem:[#allocation5 + $0x5e0] ss:$16 sps:$4 sm:$0xff]  }
  0x97   :  { %3951 = vmatpush2.bf16.msra.mxu0 %v6560_v52  ;;  %v6687_v35 = vld [vmem:[#allocation2 + $0x1c] ss:$76 sps:$4 sm:$0xff]  }
  0x98   :  { %3994 = vmatpush2.bf16.msra.mxu1 %v6561_v53  ;;  %3952 = vmatprep.subr.bf16.mxu0 %v6562_v54  ;;  %v6636_v38 = vld [vmem:[#allocation5 + $0x5e4] ss:$16 sps:$4 sm:$0xff]   ;;  %v6637_v41 = vld [vmem:[#allocation5 + $0x7e0] ss:$16 sps:$4 sm:$0xff]  }
  0x99   :  { %3995 = vmatprep.subr.bf16.mxu1 %v6564_v55  ;;  %v6639_v39 = vld [vmem:[#allocation5 + $0x7e4] ss:$16 sps:$4 sm:$0xff]   ;;  %v6640_v44 = vld [vmem:[#allocation5 + $0x5c0] ss:$16 sps:$4 sm:$0xff]  }
  0x9a   :  { %v6642_v42 = vld [vmem:[#allocation5 + $0x5c4] ss:$16 sps:$4 sm:$0xff]   ;;  %v6643_v45 = vld [vmem:[#allocation5 + $0x7c0] ss:$16 sps:$4 sm:$0xff]  }
  0x9b   :  { %3953 = vmatpush2.bf16.msra.mxu0 %v6566_v56  ;;  %v6645_v43 = vld [vmem:[#allocation5 + $0x7c4] ss:$16 sps:$4 sm:$0xff]   ;;  %v6646_v48 = vld [vmem:[#allocation5 + $0x5a0] ss:$16 sps:$4 sm:$0xff]  }
  0x9c   :  { %3996 = vmatpush2.bf16.msra.mxu1 %v6567_v57  ;;  %3954 = vmatprep.subr.bf16.mxu0 %v6568_v58  ;;  %v6648_v46 = vld [vmem:[#allocation5 + $0x5a4] ss:$16 sps:$4 sm:$0xff]   ;;  %v6649_v49 = vld [vmem:[#allocation5 + $0x7a0] ss:$16 sps:$4 sm:$0xff]  }
  0x9d   :  { %3997 = vmatprep.subr.bf16.mxu1 %v6570_v59  ;;  %v6651_v47 = vld [vmem:[#allocation5 + $0x7a4] ss:$16 sps:$4 sm:$0xff]   ;;  %v6652_v52 = vld [vmem:[#allocation5 + $0x580] ss:$16 sps:$4 sm:$0xff]  }
  0x9e   :  { %v6654_v50 = vld [vmem:[#allocation5 + $0x584] ss:$16 sps:$4 sm:$0xff]   ;;  %v6655_v53 = vld [vmem:[#allocation5 + $0x780] ss:$16 sps:$4 sm:$0xff]  }
  0x9f   :  { %3955 = vmatpush2.bf16.msra.mxu0 %v6572_v60  ;;  %v6657_v51 = vld [vmem:[#allocation5 + $0x784] ss:$16 sps:$4 sm:$0xff]   ;;  %v6658_v56 = vld [vmem:[#allocation5 + $0x560] ss:$16 sps:$4 sm:$0xff]  }
  0xa0   :  { %3998 = vmatpush2.bf16.msra.mxu1 %v6573_v61  ;;  %3956 = vmatprep.subr.bf16.mxu0 %v6574_v62  ;;  %v6660_v54 = vld [vmem:[#allocation5 + $0x564] ss:$16 sps:$4 sm:$0xff]   ;;  %v6661_v57 = vld [vmem:[#allocation5 + $0x760] ss:$16 sps:$4 sm:$0xff]  }
  0xa1   :  { %3999 = vmatprep.subr.bf16.mxu1 %v6576_v63  ;;  %v6663_v55 = vld [vmem:[#allocation5 + $0x764] ss:$16 sps:$4 sm:$0xff]   ;;  %v6664_v60 = vld [vmem:[#allocation5 + $0x540] ss:$16 sps:$4 sm:$0xff]  }
  0xa2   :  { %v6666_v58 = vld [vmem:[#allocation5 + $0x544] ss:$16 sps:$4 sm:$0xff]   ;;  %v6667_v61 = vld [vmem:[#allocation5 + $0x740] ss:$16 sps:$4 sm:$0xff]  }
  0xa3   :  { %3957 = vmatpush2.bf16.msra.mxu0 %v6578_v0  ;;  %v6669_v59 = vld [vmem:[#allocation5 + $0x744] ss:$16 sps:$4 sm:$0xff]   ;;  %v6670_v0 = vld [vmem:[#allocation5 + $0x520] ss:$16 sps:$4 sm:$0xff]  }
  0xa4   :  { %4000 = vmatpush2.bf16.msra.mxu1 %v6579_v1  ;;  %4012 = vmatprep.subr.bf16.mxu0 %v6588_v2  ;;  %v6672_v62 = vld [vmem:[#allocation5 + $0x524] ss:$16 sps:$4 sm:$0xff]   ;;  %v6673_v1 = vld [vmem:[#allocation5 + $0x720] ss:$16 sps:$4 sm:$0xff]  }
  0xa5   :  { %4055 = vmatprep.subr.bf16.mxu1 %v6591_v3  ;;  %v6675_v63 = vld [vmem:[#allocation5 + $0x724] ss:$16 sps:$4 sm:$0xff]  }
  0xa6   :  { %3959 = vmatmul.mubr.bf16.vlgmr.msra.gmra.mxu0 %v6580_v4  ;;  %v6678_v2 = vld [vmem:[#allocation5 + $0x504] ss:$16 sps:$4 sm:$0xff]   ;;  %v6676_v4 = vld [vmem:[#allocation5 + $0x500] ss:$16 sps:$4 sm:$0xff]  }
  0xa7   :  { %4002 = vmatmul.mubr.bf16.vlgmr.msra.gmra.mxu1 %v6583_v5  ;;  %4013 = vmatpush1.bf16.msra.mxu0 %v6586_v6  ;;  %v6681_v3 = vld [vmem:[#allocation5 + $0x704] ss:$16 sps:$4 sm:$0xff]   ;;  %v6679_v5 = vld [vmem:[#allocation5 + $0x700] ss:$16 sps:$4 sm:$0xff]  }
  0xa8   :  { %4056 = vmatpush1.bf16.msra.mxu1 %v6589_v7  ;;  %4014 = vmatprep.subr.bf16.mxu0 %v6594_v8  ;;  %v6690_v6 = vld [vmem:[#allocation5 + $0x8e4] ss:$16 sps:$4 sm:$0xff]  }
  0xa9   :  { %4057 = vmatprep.subr.bf16.mxu1 %v6597_v9  ;;  %4044 = vmatprep.mubr.bf16.mxu0 %v6684_v34  ;;  %v6693_v7 = vld [vmem:[#allocation5 + $0xae4] ss:$16 sps:$4 sm:$0xff]   ;;  %v6685_v9 = vld [vmem:[#allocation2 + $0x18] ss:$76 sps:$4 sm:$0xff]  }
  0xaa   :  { %4087 = vmatprep.mubr.bf16.mxu1 %v6687_v35  ;;  %v6682_v8 = vld [vmem:[#allocation2 + $0x10] ss:$76 sps:$4 sm:$0xff]  }
  0xab   :  { %4015 = vmatpush1.bf16.msra.mxu0 %v6592_v10  ;;  %v6688_v10 = vld [vmem:[#allocation5 + $0x8e0] ss:$16 sps:$4 sm:$0xff]   ;;  %v6726_v34 = vld [vmem:[#allocation5 + $0x824] ss:$16 sps:$4 sm:$0xff]  }
  0xac   :  { %4058 = vmatpush1.bf16.msra.mxu1 %v6595_v11  ;;  %4016 = vmatprep.subr.bf16.mxu0 %v6600_v12  ;;  %v6691_v11 = vld [vmem:[#allocation5 + $0xae0] ss:$16 sps:$4 sm:$0xff]   ;;  %v6696_v12 = vld [vmem:[#allocation5 + $0x8c4] ss:$16 sps:$4 sm:$0xff]  }
  0xad   :  { %4059 = vmatprep.subr.bf16.mxu1 %v6603_v13  ;;  %v6699_v13 = vld [vmem:[#allocation5 + $0xac4] ss:$16 sps:$4 sm:$0xff]  }
  0xae   :  { %v6729_v35 = vld [vmem:[#allocation5 + $0xa24] ss:$16 sps:$4 sm:$0xff]  }
  0xaf   :  { %4017 = vmatpush1.bf16.msra.mxu0 %v6598_v14  ;;  %v6694_v14 = vld [vmem:[#allocation5 + $0x8c0] ss:$16 sps:$4 sm:$0xff]  }
  0xb0   :  { %4060 = vmatpush1.bf16.msra.mxu1 %v6601_v15  ;;  %4018 = vmatprep.subr.bf16.mxu0 %v6606_v16  ;;  %v6697_v15 = vld [vmem:[#allocation5 + $0xac0] ss:$16 sps:$4 sm:$0xff]   ;;  %v6702_v16 = vld [vmem:[#allocation5 + $0x8a4] ss:$16 sps:$4 sm:$0xff]  }
  0xb1   :  { %4061 = vmatprep.subr.bf16.mxu1 %v6609_v17  ;;  %v6705_v17 = vld [vmem:[#allocation5 + $0xaa4] ss:$16 sps:$4 sm:$0xff]  }
  0xb3   :  { %4019 = vmatpush1.bf16.msra.mxu0 %v6604_v18  ;;  %v6700_v18 = vld [vmem:[#allocation5 + $0x8a0] ss:$16 sps:$4 sm:$0xff]  }
  0xb4   :  { %4062 = vmatpush1.bf16.msra.mxu1 %v6607_v19  ;;  %4020 = vmatprep.subr.bf16.mxu0 %v6612_v20  ;;  %v6786_v19 = vld [vmem:[#allocation2 + $0x24] ss:$76 sps:$4 sm:$0xff]   ;;  %v6703_v20 = vld [vmem:[#allocation5 + $0xaa0] ss:$16 sps:$4 sm:$0xff]  }
  0xb5   :  { %4063 = vmatprep.subr.bf16.mxu1 %v6615_v21  ;;  %v6789_v21 = vld [vmem:[#allocation2 + $0x2c] ss:$76 sps:$4 sm:$0xff]  }
  0xb7   :  { %4021 = vmatpush1.bf16.msra.mxu0 %v6610_v22  ;;  %v6708_v22 = vld [vmem:[#allocation5 + $0x884] ss:$16 sps:$4 sm:$0xff]  }
  0xb8   :  { %4064 = vmatpush1.bf16.msra.mxu1 %v6613_v23  ;;  %4022 = vmatprep.subr.bf16.mxu0 %v6618_v24  ;;  %v6711_v23 = vld [vmem:[#allocation5 + $0xa84] ss:$16 sps:$4 sm:$0xff]   ;;  %v6706_v24 = vld [vmem:[#allocation5 + $0x880] ss:$16 sps:$4 sm:$0xff]  }
  0xb9   :  { %4065 = vmatprep.subr.bf16.mxu1 %v6621_v25  ;;  %v6709_v25 = vld [vmem:[#allocation5 + $0xa80] ss:$16 sps:$4 sm:$0xff]  }
  0xbb   :  { %4023 = vmatpush1.bf16.msra.mxu0 %v6616_v26  ;;  %v6714_v26 = vld [vmem:[#allocation5 + $0x864] ss:$16 sps:$4 sm:$0xff]  }
  0xbc   :  { %4066 = vmatpush1.bf16.msra.mxu1 %v6619_v27  ;;  %4024 = vmatprep.subr.bf16.mxu0 %v6624_v28  ;;  %v6717_v27 = vld [vmem:[#allocation5 + $0xa64] ss:$16 sps:$4 sm:$0xff]   ;;  %v6712_v28 = vld [vmem:[#allocation5 + $0x860] ss:$16 sps:$4 sm:$0xff]  }
  0xbd   :  { %4067 = vmatprep.subr.bf16.mxu1 %v6627_v29  ;;  %v6715_v29 = vld [vmem:[#allocation5 + $0xa60] ss:$16 sps:$4 sm:$0xff]  }
  0xbf   :  { %4025 = vmatpush1.bf16.msra.mxu0 %v6622_v30  ;;  %v6720_v30 = vld [vmem:[#allocation5 + $0x844] ss:$16 sps:$4 sm:$0xff]  }
  0xc0   :  { %4068 = vmatpush1.bf16.msra.mxu1 %v6625_v31  ;;  %4026 = vmatprep.subr.bf16.mxu0 %v6630_v32  ;;  %v6723_v31 = vld [vmem:[#allocation5 + $0xa44] ss:$16 sps:$4 sm:$0xff]   ;;  %v6718_v32 = vld [vmem:[#allocation5 + $0x840] ss:$16 sps:$4 sm:$0xff]  }
  0xc1   :  { %4069 = vmatprep.subr.bf16.mxu1 %v6633_v33  ;;  %v6721_v33 = vld [vmem:[#allocation5 + $0xa40] ss:$16 sps:$4 sm:$0xff]  }
  0xc3   :  { %4027 = vmatpush1.bf16.msra.mxu0 %v6628_v36  ;;  %v6724_v36 = vld [vmem:[#allocation5 + $0x820] ss:$16 sps:$4 sm:$0xff]  }
  0xc4   :  { %4070 = vmatpush1.bf16.msra.mxu1 %v6631_v37  ;;  %4028 = vmatprep.subr.bf16.mxu0 %v6636_v38  ;;  %v6727_v37 = vld [vmem:[#allocation5 + $0xa20] ss:$16 sps:$4 sm:$0xff]   ;;  %v6732_v38 = vld [vmem:[#allocation5 + $0x804] ss:$16 sps:$4 sm:$0xff]  }
  0xc5   :  { %4071 = vmatprep.subr.bf16.mxu1 %v6639_v39  ;;  %v6735_v39 = vld [vmem:[#allocation5 + $0xa04] ss:$16 sps:$4 sm:$0xff]  }
  0xc7   :  { %4029 = vmatpush2.bf16.msra.mxu0 %v6634_v40  ;;  %v6730_v40 = vld [vmem:[#allocation5 + $0x800] ss:$16 sps:$4 sm:$0xff]  }
  0xc8   :  { %4072 = vmatpush2.bf16.msra.mxu1 %v6637_v41  ;;  %4030 = vmatprep.subr.bf16.mxu0 %v6642_v42  ;;  %v6733_v41 = vld [vmem:[#allocation5 + $0xa00] ss:$16 sps:$4 sm:$0xff]   ;;  %v6738_v42 = vld [vmem:[#allocation5 + $0x9e4] ss:$16 sps:$4 sm:$0xff]  }
  0xc9   :  { %4073 = vmatprep.subr.bf16.mxu1 %v6645_v43  ;;  %v6741_v43 = vld [vmem:[#allocation5 + $0xbe4] ss:$16 sps:$4 sm:$0xff]  }
  0xcb   :  { %4031 = vmatpush2.bf16.msra.mxu0 %v6640_v44  ;;  %v6736_v44 = vld [vmem:[#allocation5 + $0x9e0] ss:$16 sps:$4 sm:$0xff]  }
  0xcc   :  { %4074 = vmatpush2.bf16.msra.mxu1 %v6643_v45  ;;  %4032 = vmatprep.subr.bf16.mxu0 %v6648_v46  ;;  %v6739_v45 = vld [vmem:[#allocation5 + $0xbe0] ss:$16 sps:$4 sm:$0xff]   ;;  %v6744_v46 = vld [vmem:[#allocation5 + $0x9c4] ss:$16 sps:$4 sm:$0xff]  }
  0xcd   :  { %4075 = vmatprep.subr.bf16.mxu1 %v6651_v47  ;;  %v6747_v47 = vld [vmem:[#allocation5 + $0xbc4] ss:$16 sps:$4 sm:$0xff]  }
  0xcf   :  { %4033 = vmatpush2.bf16.msra.mxu0 %v6646_v48  ;;  %v6742_v48 = vld [vmem:[#allocation5 + $0x9c0] ss:$16 sps:$4 sm:$0xff]  }
  0xd0   :  { %4076 = vmatpush2.bf16.msra.mxu1 %v6649_v49  ;;  %4034 = vmatprep.subr.bf16.mxu0 %v6654_v50  ;;  %v6745_v49 = vld [vmem:[#allocation5 + $0xbc0] ss:$16 sps:$4 sm:$0xff]   ;;  %v6750_v50 = vld [vmem:[#allocation5 + $0x9a4] ss:$16 sps:$4 sm:$0xff]  }
  0xd1   :  { %4077 = vmatprep.subr.bf16.mxu1 %v6657_v51  ;;  %v6753_v51 = vld [vmem:[#allocation5 + $0xba4] ss:$16 sps:$4 sm:$0xff]  }
  0xd3   :  { %4035 = vmatpush2.bf16.msra.mxu0 %v6652_v52  ;;  %v6748_v52 = vld [vmem:[#allocation5 + $0x9a0] ss:$16 sps:$4 sm:$0xff]  }
  0xd4   :  { %4078 = vmatpush2.bf16.msra.mxu1 %v6655_v53  ;;  %4036 = vmatprep.subr.bf16.mxu0 %v6660_v54  ;;  %v6751_v53 = vld [vmem:[#allocation5 + $0xba0] ss:$16 sps:$4 sm:$0xff]   ;;  %v6756_v54 = vld [vmem:[#allocation5 + $0x984] ss:$16 sps:$4 sm:$0xff]  }
  0xd5   :  { %4079 = vmatprep.subr.bf16.mxu1 %v6663_v55  ;;  %v6759_v55 = vld [vmem:[#allocation5 + $0xb84] ss:$16 sps:$4 sm:$0xff]  }
  0xd7   :  { %4037 = vmatpush2.bf16.msra.mxu0 %v6658_v56  ;;  %v6754_v56 = vld [vmem:[#allocation5 + $0x980] ss:$16 sps:$4 sm:$0xff]  }
  0xd8   :  { %4080 = vmatpush2.bf16.msra.mxu1 %v6661_v57  ;;  %4038 = vmatprep.subr.bf16.mxu0 %v6666_v58  ;;  %v6757_v57 = vld [vmem:[#allocation5 + $0xb80] ss:$16 sps:$4 sm:$0xff]   ;;  %v6762_v58 = vld [vmem:[#allocation5 + $0x964] ss:$16 sps:$4 sm:$0xff]  }
  0xd9   :  { %4081 = vmatprep.subr.bf16.mxu1 %v6669_v59  ;;  %v6765_v59 = vld [vmem:[#allocation5 + $0xb64] ss:$16 sps:$4 sm:$0xff]  }
  0xdb   :  { %4039 = vmatpush2.bf16.msra.mxu0 %v6664_v60  ;;  %v6760_v60 = vld [vmem:[#allocation5 + $0x960] ss:$16 sps:$4 sm:$0xff]  }
  0xdc   :  { %4082 = vmatpush2.bf16.msra.mxu1 %v6667_v61  ;;  %4040 = vmatprep.subr.bf16.mxu0 %v6672_v62  ;;  %v6763_v61 = vld [vmem:[#allocation5 + $0xb60] ss:$16 sps:$4 sm:$0xff]   ;;  %v6768_v62 = vld [vmem:[#allocation5 + $0x944] ss:$16 sps:$4 sm:$0xff]  }
  0xdd   :  { %4083 = vmatprep.subr.bf16.mxu1 %v6675_v63  ;;  %v6771_v63 = vld [vmem:[#allocation5 + $0xb44] ss:$16 sps:$4 sm:$0xff]  }
  0xdf   :  { %4041 = vmatpush2.bf16.msra.mxu0 %v6670_v0  ;;  %v6766_v0 = vld [vmem:[#allocation5 + $0x940] ss:$16 sps:$4 sm:$0xff]  }
  0xe0   :  { %4084 = vmatpush2.bf16.msra.mxu1 %v6673_v1  ;;  %4042 = vmatprep.subr.bf16.mxu0 %v6678_v2  ;;  %v6769_v1 = vld [vmem:[#allocation5 + $0xb40] ss:$16 sps:$4 sm:$0xff]   ;;  %v6774_v2 = vld [vmem:[#allocation5 + $0x924] ss:$16 sps:$4 sm:$0xff]  }
  0xe1   :  { %4085 = vmatprep.subr.bf16.mxu1 %v6681_v3  ;;  %v6777_v3 = vld [vmem:[#allocation5 + $0xb24] ss:$16 sps:$4 sm:$0xff]  }
  0xe3   :  { %4043 = vmatpush2.bf16.msra.mxu0 %v6676_v4  ;;  %v6772_v4 = vld [vmem:[#allocation5 + $0x920] ss:$16 sps:$4 sm:$0xff]  }
  0xe4   :  { %4086 = vmatpush2.bf16.msra.mxu1 %v6679_v5  ;;  %4098 = vmatprep.subr.bf16.mxu0 %v6690_v6  ;;  %v6775_v5 = vld [vmem:[#allocation5 + $0xb20] ss:$16 sps:$4 sm:$0xff]   ;;  %v6780_v6 = vld [vmem:[#allocation5 + $0x904] ss:$16 sps:$4 sm:$0xff]  }
  0xe5   :  { %4141 = vmatprep.subr.bf16.mxu1 %v6693_v7  ;;  %v6783_v7 = vld [vmem:[#allocation5 + $0xb04] ss:$16 sps:$4 sm:$0xff]  }
  0xe6   :  { %4045 = vmatmul.mubr.bf16.vlgmr.msra.gmra.mxu0 %v6682_v8  ;;  %v6778_v8 = vld [vmem:[#allocation5 + $0x900] ss:$16 sps:$4 sm:$0xff]  }
  0xe7   :  { %4088 = vmatmul.mubr.bf16.vlgmr.msra.gmra.mxu1 %v6685_v9  ;;  %4099 = vmatpush1.bf16.msra.mxu0 %v6688_v10  ;;  %v6781_v9 = vld [vmem:[#allocation5 + $0xb00] ss:$16 sps:$4 sm:$0xff]   ;;  %v6792_v10 = vld [vmem:[#allocation5 + $0xce4] ss:$16 sps:$4 sm:$0xff]  }
  0xe8   :  { %4142 = vmatpush1.bf16.msra.mxu1 %v6691_v11  ;;  %4100 = vmatprep.subr.bf16.mxu0 %v6696_v12  ;;  %v6795_v11 = vld [vmem:[#allocation5 + $0xee4] ss:$16 sps:$4 sm:$0xff]  }
  0xe9   :  { %4143 = vmatprep.subr.bf16.mxu1 %v6699_v13  ;;  %4130 = vmatprep.mubr.bf16.mxu0 %v6786_v19  ;;  %v6784_v12 = vld [vmem:[#allocation2 + $0x20] ss:$76 sps:$4 sm:$0xff]   ;;  %v6787_v13 = vld [vmem:[#allocation2 + $0x28] ss:$76 sps:$4 sm:$0xff]  }
  0xea   :  { %4173 = vmatprep.mubr.bf16.mxu1 %v6789_v21  ;;  %v6891_v19 = vld [vmem:[#allocation2 + $0x3c] ss:$76 sps:$4 sm:$0xff]  }
  0xeb   :  { %4101 = vmatpush1.bf16.msra.mxu0 %v6694_v14  ;;  %v6790_v14 = vld [vmem:[#allocation5 + $0xce0] ss:$16 sps:$4 sm:$0xff]  }
  0xec   :  { %4144 = vmatpush1.bf16.msra.mxu1 %v6697_v15  ;;  %4102 = vmatprep.subr.bf16.mxu0 %v6702_v16  ;;  %v6793_v15 = vld [vmem:[#allocation5 + $0xee0] ss:$16 sps:$4 sm:$0xff]   ;;  %v6798_v16 = vld [vmem:[#allocation5 + $0xcc4] ss:$16 sps:$4 sm:$0xff]  }
  0xed   :  { %4145 = vmatprep.subr.bf16.mxu1 %v6705_v17  ;;  %v6801_v17 = vld [vmem:[#allocation5 + $0xec4] ss:$16 sps:$4 sm:$0xff]   ;;  %v6799_v21 = vld [vmem:[#allocation5 + $0xec0] ss:$16 sps:$4 sm:$0xff]  }
  0xef   :  { %4103 = vmatpush1.bf16.msra.mxu0 %v6700_v18  ;;  %v6888_v18 = vld [vmem:[#allocation2 + $0x34] ss:$76 sps:$4 sm:$0xff]  }
  0xf0   :  { %4146 = vmatpush1.bf16.msra.mxu1 %v6703_v20  ;;  %4104 = vmatprep.subr.bf16.mxu0 %v6708_v22  ;;  %v6796_v20 = vld [vmem:[#allocation5 + $0xcc0] ss:$16 sps:$4 sm:$0xff]   ;;  %v6804_v22 = vld [vmem:[#allocation5 + $0xca4] ss:$16 sps:$4 sm:$0xff]  }
  0xf1   :  { %4147 = vmatprep.subr.bf16.mxu1 %v6711_v23  ;;  %v6807_v23 = vld [vmem:[#allocation5 + $0xea4] ss:$16 sps:$4 sm:$0xff]  }
  0xf3   :  { %4105 = vmatpush1.bf16.msra.mxu0 %v6706_v24  ;;  %v6802_v24 = vld [vmem:[#allocation5 + $0xca0] ss:$16 sps:$4 sm:$0xff]  }
  0xf4   :  { %4148 = vmatpush1.bf16.msra.mxu1 %v6709_v25  ;;  %4106 = vmatprep.subr.bf16.mxu0 %v6714_v26  ;;  %v6805_v25 = vld [vmem:[#allocation5 + $0xea0] ss:$16 sps:$4 sm:$0xff]   ;;  %v6810_v26 = vld [vmem:[#allocation5 + $0xc84] ss:$16 sps:$4 sm:$0xff]  }
  0xf5   :  { %4149 = vmatprep.subr.bf16.mxu1 %v6717_v27  ;;  %v6813_v27 = vld [vmem:[#allocation5 + $0xe84] ss:$16 sps:$4 sm:$0xff]  }
  0xf7   :  { %4107 = vmatpush1.bf16.msra.mxu0 %v6712_v28  ;;  %v6808_v28 = vld [vmem:[#allocation5 + $0xc80] ss:$16 sps:$4 sm:$0xff]  }
  0xf8   :  { %4150 = vmatpush1.bf16.msra.mxu1 %v6715_v29  ;;  %4108 = vmatprep.subr.bf16.mxu0 %v6720_v30  ;;  %v6811_v29 = vld [vmem:[#allocation5 + $0xe80] ss:$16 sps:$4 sm:$0xff]   ;;  %v6816_v30 = vld [vmem:[#allocation5 + $0xc64] ss:$16 sps:$4 sm:$0xff]  }
  0xf9   :  { %4151 = vmatprep.subr.bf16.mxu1 %v6723_v31  ;;  %v6819_v31 = vld [vmem:[#allocation5 + $0xe64] ss:$16 sps:$4 sm:$0xff]  }
  0xfb   :  { %4109 = vmatpush1.bf16.msra.mxu0 %v6718_v32  ;;  %v6814_v32 = vld [vmem:[#allocation5 + $0xc60] ss:$16 sps:$4 sm:$0xff]  }
  0xfc   :  { %4152 = vmatpush1.bf16.msra.mxu1 %v6721_v33  ;;  %4110 = vmatprep.subr.bf16.mxu0 %v6726_v34  ;;  %v6817_v33 = vld [vmem:[#allocation5 + $0xe60] ss:$16 sps:$4 sm:$0xff]   ;;  %v6822_v34 = vld [vmem:[#allocation5 + $0xc44] ss:$16 sps:$4 sm:$0xff]  }
  0xfd   :  { %4153 = vmatprep.subr.bf16.mxu1 %v6729_v35  ;;  %v6825_v35 = vld [vmem:[#allocation5 + $0xe44] ss:$16 sps:$4 sm:$0xff]  }
  0xff   :  { %4111 = vmatpush1.bf16.msra.mxu0 %v6724_v36  ;;  %v6820_v36 = vld [vmem:[#allocation5 + $0xc40] ss:$16 sps:$4 sm:$0xff]  }
 0x100   :  { %4154 = vmatpush1.bf16.msra.mxu1 %v6727_v37  ;;  %4112 = vmatprep.subr.bf16.mxu0 %v6732_v38  ;;  %v6823_v37 = vld [vmem:[#allocation5 + $0xe40] ss:$16 sps:$4 sm:$0xff]   ;;  %v6828_v38 = vld [vmem:[#allocation5 + $0xc24] ss:$16 sps:$4 sm:$0xff]  }
 0x101   :  { %4155 = vmatprep.subr.bf16.mxu1 %v6735_v39  ;;  %v6831_v39 = vld [vmem:[#allocation5 + $0xe24] ss:$16 sps:$4 sm:$0xff]  }
 0x103   :  { %4113 = vmatpush1.bf16.msra.mxu0 %v6730_v40  ;;  %v6826_v40 = vld [vmem:[#allocation5 + $0xc20] ss:$16 sps:$4 sm:$0xff]  }
 0x104   :  { %4156 = vmatpush1.bf16.msra.mxu1 %v6733_v41  ;;  %4114 = vmatprep.subr.bf16.mxu0 %v6738_v42  ;;  %v6829_v41 = vld [vmem:[#allocation5 + $0xe20] ss:$16 sps:$4 sm:$0xff]   ;;  %v6834_v42 = vld [vmem:[#allocation5 + $0xc04] ss:$16 sps:$4 sm:$0xff]  }
 0x105   :  { %4157 = vmatprep.subr.bf16.mxu1 %v6741_v43  ;;  %v6837_v43 = vld [vmem:[#allocation5 + $0xe04] ss:$16 sps:$4 sm:$0xff]  }
 0x107   :  { %4115 = vmatpush2.bf16.msra.mxu0 %v6736_v44  ;;  %v6832_v44 = vld [vmem:[#allocation5 + $0xc00] ss:$16 sps:$4 sm:$0xff]  }
 0x108   :  { %4158 = vmatpush2.bf16.msra.mxu1 %v6739_v45  ;;  %4116 = vmatprep.subr.bf16.mxu0 %v6744_v46  ;;  %v6835_v45 = vld [vmem:[#allocation5 + $0xe00] ss:$16 sps:$4 sm:$0xff]   ;;  %v6840_v46 = vld [vmem:[#allocation5 + $0xde4] ss:$16 sps:$4 sm:$0xff]  }
 0x109   :  { %4159 = vmatprep.subr.bf16.mxu1 %v6747_v47  ;;  %v6843_v47 = vld [vmem:[#allocation5 + $0xfe4] ss:$16 sps:$4 sm:$0xff]  }
 0x10b   :  { %4117 = vmatpush2.bf16.msra.mxu0 %v6742_v48  ;;  %v6838_v48 = vld [vmem:[#allocation5 + $0xde0] ss:$16 sps:$4 sm:$0xff]  }
 0x10c   :  { %4160 = vmatpush2.bf16.msra.mxu1 %v6745_v49  ;;  %4118 = vmatprep.subr.bf16.mxu0 %v6750_v50  ;;  %v6841_v49 = vld [vmem:[#allocation5 + $0xfe0] ss:$16 sps:$4 sm:$0xff]   ;;  %v6846_v50 = vld [vmem:[#allocation5 + $0xdc4] ss:$16 sps:$4 sm:$0xff]  }
 0x10d   :  { %4161 = vmatprep.subr.bf16.mxu1 %v6753_v51  ;;  %v6849_v51 = vld [vmem:[#allocation5 + $0xfc4] ss:$16 sps:$4 sm:$0xff]  }
 0x10f   :  { %4119 = vmatpush2.bf16.msra.mxu0 %v6748_v52  ;;  %v6844_v52 = vld [vmem:[#allocation5 + $0xdc0] ss:$16 sps:$4 sm:$0xff]  }
 0x110   :  { %4162 = vmatpush2.bf16.msra.mxu1 %v6751_v53  ;;  %4120 = vmatprep.subr.bf16.mxu0 %v6756_v54  ;;  %v6847_v53 = vld [vmem:[#allocation5 + $0xfc0] ss:$16 sps:$4 sm:$0xff]   ;;  %v6852_v54 = vld [vmem:[#allocation5 + $0xda4] ss:$16 sps:$4 sm:$0xff]  }
 0x111   :  { %4163 = vmatprep.subr.bf16.mxu1 %v6759_v55  ;;  %v6855_v55 = vld [vmem:[#allocation5 + $0xfa4] ss:$16 sps:$4 sm:$0xff]  }
 0x113   :  { %4121 = vmatpush2.bf16.msra.mxu0 %v6754_v56  ;;  %v6850_v56 = vld [vmem:[#allocation5 + $0xda0] ss:$16 sps:$4 sm:$0xff]  }
 0x114   :  { %4164 = vmatpush2.bf16.msra.mxu1 %v6757_v57  ;;  %4122 = vmatprep.subr.bf16.mxu0 %v6762_v58  ;;  %v6853_v57 = vld [vmem:[#allocation5 + $0xfa0] ss:$16 sps:$4 sm:$0xff]   ;;  %v6858_v58 = vld [vmem:[#allocation5 + $0xd84] ss:$16 sps:$4 sm:$0xff]  }
 0x115   :  { %4165 = vmatprep.subr.bf16.mxu1 %v6765_v59  ;;  %v6861_v59 = vld [vmem:[#allocation5 + $0xf84] ss:$16 sps:$4 sm:$0xff]  }
 0x117   :  { %4123 = vmatpush2.bf16.msra.mxu0 %v6760_v60  ;;  %v6856_v60 = vld [vmem:[#allocation5 + $0xd80] ss:$16 sps:$4 sm:$0xff]  }
 0x118   :  { %4166 = vmatpush2.bf16.msra.mxu1 %v6763_v61  ;;  %4124 = vmatprep.subr.bf16.mxu0 %v6768_v62  ;;  %v6859_v61 = vld [vmem:[#allocation5 + $0xf80] ss:$16 sps:$4 sm:$0xff]   ;;  %v6864_v62 = vld [vmem:[#allocation5 + $0xd64] ss:$16 sps:$4 sm:$0xff]  }
 0x119   :  { %4167 = vmatprep.subr.bf16.mxu1 %v6771_v63  ;;  %v6867_v63 = vld [vmem:[#allocation5 + $0xf64] ss:$16 sps:$4 sm:$0xff]  }
 0x11b   :  { %4125 = vmatpush2.bf16.msra.mxu0 %v6766_v0  ;;  %v6862_v0 = vld [vmem:[#allocation5 + $0xd60] ss:$16 sps:$4 sm:$0xff]  }
 0x11c   :  { %4168 = vmatpush2.bf16.msra.mxu1 %v6769_v1  ;;  %4126 = vmatprep.subr.bf16.mxu0 %v6774_v2  ;;  %v6865_v1 = vld [vmem:[#allocation5 + $0xf60] ss:$16 sps:$4 sm:$0xff]   ;;  %v6870_v2 = vld [vmem:[#allocation5 + $0xd44] ss:$16 sps:$4 sm:$0xff]  }
 0x11d   :  { %4169 = vmatprep.subr.bf16.mxu1 %v6777_v3  ;;  %v6873_v3 = vld [vmem:[#allocation5 + $0xf44] ss:$16 sps:$4 sm:$0xff]  }
 0x11f   :  { %4127 = vmatpush2.bf16.msra.mxu0 %v6772_v4  ;;  %v6868_v4 = vld [vmem:[#allocation5 + $0xd40] ss:$16 sps:$4 sm:$0xff]  }
 0x120   :  { %4170 = vmatpush2.bf16.msra.mxu1 %v6775_v5  ;;  %4128 = vmatprep.subr.bf16.mxu0 %v6780_v6  ;;  %v6871_v5 = vld [vmem:[#allocation5 + $0xf40] ss:$16 sps:$4 sm:$0xff]   ;;  %v6876_v6 = vld [vmem:[#allocation5 + $0xd24] ss:$16 sps:$4 sm:$0xff]  }
 0x121   :  { %4171 = vmatprep.subr.bf16.mxu1 %v6783_v7  ;;  %v770_v7 = vlaneseq }
 0x123   :  { %4129 = vmatpush2.bf16.msra.mxu0 %v6778_v8  ;;  %v6879_v8 = vld [vmem:[#allocation5 + $0xf24] ss:$16 sps:$4 sm:$0xff]  }
 0x124   :  { %4172 = vmatpush2.bf16.msra.mxu1 %v6781_v9  ;;  %4184 = vmatprep.subr.bf16.mxu0 %v6792_v10  ;;  %v6874_v9 = vld [vmem:[#allocation5 + $0xd20] ss:$16 sps:$4 sm:$0xff]  }
 0x125   :  { %4227 = vmatprep.subr.bf16.mxu1 %v6795_v11  ;;  %v6877_v10 = vld [vmem:[#allocation5 + $0xf20] ss:$16 sps:$4 sm:$0xff]   ;;  %v6882_v11 = vld [vmem:[#allocation5 + $0xd04] ss:$16 sps:$4 sm:$0xff]  }
 0x126   :  { %4131 = vmatmul.mubr.bf16.vlgmr.msra.gmra.mxu0 %v6784_v12  ;;  %v7874_v12 = vshrl.u32 %v770_v7, 7  ;;  %v6952_v7 = vld [vmem:[#allocation5 + $0xcc] ss:$16 sps:$4 sm:$0xff]  }
 0x127   :  { %4174 = vmatmul.mubr.bf16.vlgmr.msra.gmra.mxu1 %v6787_v13  ;;  %4185 = vmatpush1.bf16.msra.mxu0 %v6790_v14  ;;  %v6885_v13 = vld [vmem:[#allocation5 + $0xf04] ss:$16 sps:$4 sm:$0xff]   ;;  %v6880_v14 = vld [vmem:[#allocation5 + $0xd00] ss:$16 sps:$4 sm:$0xff]  }
 0x128   :  { %4228 = vmatpush1.bf16.msra.mxu1 %v6793_v15  ;;  %4186 = vmatprep.subr.bf16.mxu0 %v6798_v16  ;;  %v6883_v15 = vld [vmem:[#allocation5 + $0xf00] ss:$16 sps:$4 sm:$0xff]  }
 0x129   :  { %4229 = vmatprep.subr.bf16.mxu1 %v6801_v17  ;;  %4216 = vmatprep.mubr.bf16.mxu0 %v6888_v18  ;;  %v768_v16 = vld [vmem:[#allocation7] sm:$0xf]  ;;  %v772_v17 = vsub.s32 0, %v7874_v12  ;;  %v6894_v18 = vld [vmem:[#allocation5 + $0x10e4] ss:$16 sps:$4 sm:$0xff]  }
 0x12a   :  { %4259 = vmatprep.mubr.bf16.mxu1 %v6891_v19  ;;  %v6897_v19 = vld [vmem:[#allocation5 + $0x12e4] ss:$16 sps:$4 sm:$0xff]  }
 0x12b   :  { %4187 = vmatpush1.bf16.msra.mxu0 %v6796_v20  ;;  %v6886_v20 = vld [vmem:[#allocation2 + $0x30] ss:$76 sps:$4 sm:$0xff]  }
 0x12c   :  { %4230 = vmatpush1.bf16.msra.mxu1 %v6799_v21  ;;  %4188 = vmatprep.subr.bf16.mxu0 %v6804_v22  ;;  %v6889_v21 = vld [vmem:[#allocation2 + $0x38] ss:$76 sps:$4 sm:$0xff]  }
 0x12d   :  { %4231 = vmatprep.subr.bf16.mxu1 %v6807_v23  ;;  %v6892_v22 = vld [vmem:[#allocation5 + $0x10e0] ss:$16 sps:$4 sm:$0xff]  }
 0x12e   :  { %v6895_v23 = vld [vmem:[#allocation5 + $0x12e0] ss:$16 sps:$4 sm:$0xff]  }
 0x12f   :  { %4189 = vmatpush1.bf16.msra.mxu0 %v6802_v24  ;;  %v773_v24 = vrot.slane %v768_v16, %v772_v17  ;;  %v6961_v16 = vld [vmem:[#allocation5 + $0x1184] ss:$16 sps:$4 sm:$0xff]  }
 0x130   :  { %4232 = vmatpush1.bf16.msra.mxu1 %v6805_v25  ;;  %4190 = vmatprep.subr.bf16.mxu0 %v6810_v26  ;;  %v6900_v25 = vld [vmem:[#allocation5 + $0x10c4] ss:$16 sps:$4 sm:$0xff]  }
 0x131   :  { %4233 = vmatprep.subr.bf16.mxu1 %v6813_v27  ;;  %v6903_v26 = vld [vmem:[#allocation5 + $0x12c4] ss:$16 sps:$4 sm:$0xff]   ;;  %v6991_v27 = vld [vmem:[#allocation2 + $0x44] ss:$76 sps:$4 sm:$0xff]  }
 0x133   :  { %4191 = vmatpush1.bf16.msra.mxu0 %v6808_v28 }
 0x134   :  { %4234 = vmatpush1.bf16.msra.mxu1 %v6811_v29  ;;  %4192 = vmatprep.subr.bf16.mxu0 %v6816_v30  ;;  %v6898_v30 = vld [vmem:[#allocation5 + $0x10c0] ss:$16 sps:$4 sm:$0xff]  }
 0x135   :  { %4235 = vmatprep.subr.bf16.mxu1 %v6819_v31  ;;  %v6901_v31 = vld [vmem:[#allocation5 + $0x12c0] ss:$16 sps:$4 sm:$0xff]  }
 0x137   :  { %4193 = vmatpush1.bf16.msra.mxu0 %v6814_v32 }
 0x138   :  { %4236 = vmatpush1.bf16.msra.mxu1 %v6817_v33  ;;  %4194 = vmatprep.subr.bf16.mxu0 %v6822_v34  ;;  %v6906_v33 = vld [vmem:[#allocation5 + $0x10a4] ss:$16 sps:$4 sm:$0xff]  }
 0x139   :  { %4237 = vmatprep.subr.bf16.mxu1 %v6825_v35 }
 0x13b   :  { %4195 = vmatpush1.bf16.msra.mxu0 %v6820_v36  ;;  %v6909_v36 = vld [vmem:[#allocation5 + $0x12a4] ss:$16 sps:$4 sm:$0xff]  }
 0x13c   :  { %4238 = vmatpush1.bf16.msra.mxu1 %v6823_v37  ;;  %4196 = vmatprep.subr.bf16.mxu0 %v6828_v38  ;;  %v7782_v38 = vmov 0  }
 0x13d   :  { %4239 = vmatprep.subr.bf16.mxu1 %v6831_v39 }
 0x13f   :  { %4197 = vmatpush1.bf16.msra.mxu0 %v6826_v40  ;;  %v6904_v40 = vld [vmem:[#allocation5 + $0x10a0] ss:$16 sps:$4 sm:$0xff]  }
 0x140   :  { %4240 = vmatpush1.bf16.msra.mxu1 %v6829_v41  ;;  %4198 = vmatprep.subr.bf16.mxu0 %v6834_v42  ;;  %v6907_v41 = vld [vmem:[#allocation5 + $0x12a0] ss:$16 sps:$4 sm:$0xff]  }
 0x141   :  { %4241 = vmatprep.subr.bf16.mxu1 %v6837_v43  ;;  %v6912_v43 = vld [vmem:[#allocation5 + $0x1084] ss:$16 sps:$4 sm:$0xff]  }
 0x143   :  { %4199 = vmatpush1.bf16.msra.mxu0 %v6832_v44 }
 0x144   :  { %4242 = vmatpush1.bf16.msra.mxu1 %v6835_v45  ;;  %4200 = vmatprep.subr.bf16.mxu0 %v6840_v46  ;;  %v6915_v45 = vld [vmem:[#allocation5 + $0x1284] ss:$16 sps:$4 sm:$0xff]  }
 0x145   :  { %4243 = vmatprep.subr.bf16.mxu1 %v6843_v47  ;;  %v6910_v47 = vld [vmem:[#allocation5 + $0x1080] ss:$16 sps:$4 sm:$0xff]  }
 0x147   :  { %4201 = vmatpush2.bf16.msra.mxu0 %v6838_v48  ;;  %v6913_v48 = vld [vmem:[#allocation5 + $0x1280] ss:$16 sps:$4 sm:$0xff]  }
 0x148   :  { %4244 = vmatpush2.bf16.msra.mxu1 %v6841_v49  ;;  %4202 = vmatprep.subr.bf16.mxu0 %v6846_v50  ;;  %v6918_v49 = vld [vmem:[#allocation5 + $0x1064] ss:$16 sps:$4 sm:$0xff]  }
 0x149   :  { %4245 = vmatprep.subr.bf16.mxu1 %v6849_v51  ;;  %v6921_v50 = vld [vmem:[#allocation5 + $0x1264] ss:$16 sps:$4 sm:$0xff]   ;;  %v6916_v51 = vld [vmem:[#allocation5 + $0x1060] ss:$16 sps:$4 sm:$0xff]  }
 0x14b   :  { %4203 = vmatpush2.bf16.msra.mxu0 %v6844_v52  ;;  %v6919_v52 = vld [vmem:[#allocation5 + $0x1260] ss:$16 sps:$4 sm:$0xff]  }
 0x14c   :  { %4246 = vmatpush2.bf16.msra.mxu1 %v6847_v53  ;;  %4204 = vmatprep.subr.bf16.mxu0 %v6852_v54  ;;  %v6924_v53 = vld [vmem:[#allocation5 + $0x1044] ss:$16 sps:$4 sm:$0xff]  }
 0x14d   :  { %4247 = vmatprep.subr.bf16.mxu1 %v6855_v55  ;;  %v6927_v54 = vld [vmem:[#allocation5 + $0x1244] ss:$16 sps:$4 sm:$0xff]   ;;  %v6922_v55 = vld [vmem:[#allocation5 + $0x1040] ss:$16 sps:$4 sm:$0xff]  }
 0x14f   :  { %4205 = vmatpush2.bf16.msra.mxu0 %v6850_v56  ;;  %v6925_v56 = vld [vmem:[#allocation5 + $0x1240] ss:$16 sps:$4 sm:$0xff]  }
 0x150   :  { %4248 = vmatpush2.bf16.msra.mxu1 %v6853_v57  ;;  %4206 = vmatprep.subr.bf16.mxu0 %v6858_v58  ;;  %v6930_v57 = vld [vmem:[#allocation5 + $0x1024] ss:$16 sps:$4 sm:$0xff]  }
 0x151   :  { %4249 = vmatprep.subr.bf16.mxu1 %v6861_v59  ;;  %v6933_v58 = vld [vmem:[#allocation5 + $0x1224] ss:$16 sps:$4 sm:$0xff]   ;;  %v6928_v59 = vld [vmem:[#allocation5 + $0x1020] ss:$16 sps:$4 sm:$0xff]  }
 0x153   :  { %4207 = vmatpush2.bf16.msra.mxu0 %v6856_v60  ;;  %v6931_v60 = vld [vmem:[#allocation5 + $0x1220] ss:$16 sps:$4 sm:$0xff]  }
 0x154   :  { %4250 = vmatpush2.bf16.msra.mxu1 %v6859_v61  ;;  %4208 = vmatprep.subr.bf16.mxu0 %v6864_v62  ;;  %v6936_v61 = vld [vmem:[#allocation5 + $0x1004] ss:$16 sps:$4 sm:$0xff]  }
 0x155   :  { %4251 = vmatprep.subr.bf16.mxu1 %v6867_v63  ;;  %v6939_v62 = vld [vmem:[#allocation5 + $0x1204] ss:$16 sps:$4 sm:$0xff]   ;;  %v6934_v63 = vld [vmem:[#allocation5 + $0x1000] ss:$16 sps:$4 sm:$0xff]  }
 0x157   :  { %4209 = vmatpush2.bf16.msra.mxu0 %v6862_v0  ;;  %v6937_v0 = vld [vmem:[#allocation5 + $0x1200] ss:$16 sps:$4 sm:$0xff]  }
 0x158   :  { %4252 = vmatpush2.bf16.msra.mxu1 %v6865_v1  ;;  %4210 = vmatprep.subr.bf16.mxu0 %v6870_v2  ;;  %v6942_v1 = vld [vmem:[#allocation5 + $0x11e4] ss:$16 sps:$4 sm:$0xff]   ;;  %v6946_v2 = vld [vmem:[#allocation5 + $0xec] ss:$16 sps:$4 sm:$0xff]  }
 0x159   :  { %4253 = vmatprep.subr.bf16.mxu1 %v6873_v3  ;;  %v6940_v3 = vld [vmem:[#allocation5 + $0x11e0] ss:$16 sps:$4 sm:$0xff]  }
 0x15b   :  { %4211 = vmatpush2.bf16.msra.mxu0 %v6868_v4  ;;  %v6943_v4 = vld [vmem:[#allocation2 + $0x48] ss:$76 sps:$4 sm:$0xff]  }
 0x15c   :  { %4254 = vmatpush2.bf16.msra.mxu1 %v6871_v5  ;;  %4212 = vmatprep.subr.bf16.mxu0 %v6876_v6  ;;  %v6944_v5 = vld [vmem:[#allocation5 + $0xe8] ss:$16 sps:$4 sm:$0xff]   ;;  %v6949_v6 = vld [vmem:[#allocation5 + $0x11c4] ss:$16 sps:$4 sm:$0xff]  }
 0x15d   :  { %4255 = vmatprep.subr.bf16.mxu1 %v6879_v8  ;;  %v6947_v8 = vld [vmem:[#allocation5 + $0x11c0] ss:$16 sps:$4 sm:$0xff]  }
 0x15f   :  { %4213 = vmatpush2.bf16.msra.mxu0 %v6874_v9  ;;  %v6950_v9 = vld [vmem:[#allocation5 + $0xc8] ss:$16 sps:$4 sm:$0xff]  }
 0x160   :  { %4256 = vmatpush2.bf16.msra.mxu1 %v6877_v10  ;;  %4214 = vmatprep.subr.bf16.mxu0 %v6882_v11  ;;  %v6955_v10 = vld [vmem:[#allocation5 + $0x11a4] ss:$16 sps:$4 sm:$0xff]   ;;  %v6958_v11 = vld [vmem:[#allocation5 + $0xac] ss:$16 sps:$4 sm:$0xff]  }
 0x161   :  { %4257 = vmatprep.subr.bf16.mxu1 %v6885_v13  ;;  %v7556_v13 = vld [vmem:[#allocation2 + $0x4] ss:$76 sps:$4 sm:$0xff]  }
 0x163   :  { %4215 = vmatpush2.bf16.msra.mxu0 %v6880_v14  ;;  %v6953_v14 = vld [vmem:[#allocation5 + $0x11a0] ss:$16 sps:$4 sm:$0xff]  }
 0x164   :  { %4258 = vmatpush2.bf16.msra.mxu1 %v6883_v15  ;;  %4270 = vmatprep.subr.bf16.mxu0 %v6894_v18  ;;  %v6956_v15 = vld [vmem:[#allocation5 + $0xa8] ss:$16 sps:$4 sm:$0xff]   ;;  %v6964_v18 = vld [vmem:[#allocation5 + $0x8c] ss:$16 sps:$4 sm:$0xff]  }
 0x165   :  { %4313 = vmatprep.subr.bf16.mxu1 %v6897_v19  ;;  %v6959_v19 = vld [vmem:[#allocation5 + $0x1180] ss:$16 sps:$4 sm:$0xff]  }
 0x166   :  { %v3960_v28 = vpop.f32.mrf.mxu0  ;;  %4217 = vmatmul.mubr.bf16.vlgmr.msra.gmra.mxu0 %v6886_v20  ;;  %v6962_v20 = vld [vmem:[#allocation5 + $0x88] ss:$16 sps:$4 sm:$0xff]  }
 0x167   :  { %v4003_v29 = vpop.f32.mrf.mxu1  ;;  %4260 = vmatmul.mubr.bf16.vlgmr.msra.gmra.mxu1 %v6889_v21  ;;  %v3961_v32 = vadd.f32 %v3960_v28, %v773_v24  ;;  %4271 = vmatpush1.bf16.msra.mxu0 %v6892_v22  ;;  %v6967_v21 = vld [vmem:[#allocation5 + $0x1164] ss:$16 sps:$4 sm:$0xff]   ;;  %v6970_v22 = vld [vmem:[#allocation5 + $0x6c] ss:$16 sps:$4 sm:$0xff]   ;;  %v6974_v28 = vld [vmem:[#allocation5 + $0x48] ss:$16 sps:$4 sm:$0xff]  }
 0x168   :  { %4314 = vmatpush1.bf16.msra.mxu1 %v6895_v23  ;;  %v7879_v34 = vpop.f32.mrf.mxu0  ;;  %4272 = vmatprep.subr.bf16.mxu0 %v6900_v25  ;;  %v6965_v23 = vld [vmem:[#allocation5 + $0x1160] ss:$16 sps:$4 sm:$0xff]   ;;  %v6973_v25 = vld [vmem:[#allocation5 + $0x1144] ss:$16 sps:$4 sm:$0xff]  }
 0x169   :  { %v7881_v35 = vpop.f32.mrf.mxu1  ;;  %4315 = vmatprep.subr.bf16.mxu1 %v6903_v26  ;;  %v7883_v37 = vadd.f32 %v4003_v29, %v3961_v32  ;;  %4345 = vmatprep.mubr.bf16.mxu1 %v7782_v38  ;;  %v6976_v26 = vld [vmem:[#allocation5 + $0x4c] ss:$16 sps:$4 sm:$0xff]   ;;  %v6979_v29 = vld [vmem:[#allocation5 + $0x1124] ss:$16 sps:$4 sm:$0xff]   ;;  %v6980_v32 = vld [vmem:[#allocation5 + $0x28] ss:$16 sps:$4 sm:$0xff]  }
 0x16a   :  { %4302 = vmatprep.mubr.bf16.mxu0 %v6991_v27  ;;  %v3964_v39 = vpop.f32.mrf.mxu0  ;;  %v6971_v27 = vld [vmem:[#allocation5 + $0x1140] ss:$16 sps:$4 sm:$0xff]  }
 0x16b   :  { %v3965_v42 = vadd.f32 %v3964_v39, %v773_v24  ;;  %4273 = vmatpush1.bf16.msra.mxu0 %v6898_v30  ;;  %v4007_v44 = vpop.f32.mrf.mxu1  ;;  %v6968_v24 = vld [vmem:[#allocation5 + $0x68] ss:$16 sps:$4 sm:$0xff]   ;;  %v6982_v30 = vld [vmem:[#allocation5 + $0x2c] ss:$16 sps:$4 sm:$0xff]   ;;  %v6983_v39 = vld [vmem:[#allocation5 + $0x1100] ss:$16 sps:$4 sm:$0xff]  }
 0x16c   :  { %4316 = vmatpush1.bf16.msra.mxu1 %v6901_v31  ;;  %4274 = vmatprep.subr.bf16.mxu0 %v6906_v33  ;;  %v6977_v31 = vld [vmem:[#allocation5 + $0x1120] ss:$16 sps:$4 sm:$0xff]   ;;  %v6985_v33 = vld [vmem:[#allocation5 + $0x1104] ss:$16 sps:$4 sm:$0xff]  }
 0x16d   :  { %4317 = vmatprep.subr.bf16.mxu1 %v6909_v36  ;;  %v7886_v46 = vadd.f32 %v4007_v44, %v3965_v42  ;;  %v6988_v36 = vld [vmem:[#allocation5 + $0xc] ss:$16 sps:$4 sm:$0xff]   ;;  %v6992_v44 = vld [vmem:[#allocation5 + $0x1e8] ss:$16 sps:$4 sm:$0xff]  }
 0x16e   :  { %v6994_v42 = vld [vmem:[#allocation5 + $0x1ec] ss:$16 sps:$4 sm:$0xff]  }
 0x16f   :  { %4275 = vmatpush1.bf16.msra.mxu0 %v6904_v40  ;;  %v6986_v40 = vld [vmem:[#allocation5 + $0x8] ss:$16 sps:$4 sm:$0xff]  }
 0x170   :  { %4318 = vmatpush1.bf16.msra.mxu1 %v6907_v41  ;;  %4276 = vmatprep.subr.bf16.mxu0 %v6912_v43  ;;  %v6989_v41 = vld [vmem:[#allocation2 + $0x40] ss:$76 sps:$4 sm:$0xff]   ;;  %v6997_v43 = vld [vmem:[#allocation5 + $0x2ec] ss:$16 sps:$4 sm:$0xff]  }
 0x171   :  { %4319 = vmatprep.subr.bf16.mxu1 %v6915_v45  ;;  %v6995_v45 = vld [vmem:[#allocation5 + $0x2e8] ss:$16 sps:$4 sm:$0xff]  }
 0x173   :  { %4277 = vmatpush1.bf16.msra.mxu0 %v6910_v47  ;;  %v7888_v47 = vpop.f32.mrf.mxu0 }
 0x174   :  { %4320 = vmatpush1.bf16.msra.mxu1 %v6913_v48  ;;  %4278 = vmatprep.subr.bf16.mxu0 %v6918_v49  ;;  %v7890_v48 = vpop.f32.mrf.mxu1  ;;  %v7000_v49 = vld [vmem:[#allocation5 + $0x1cc] ss:$16 sps:$4 sm:$0xff]  }
 0x175   :  { %4321 = vmatprep.subr.bf16.mxu1 %v6921_v50  ;;  %v7003_v50 = vld [vmem:[#allocation5 + $0x2cc] ss:$16 sps:$4 sm:$0xff]  }
 0x177   :  { %4279 = vmatpush1.bf16.msra.mxu0 %v6916_v51  ;;  %v6998_v51 = vld [vmem:[#allocation5 + $0x1c8] ss:$16 sps:$4 sm:$0xff]  }
 0x178   :  { %4322 = vmatpush1.bf16.msra.mxu1 %v6919_v52  ;;  %4280 = vmatprep.subr.bf16.mxu0 %v6924_v53  ;;  %v7001_v52 = vld [vmem:[#allocation5 + $0x2c8] ss:$16 sps:$4 sm:$0xff]  }
 0x179   :  { %4323 = vmatprep.subr.bf16.mxu1 %v6927_v54 }
 0x17b   :  { %4281 = vmatpush1.bf16.msra.mxu0 %v6922_v55 }
 0x17c   :  { %4324 = vmatpush1.bf16.msra.mxu1 %v6925_v56  ;;  %4282 = vmatprep.subr.bf16.mxu0 %v6930_v57 }
 0x17d   :  { %4325 = vmatprep.subr.bf16.mxu1 %v6933_v58  ;;  %v7006_v58 = vld [vmem:[#allocation5 + $0x1ac] ss:$16 sps:$4 sm:$0xff]  }
 0x17f   :  { %4283 = vmatpush1.bf16.msra.mxu0 %v6928_v59  ;;  %v7009_v59 = vld [vmem:[#allocation5 + $0x2ac] ss:$16 sps:$4 sm:$0xff]  }
 0x180   :  { %4326 = vmatpush1.bf16.msra.mxu1 %v6931_v60  ;;  %4284 = vmatprep.subr.bf16.mxu0 %v6936_v61  ;;  %v7004_v61 = vld [vmem:[#allocation5 + $0x1a8] ss:$16 sps:$4 sm:$0xff]  }
 0x181   :  { %4327 = vmatprep.subr.bf16.mxu1 %v6939_v62  ;;  %v7007_v62 = vld [vmem:[#allocation5 + $0x2a8] ss:$16 sps:$4 sm:$0xff]  }
 0x183   :  { %4285 = vmatpush1.bf16.msra.mxu0 %v6934_v63  ;;  %v7557_v63 = vld [vmem:[#allocation2 + $0xc] ss:$76 sps:$4 sm:$0xff]  }
 0x184   :  { %4328 = vmatpush1.bf16.msra.mxu1 %v6937_v0  ;;  %4286 = vmatprep.subr.bf16.mxu0 %v6942_v1 }
 0x185   :  { %4356 = vmatprep.subr.bf16.mxu1 %v6946_v2  ;;  %v7012_v2 = vld [vmem:[#allocation5 + $0x18c] ss:$16 sps:$4 sm:$0xff]  }
 0x187   :  { %4346 = vmatmul.mubr.bf16.vlgmr.msra.gmra.mxu1 %v6943_v4  ;;  %4287 = vmatpush2.bf16.msra.mxu0 %v6940_v3  ;;  %v7015_v3 = vld [vmem:[#allocation5 + $0x28c] ss:$16 sps:$4 sm:$0xff]  }
 0x188   :  { %4357 = vmatpush1.bf16.msra.mxu1 %v6944_v5  ;;  %4288 = vmatprep.subr.bf16.mxu0 %v6949_v6  ;;  %v7010_v5 = vld [vmem:[#allocation5 + $0x188] ss:$16 sps:$4 sm:$0xff]  }
 0x189   :  { %4358 = vmatprep.subr.bf16.mxu1 %v6952_v7  ;;  %4388 = vmatprep.mubr.bf16.mxu1 %v7556_v13  ;;  %v7013_v6 = vld [vmem:[#allocation5 + $0x288] ss:$16 sps:$4 sm:$0xff]   ;;  %v7018_v7 = vld [vmem:[#allocation5 + $0x16c] ss:$16 sps:$4 sm:$0xff]  }
 0x18a   :  { %v7022_v13 = vld [vmem:[#allocation5 + $0x148] ss:$16 sps:$4 sm:$0xff]  }
 0x18b   :  { %4289 = vmatpush2.bf16.msra.mxu0 %v6947_v8  ;;  %v7021_v8 = vld [vmem:[#allocation5 + $0x26c] ss:$16 sps:$4 sm:$0xff]  }
 0x18c   :  { %4359 = vmatpush1.bf16.msra.mxu1 %v6950_v9  ;;  %4290 = vmatprep.subr.bf16.mxu0 %v6955_v10  ;;  %v7019_v9 = vld [vmem:[#allocation5 + $0x268] ss:$16 sps:$4 sm:$0xff]   ;;  %v7024_v10 = vld [vmem:[#allocation5 + $0x14c] ss:$16 sps:$4 sm:$0xff]  }
 0x18d   :  { %4360 = vmatprep.subr.bf16.mxu1 %v6958_v11  ;;  %v7027_v11 = vld [vmem:[#allocation5 + $0x24c] ss:$16 sps:$4 sm:$0xff]  }
 0x18f   :  { %4291 = vmatpush2.bf16.msra.mxu0 %v6953_v14  ;;  %v7025_v14 = vld [vmem:[#allocation5 + $0x248] ss:$16 sps:$4 sm:$0xff]  }
 0x190   :  { %4361 = vmatpush1.bf16.msra.mxu1 %v6956_v15  ;;  %4292 = vmatprep.subr.bf16.mxu0 %v6961_v16  ;;  %v7030_v15 = vld [vmem:[#allocation5 + $0x12c] ss:$16 sps:$4 sm:$0xff]  }
 0x191   :  { %4362 = vmatprep.subr.bf16.mxu1 %v6964_v18  ;;  %v7033_v16 = vld [vmem:[#allocation5 + $0x22c] ss:$16 sps:$4 sm:$0xff]   ;;  %v7028_v18 = vld [vmem:[#allocation5 + $0x128] ss:$16 sps:$4 sm:$0xff]  }
 0x193   :  { %4293 = vmatpush2.bf16.msra.mxu0 %v6959_v19  ;;  %v7031_v19 = vld [vmem:[#allocation5 + $0x228] ss:$16 sps:$4 sm:$0xff]  }
 0x194   :  { %4363 = vmatpush1.bf16.msra.mxu1 %v6962_v20  ;;  %4294 = vmatprep.subr.bf16.mxu0 %v6967_v21  ;;  %v7036_v20 = vld [vmem:[#allocation5 + $0x10c] ss:$16 sps:$4 sm:$0xff]  }
 0x195   :  { %4364 = vmatprep.subr.bf16.mxu1 %v6970_v22  ;;  %v7039_v21 = vld [vmem:[#allocation5 + $0x20c] ss:$16 sps:$4 sm:$0xff]   ;;  %v7034_v22 = vld [vmem:[#allocation5 + $0x108] ss:$16 sps:$4 sm:$0xff]  }
 0x197   :  { %4295 = vmatpush2.bf16.msra.mxu0 %v6965_v23  ;;  %v7037_v23 = vld [vmem:[#allocation5 + $0x208] ss:$16 sps:$4 sm:$0xff]  }
 0x198   :  { %4365 = vmatpush1.bf16.msra.mxu1 %v6968_v24  ;;  %4296 = vmatprep.subr.bf16.mxu0 %v6973_v25  ;;  %v7042_v24 = vld [vmem:[#allocation5 + $0x3ec] ss:$16 sps:$4 sm:$0xff]  }
 0x199   :  { %4366 = vmatprep.subr.bf16.mxu1 %v6976_v26  ;;  %v7045_v25 = vld [vmem:[#allocation5 + $0x4ec] ss:$16 sps:$4 sm:$0xff]   ;;  %v7040_v26 = vld [vmem:[#allocation5 + $0x3e8] ss:$16 sps:$4 sm:$0xff]  }
 0x19b   :  { %4297 = vmatpush2.bf16.msra.mxu0 %v6971_v27  ;;  %v7043_v27 = vld [vmem:[#allocation5 + $0x4e8] ss:$16 sps:$4 sm:$0xff]  }
 0x19c   :  { %4367 = vmatpush1.bf16.msra.mxu1 %v6974_v28  ;;  %4298 = vmatprep.subr.bf16.mxu0 %v6979_v29  ;;  %v7048_v28 = vld [vmem:[#allocation5 + $0x3cc] ss:$16 sps:$4 sm:$0xff]  }
 0x19d   :  { %4368 = vmatprep.subr.bf16.mxu1 %v6982_v30  ;;  %v7051_v29 = vld [vmem:[#allocation5 + $0x4cc] ss:$16 sps:$4 sm:$0xff]   ;;  %v7046_v30 = vld [vmem:[#allocation5 + $0x3c8] ss:$16 sps:$4 sm:$0xff]  }
 0x19f   :  { %4299 = vmatpush2.bf16.msra.mxu0 %v6977_v31  ;;  %v7049_v31 = vld [vmem:[#allocation5 + $0x4c8] ss:$16 sps:$4 sm:$0xff]  }
 0x1a0   :  { %4369 = vmatpush1.bf16.msra.mxu1 %v6980_v32  ;;  %4300 = vmatprep.subr.bf16.mxu0 %v6985_v33  ;;  %v7558_v32 = vld [vmem:[#allocation2] ss:$76 sps:$4 sm:$0xff]   ;;  %v7054_v33 = vld [vmem:[#allocation5 + $0x3ac] ss:$16 sps:$4 sm:$0xff]  }
 0x1a1   :  { %4370 = vmatprep.subr.bf16.mxu1 %v6988_v36  ;;  %v7057_v36 = vld [vmem:[#allocation5 + $0x4ac] ss:$16 sps:$4 sm:$0xff]  }
 0x1a3   :  { %4301 = vmatpush2.bf16.msra.mxu0 %v6983_v39  ;;  %v7052_v39 = vld [vmem:[#allocation5 + $0x3a8] ss:$16 sps:$4 sm:$0xff]  }
 0x1a4   :  { %4371 = vmatpush1.bf16.msra.mxu1 %v6986_v40  ;;  %4399 = vmatprep.subr.bf16.mxu0 %v6997_v43  ;;  %v7055_v40 = vld [vmem:[#allocation5 + $0x4a8] ss:$16 sps:$4 sm:$0xff]   ;;  %v7063_v43 = vld [vmem:[#allocation5 + $0x48c] ss:$16 sps:$4 sm:$0xff]  }
 0x1a5   :  { %4372 = vmatprep.subr.bf16.mxu1 %v6994_v42  ;;  %v7060_v42 = vld [vmem:[#allocation5 + $0x38c] ss:$16 sps:$4 sm:$0xff]  }
 0x1a6   :  { %v4046_v53 = vpop.f32.mrf.mxu0  ;;  %4303 = vmatmul.mubr.bf16.vlgmr.msra.gmra.mxu0 %v6989_v41  ;;  %v7559_v41 = vld [vmem:[#allocation2 + $0x14] ss:$76 sps:$4 sm:$0xff]  }
 0x1a7   :  { %v4089_v54 = vpop.f32.mrf.mxu1  ;;  %v4047_v55 = vadd.f32 %v4046_v53, %v7883_v37  ;;  %4400 = vmatpush1.bf16.msra.mxu0 %v6995_v45  ;;  %4431 = vmatprep.mubr.bf16.mxu0 %v7557_v63  ;;  %v7061_v45 = vld [vmem:[#allocation5 + $0x488] ss:$16 sps:$4 sm:$0xff]   ;;  %v7072_v53 = vld [vmem:[#allocation5 + $0x34c] ss:$16 sps:$4 sm:$0xff]  }
 0x1a8   :  { %4373 = vmatpush2.bf16.msra.mxu1 %v6992_v44  ;;  %v7893_v56 = vpop.f32.mrf.mxu0  ;;  %4401 = vmatprep.subr.bf16.mxu0 %v7003_v50  ;;  %v7058_v44 = vld [vmem:[#allocation5 + $0x388] ss:$16 sps:$4 sm:$0xff]   ;;  %v7069_v50 = vld [vmem:[#allocation5 + $0x46c] ss:$16 sps:$4 sm:$0xff]  }
 0x1a9   :  { %v7895_v57 = vpop.f32.mrf.mxu1  ;;  %4374 = vmatprep.subr.bf16.mxu1 %v7000_v49  ;;  %v7897_v60 = vadd.f32 %v4089_v54, %v4047_v55  ;;  %v7066_v49 = vld [vmem:[#allocation5 + $0x36c] ss:$16 sps:$4 sm:$0xff]   ;;  %v7070_v55 = vld [vmem:[#allocation5 + $0x348] ss:$16 sps:$4 sm:$0xff]  }
 0x1aa   :  { %v4050_v0 = vpop.f32.mrf.mxu0  ;;  %v7075_v54 = vld [vmem:[#allocation5 + $0x44c] ss:$16 sps:$4 sm:$0xff]   ;;  %v7079_v63 = vld [vmem:[#allocation5 + $0x428] ss:$16 sps:$4 sm:$0xff]  }
 0x1ab   :  { %v4051_v1 = vadd.f32 %v4050_v0, %v7886_v46  ;;  %4402 = vmatpush1.bf16.msra.mxu0 %v7001_v52  ;;  %v4093_v37 = vpop.f32.mrf.mxu1  ;;  %v7016_v46 = vld [vmem:[#allocation5 + $0x168] ss:$16 sps:$4 sm:$0xff]   ;;  %v7084_v0 = vld [vmem:[#allocation5 + $0x30c] ss:$16 sps:$4 sm:$0xff]  }
 0x1ac   :  { %4375 = vmatpush2.bf16.msra.mxu1 %v6998_v51  ;;  %4403 = vmatprep.subr.bf16.mxu0 %v7009_v59  ;;  %v7064_v51 = vld [vmem:[#allocation5 + $0x368] ss:$16 sps:$4 sm:$0xff]   ;;  %v7078_v59 = vld [vmem:[#allocation5 + $0x32c] ss:$16 sps:$4 sm:$0xff]  }
 0x1ad   :  { %4376 = vmatprep.subr.bf16.mxu1 %v7006_v58  ;;  %v7900_v4 = vadd.f32 %v4093_v37, %v4051_v1  ;;  %v7067_v52 = vld [vmem:[#allocation5 + $0x468] ss:$16 sps:$4 sm:$0xff]   ;;  %v7087_v1 = vld [vmem:[#allocation5 + $0x40c] ss:$16 sps:$4 sm:$0xff]  }
 0x1ae   :  { %v7073_v58 = vld [vmem:[#allocation5 + $0x448] ss:$16 sps:$4 sm:$0xff]  }
 0x1af   :  { %4404 = vmatpush1.bf16.msra.mxu0 %v7007_v62  ;;  %v7076_v62 = vld [vmem:[#allocation5 + $0x328] ss:$16 sps:$4 sm:$0xff]  }
 0x1b0   :  { %4377 = vmatpush2.bf16.msra.mxu1 %v7004_v61  ;;  %4405 = vmatprep.subr.bf16.mxu0 %v7015_v3  ;;  %v7081_v61 = vld [vmem:[#allocation5 + $0x42c] ss:$16 sps:$4 sm:$0xff]   ;;  %v7082_v37 = vld [vmem:[#allocation5 + $0x308] ss:$16 sps:$4 sm:$0xff]  }
 0x1b1   :  { %4378 = vmatprep.subr.bf16.mxu1 %v7012_v2  ;;  %v7085_v2 = vld [vmem:[#allocation5 + $0x408] ss:$16 sps:$4 sm:$0xff]   ;;  %v7090_v3 = vld [vmem:[#allocation5 + $0x5ec] ss:$16 sps:$4 sm:$0xff]  }
 0x1b3   :  { %4406 = vmatpush1.bf16.msra.mxu0 %v7013_v6  ;;  %v7088_v6 = vld [vmem:[#allocation5 + $0x5e8] ss:$16 sps:$4 sm:$0xff]  }
 0x1b4   :  { %4379 = vmatpush2.bf16.msra.mxu1 %v7010_v5  ;;  %4407 = vmatprep.subr.bf16.mxu0 %v7021_v8  ;;  %v7093_v5 = vld [vmem:[#allocation5 + $0x6ec] ss:$16 sps:$4 sm:$0xff]   ;;  %v7902_v8 = vpop.f32.mrf.mxu0 }
 0x1b5   :  { %4380 = vmatprep.subr.bf16.mxu1 %v7018_v7  ;;  %v7091_v7 = vld [vmem:[#allocation5 + $0x6e8] ss:$16 sps:$4 sm:$0xff]  }
 0x1b7   :  { %4408 = vmatpush1.bf16.msra.mxu0 %v7019_v9  ;;  %v7096_v9 = vld [vmem:[#allocation5 + $0x5cc] ss:$16 sps:$4 sm:$0xff]  }
 0x1b8   :  { %4381 = vmatpush2.bf16.msra.mxu1 %v7016_v46  ;;  %4409 = vmatprep.subr.bf16.mxu0 %v7027_v11  ;;  %v7904_v46 = vpop.f32.mrf.mxu1  ;;  %v7094_v11 = vld [vmem:[#allocation5 + $0x5c8] ss:$16 sps:$4 sm:$0xff]  }
 0x1b9   :  { %4382 = vmatprep.subr.bf16.mxu1 %v7024_v10  ;;  %v7099_v10 = vld [vmem:[#allocation5 + $0x6cc] ss:$16 sps:$4 sm:$0xff]  }
 0x1bb   :  { %4410 = vmatpush1.bf16.msra.mxu0 %v7025_v14 }
 0x1bc   :  { %4383 = vmatpush2.bf16.msra.mxu1 %v7022_v13  ;;  %4411 = vmatprep.subr.bf16.mxu0 %v7033_v16  ;;  %v7097_v13 = vld [vmem:[#allocation5 + $0x6c8] ss:$16 sps:$4 sm:$0xff]   ;;  %v7560_v16 = vld [vmem:[#allocation2 + $0x8] ss:$76 sps:$4 sm:$0xff]  }
 0x1bd   :  { %4384 = vmatprep.subr.bf16.mxu1 %v7030_v15 }
 0x1bf   :  { %4412 = vmatpush1.bf16.msra.mxu0 %v7031_v19 }
 0x1c0   :  { %4385 = vmatpush2.bf16.msra.mxu1 %v7028_v18  ;;  %4413 = vmatprep.subr.bf16.mxu0 %v7039_v21  ;;  %v7102_v21 = vld [vmem:[#allocation5 + $0x5ac] ss:$16 sps:$4 sm:$0xff]  }
 0x1c1   :  { %4386 = vmatprep.subr.bf16.mxu1 %v7036_v20 }
 0x1c3   :  { %4414 = vmatpush1.bf16.msra.mxu0 %v7037_v23 }
 0x1c4   :  { %4387 = vmatpush2.bf16.msra.mxu1 %v7034_v22  ;;  %4415 = vmatprep.subr.bf16.mxu0 %v7042_v24  ;;  %v7105_v22 = vld [vmem:[#allocation5 + $0x6ac] ss:$16 sps:$4 sm:$0xff]   ;;  %v7100_v24 = vld [vmem:[#allocation5 + $0x5a8] ss:$16 sps:$4 sm:$0xff]  }
 0x1c5   :  { %4442 = vmatprep.subr.bf16.mxu1 %v7045_v25  ;;  %v7103_v25 = vld [vmem:[#allocation5 + $0x6a8] ss:$16 sps:$4 sm:$0xff]  }
 0x1c7   :  { %4389 = vmatmul.mubr.bf16.vlgmr.msra.gmra.mxu1 %v7558_v32  ;;  %4416 = vmatpush2.bf16.msra.mxu0 %v7040_v26  ;;  %v7561_v26 = vld [vmem:[#allocation2 + $0x1c] ss:$76 sps:$4 sm:$0xff]   ;;  %v7106_v32 = vld [vmem:[#allocation5 + $0x588] ss:$16 sps:$4 sm:$0xff]  }
 0x1c8   :  { %4443 = vmatpush1.bf16.msra.mxu1 %v7043_v27  ;;  %4417 = vmatprep.subr.bf16.mxu0 %v7048_v28 }
 0x1c9   :  { %4444 = vmatprep.subr.bf16.mxu1 %v7051_v29  ;;  %4474 = vmatprep.mubr.bf16.mxu1 %v7559_v41  ;;  %v7108_v29 = vld [vmem:[#allocation5 + $0x58c] ss:$16 sps:$4 sm:$0xff]  }
 0x1ca   :  { %v7120_v41 = vld [vmem:[#allocation5 + $0x54c] ss:$16 sps:$4 sm:$0xff]  }
 0x1cb   :  { %4418 = vmatpush2.bf16.msra.mxu0 %v7046_v30  ;;  %v7111_v30 = vld [vmem:[#allocation5 + $0x68c] ss:$16 sps:$4 sm:$0xff]  }
 0x1cc   :  { %4445 = vmatpush1.bf16.msra.mxu1 %v7049_v31  ;;  %4419 = vmatprep.subr.bf16.mxu0 %v7054_v33  ;;  %v7109_v33 = vld [vmem:[#allocation5 + $0x688] ss:$16 sps:$4 sm:$0xff]  }
 0x1cd   :  { %4446 = vmatprep.subr.bf16.mxu1 %v7057_v36  ;;  %v7114_v36 = vld [vmem:[#allocation5 + $0x56c] ss:$16 sps:$4 sm:$0xff]  }
 0x1cf   :  { %4420 = vmatpush2.bf16.msra.mxu0 %v7052_v39  ;;  %v7117_v39 = vld [vmem:[#allocation5 + $0x66c] ss:$16 sps:$4 sm:$0xff]  }
 0x1d0   :  { %4447 = vmatpush1.bf16.msra.mxu1 %v7055_v40  ;;  %4421 = vmatprep.subr.bf16.mxu0 %v7060_v42  ;;  %v7115_v40 = vld [vmem:[#allocation5 + $0x668] ss:$16 sps:$4 sm:$0xff]   ;;  %v7123_v42 = vld [vmem:[#allocation5 + $0x64c] ss:$16 sps:$4 sm:$0xff]  }
 0x1d1   :  { %4448 = vmatprep.subr.bf16.mxu1 %v7063_v43  ;;  %v7118_v43 = vld [vmem:[#allocation5 + $0x548] ss:$16 sps:$4 sm:$0xff]  }
 0x1d3   :  { %4422 = vmatpush2.bf16.msra.mxu0 %v7058_v44  ;;  %v7121_v44 = vld [vmem:[#allocation5 + $0x648] ss:$16 sps:$4 sm:$0xff]  }
 0x1d4   :  { %4449 = vmatpush1.bf16.msra.mxu1 %v7061_v45  ;;  %4423 = vmatprep.subr.bf16.mxu0 %v7066_v49  ;;  %v7126_v45 = vld [vmem:[#allocation5 + $0x52c] ss:$16 sps:$4 sm:$0xff]  }
 0x1d5   :  { %4450 = vmatprep.subr.bf16.mxu1 %v7069_v50  ;;  %v7129_v49 = vld [vmem:[#allocation5 + $0x62c] ss:$16 sps:$4 sm:$0xff]   ;;  %v7124_v50 = vld [vmem:[#allocation5 + $0x528] ss:$16 sps:$4 sm:$0xff]  }
 0x1d7   :  { %4424 = vmatpush2.bf16.msra.mxu0 %v7064_v51  ;;  %v7127_v51 = vld [vmem:[#allocation5 + $0x628] ss:$16 sps:$4 sm:$0xff]  }
 0x1d8   :  { %4451 = vmatpush1.bf16.msra.mxu1 %v7067_v52  ;;  %4425 = vmatprep.subr.bf16.mxu0 %v7072_v53  ;;  %v7132_v52 = vld [vmem:[#allocation5 + $0x50c] ss:$16 sps:$4 sm:$0xff]  }
 0x1d9   :  { %4452 = vmatprep.subr.bf16.mxu1 %v7075_v54  ;;  %v7135_v53 = vld [vmem:[#allocation5 + $0x60c] ss:$16 sps:$4 sm:$0xff]   ;;  %v7130_v54 = vld [vmem:[#allocation5 + $0x508] ss:$16 sps:$4 sm:$0xff]  }
 0x1db   :  { %4426 = vmatpush2.bf16.msra.mxu0 %v7070_v55  ;;  %v7133_v55 = vld [vmem:[#allocation5 + $0x608] ss:$16 sps:$4 sm:$0xff]  }
 0x1dc   :  { %4453 = vmatpush1.bf16.msra.mxu1 %v7073_v58  ;;  %4427 = vmatprep.subr.bf16.mxu0 %v7078_v59  ;;  %v7138_v58 = vld [vmem:[#allocation5 + $0x7ec] ss:$16 sps:$4 sm:$0xff]  }
 0x1dd   :  { %4454 = vmatprep.subr.bf16.mxu1 %v7081_v61  ;;  %v7141_v59 = vld [vmem:[#allocation5 + $0x8ec] ss:$16 sps:$4 sm:$0xff]   ;;  %v7136_v61 = vld [vmem:[#allocation5 + $0x7e8] ss:$16 sps:$4 sm:$0xff]  }
 0x1df   :  { %4428 = vmatpush2.bf16.msra.mxu0 %v7076_v62  ;;  %v7139_v62 = vld [vmem:[#allocation5 + $0x8e8] ss:$16 sps:$4 sm:$0xff]  }
 0x1e0   :  { %4455 = vmatpush1.bf16.msra.mxu1 %v7079_v63  ;;  %4429 = vmatprep.subr.bf16.mxu0 %v7084_v0  ;;  %v7144_v63 = vld [vmem:[#allocation5 + $0x7cc] ss:$16 sps:$4 sm:$0xff]  }
 0x1e1   :  { %4456 = vmatprep.subr.bf16.mxu1 %v7087_v1  ;;  %v7147_v0 = vld [vmem:[#allocation5 + $0x8cc] ss:$16 sps:$4 sm:$0xff]   ;;  %v7142_v1 = vld [vmem:[#allocation5 + $0x7c8] ss:$16 sps:$4 sm:$0xff]  }
 0x1e3   :  { %4430 = vmatpush2.bf16.msra.mxu0 %v7082_v37  ;;  %v7145_v37 = vld [vmem:[#allocation5 + $0x8c8] ss:$16 sps:$4 sm:$0xff]  }
 0x1e4   :  { %4457 = vmatpush1.bf16.msra.mxu1 %v7085_v2  ;;  %4485 = vmatprep.subr.bf16.mxu0 %v7093_v5  ;;  %v7562_v2 = vld [vmem:[#allocation2 + $0x10] ss:$76 sps:$4 sm:$0xff]   ;;  %v7153_v5 = vld [vmem:[#allocation5 + $0x8ac] ss:$16 sps:$4 sm:$0xff]  }
 0x1e5   :  { %4458 = vmatprep.subr.bf16.mxu1 %v7090_v3  ;;  %v7150_v3 = vld [vmem:[#allocation5 + $0x7ac] ss:$16 sps:$4 sm:$0xff]  }
 0x1e6   :  { %v4132_v14 = vpop.f32.mrf.mxu0  ;;  %4432 = vmatmul.mubr.bf16.vlgmr.msra.gmra.mxu0 %v7560_v16  ;;  %v7165_v16 = vld [vmem:[#allocation5 + $0x86c] ss:$16 sps:$4 sm:$0xff]  }
 0x1e7   :  { %v4175_v15 = vpop.f32.mrf.mxu1  ;;  %v4133_v18 = vadd.f32 %v4132_v14, %v7897_v60  ;;  %4486 = vmatpush1.bf16.msra.mxu0 %v7091_v7  ;;  %4517 = vmatprep.mubr.bf16.mxu0 %v7561_v26  ;;  %v7151_v7 = vld [vmem:[#allocation5 + $0x8a8] ss:$16 sps:$4 sm:$0xff]  }
 0x1e8   :  { %4459 = vmatpush2.bf16.msra.mxu1 %v7088_v6  ;;  %v7907_v19 = vpop.f32.mrf.mxu0  ;;  %4487 = vmatprep.subr.bf16.mxu0 %v7099_v10  ;;  %v7148_v6 = vld [vmem:[#allocation5 + $0x7a8] ss:$16 sps:$4 sm:$0xff]   ;;  %v7156_v10 = vld [vmem:[#allocation5 + $0x78c] ss:$16 sps:$4 sm:$0xff]  }
 0x1e9   :  { %v7909_v20 = vpop.f32.mrf.mxu1  ;;  %4460 = vmatprep.subr.bf16.mxu1 %v7096_v9  ;;  %v7911_v23 = vadd.f32 %v4175_v15, %v4133_v18  ;;  %v7563_v9 = vld [vmem:[#allocation2 + $0x24] ss:$76 sps:$4 sm:$0xff]  }
 0x1ea   :  { %v4136_v27 = vpop.f32.mrf.mxu0  ;;  %v7157_v14 = vld [vmem:[#allocation5 + $0x888] ss:$16 sps:$4 sm:$0xff]   ;;  %v7162_v15 = vld [vmem:[#allocation5 + $0x76c] ss:$16 sps:$4 sm:$0xff]  }
 0x1eb   :  { %v4137_v28 = vadd.f32 %v4136_v27, %v7900_v4  ;;  %4488 = vmatpush1.bf16.msra.mxu0 %v7097_v13  ;;  %v4179_v60 = vpop.f32.mrf.mxu1  ;;  %v7112_v4 = vld [vmem:[#allocation5 + $0x568] ss:$16 sps:$4 sm:$0xff]   ;;  %v7174_v27 = vld [vmem:[#allocation5 + $0x72c] ss:$16 sps:$4 sm:$0xff]  }
 0x1ec   :  { %4461 = vmatpush2.bf16.msra.mxu1 %v7094_v11  ;;  %4489 = vmatprep.subr.bf16.mxu0 %v7105_v22  ;;  %v7159_v11 = vld [vmem:[#allocation5 + $0x88c] ss:$16 sps:$4 sm:$0xff]   ;;  %v7154_v13 = vld [vmem:[#allocation5 + $0x788] ss:$16 sps:$4 sm:$0xff]  }
 0x1ed   :  { %4462 = vmatprep.subr.bf16.mxu1 %v7102_v21  ;;  %v7914_v31 = vadd.f32 %v4179_v60, %v4137_v28  ;;  %v7160_v18 = vld [vmem:[#allocation5 + $0x768] ss:$16 sps:$4 sm:$0xff]   ;;  %v7168_v22 = vld [vmem:[#allocation5 + $0x74c] ss:$16 sps:$4 sm:$0xff]  }
 0x1ee   :  { %v7163_v21 = vld [vmem:[#allocation5 + $0x868] ss:$16 sps:$4 sm:$0xff]   ;;  %v7177_v28 = vld [vmem:[#allocation5 + $0x82c] ss:$16 sps:$4 sm:$0xff]  }
 0x1ef   :  { %4490 = vmatpush1.bf16.msra.mxu0 %v7103_v25  ;;  %v7166_v25 = vld [vmem:[#allocation5 + $0x748] ss:$16 sps:$4 sm:$0xff]  }
 0x1f0   :  { %4463 = vmatpush2.bf16.msra.mxu1 %v7100_v24  ;;  %4491 = vmatprep.subr.bf16.mxu0 %v7111_v30  ;;  %v7171_v24 = vld [vmem:[#allocation5 + $0x84c] ss:$16 sps:$4 sm:$0xff]   ;;  %v7169_v26 = vld [vmem:[#allocation5 + $0x848] ss:$16 sps:$4 sm:$0xff]  }
 0x1f1   :  { %4464 = vmatprep.subr.bf16.mxu1 %v7108_v29  ;;  %v7172_v60 = vld [vmem:[#allocation5 + $0x728] ss:$16 sps:$4 sm:$0xff]   ;;  %v7180_v30 = vld [vmem:[#allocation5 + $0x70c] ss:$16 sps:$4 sm:$0xff]  }
 0x1f2   :  { %v7175_v29 = vld [vmem:[#allocation5 + $0x828] ss:$16 sps:$4 sm:$0xff]  }
 0x1f3   :  { %4492 = vmatpush1.bf16.msra.mxu0 %v7109_v33  ;;  %v7178_v33 = vld [vmem:[#allocation5 + $0x708] ss:$16 sps:$4 sm:$0xff]  }
 0x1f4   :  { %4465 = vmatpush2.bf16.msra.mxu1 %v7106_v32  ;;  %4493 = vmatprep.subr.bf16.mxu0 %v7117_v39  ;;  %v7183_v32 = vld [vmem:[#allocation5 + $0x80c] ss:$16 sps:$4 sm:$0xff]  }
 0x1f5   :  { %4466 = vmatprep.subr.bf16.mxu1 %v7114_v36  ;;  %v7181_v36 = vld [vmem:[#allocation5 + $0x808] ss:$16 sps:$4 sm:$0xff]   ;;  %v7186_v39 = vld [vmem:[#allocation5 + $0x9ec] ss:$16 sps:$4 sm:$0xff]  }
 0x1f7   :  { %4494 = vmatpush1.bf16.msra.mxu0 %v7115_v40  ;;  %v7184_v40 = vld [vmem:[#allocation5 + $0x9e8] ss:$16 sps:$4 sm:$0xff]  }
 0x1f8   :  { %4467 = vmatpush2.bf16.msra.mxu1 %v7112_v4  ;;  %4495 = vmatprep.subr.bf16.mxu0 %v7123_v42  ;;  %v7189_v4 = vld [vmem:[#allocation5 + $0xaec] ss:$16 sps:$4 sm:$0xff]   ;;  %v7916_v42 = vpop.f32.mrf.mxu0 }
 0x1f9   :  { %4468 = vmatprep.subr.bf16.mxu1 %v7120_v41  ;;  %v7187_v41 = vld [vmem:[#allocation5 + $0xae8] ss:$16 sps:$4 sm:$0xff]  }
 0x1fb   :  { %4496 = vmatpush1.bf16.msra.mxu0 %v7121_v44  ;;  %v7192_v44 = vld [vmem:[#allocation5 + $0x9cc] ss:$16 sps:$4 sm:$0xff]  }
 0x1fc   :  { %4469 = vmatpush2.bf16.msra.mxu1 %v7118_v43  ;;  %4497 = vmatprep.subr.bf16.mxu0 %v7129_v49  ;;  %v7918_v43 = vpop.f32.mrf.mxu1 }
 0x1fd   :  { %4470 = vmatprep.subr.bf16.mxu1 %v7126_v45  ;;  %v7195_v45 = vld [vmem:[#allocation5 + $0xacc] ss:$16 sps:$4 sm:$0xff]  }
 0x1ff   :  { %4498 = vmatpush1.bf16.msra.mxu0 %v7127_v51  ;;  %v7564_v51 = vld [vmem:[#allocation2 + $0x18] ss:$76 sps:$4 sm:$0xff]  }
 0x200   :  { %4471 = vmatpush2.bf16.msra.mxu1 %v7124_v50  ;;  %4499 = vmatprep.subr.bf16.mxu0 %v7135_v53  ;;  %v7190_v53 = vld [vmem:[#allocation5 + $0x9c8] ss:$16 sps:$4 sm:$0xff]  }
 0x201   :  { %4472 = vmatprep.subr.bf16.mxu1 %v7132_v52 }
 0x203   :  { %4500 = vmatpush1.bf16.msra.mxu0 %v7133_v55 }
 0x204   :  { %4473 = vmatpush2.bf16.msra.mxu1 %v7130_v54  ;;  %4501 = vmatprep.subr.bf16.mxu0 %v7138_v58  ;;  %v7193_v54 = vld [vmem:[#allocation5 + $0xac8] ss:$16 sps:$4 sm:$0xff]  }
 0x205   :  { %4528 = vmatprep.subr.bf16.mxu1 %v7141_v59  ;;  %v7198_v59 = vld [vmem:[#allocation5 + $0x9ac] ss:$16 sps:$4 sm:$0xff]  }
 0x207   :  { %4475 = vmatmul.mubr.bf16.vlgmr.msra.gmra.mxu1 %v7562_v2  ;;  %4502 = vmatpush2.bf16.msra.mxu0 %v7136_v61  ;;  %v7201_v61 = vld [vmem:[#allocation5 + $0xaac] ss:$16 sps:$4 sm:$0xff]  }
 0x208   :  { %4529 = vmatpush1.bf16.msra.mxu1 %v7139_v62  ;;  %4503 = vmatprep.subr.bf16.mxu0 %v7144_v63  ;;  %v7565_v63 = vld [vmem:[#allocation2 + $0x2c] ss:$76 sps:$4 sm:$0xff]  }
 0x209   :  { %4530 = vmatprep.subr.bf16.mxu1 %v7147_v0  ;;  %4560 = vmatprep.mubr.bf16.mxu1 %v7563_v9  ;;  %v7205_v9 = vld [vmem:[#allocation5 + $0xa88] ss:$16 sps:$4 sm:$0xff]  }
 0x20b   :  { %4504 = vmatpush2.bf16.msra.mxu0 %v7142_v1 }
 0x20c   :  { %4531 = vmatpush1.bf16.msra.mxu1 %v7145_v37  ;;  %4505 = vmatprep.subr.bf16.mxu0 %v7150_v3  ;;  %v7199_v37 = vld [vmem:[#allocation5 + $0xaa8] ss:$16 sps:$4 sm:$0xff]   ;;  %v7204_v3 = vld [vmem:[#allocation5 + $0x98c] ss:$16 sps:$4 sm:$0xff]  }
 0x20d   :  { %4532 = vmatprep.subr.bf16.mxu1 %v7153_v5  ;;  %v7207_v5 = vld [vmem:[#allocation5 + $0xa8c] ss:$16 sps:$4 sm:$0xff]  }
 0x20f   :  { %4506 = vmatpush2.bf16.msra.mxu0 %v7148_v6 }
 0x210   :  { %4533 = vmatpush1.bf16.msra.mxu1 %v7151_v7  ;;  %4507 = vmatprep.subr.bf16.mxu0 %v7156_v10  ;;  %v7202_v7 = vld [vmem:[#allocation5 + $0x988] ss:$16 sps:$4 sm:$0xff]   ;;  %v7210_v10 = vld [vmem:[#allocation5 + $0x96c] ss:$16 sps:$4 sm:$0xff]  }
 0x211   :  { %4534 = vmatprep.subr.bf16.mxu1 %v7159_v11  ;;  %v7213_v11 = vld [vmem:[#allocation5 + $0xa6c] ss:$16 sps:$4 sm:$0xff]  }
 0x213   :  { %4508 = vmatpush2.bf16.msra.mxu0 %v7154_v13  ;;  %v7211_v13 = vld [vmem:[#allocation5 + $0xa68] ss:$16 sps:$4 sm:$0xff]  }
 0x214   :  { %4535 = vmatpush1.bf16.msra.mxu1 %v7157_v14  ;;  %4509 = vmatprep.subr.bf16.mxu0 %v7162_v15  ;;  %v7216_v14 = vld [vmem:[#allocation5 + $0x94c] ss:$16 sps:$4 sm:$0xff]  }
 0x215   :  { %4536 = vmatprep.subr.bf16.mxu1 %v7165_v16  ;;  %v7219_v15 = vld [vmem:[#allocation5 + $0xa4c] ss:$16 sps:$4 sm:$0xff]   ;;  %v7214_v16 = vld [vmem:[#allocation5 + $0x948] ss:$16 sps:$4 sm:$0xff]  }
 0x217   :  { %4510 = vmatpush2.bf16.msra.mxu0 %v7160_v18  ;;  %v7217_v18 = vld [vmem:[#allocation5 + $0xa48] ss:$16 sps:$4 sm:$0xff]  }
 0x218   :  { %4537 = vmatpush1.bf16.msra.mxu1 %v7163_v21  ;;  %4511 = vmatprep.subr.bf16.mxu0 %v7168_v22  ;;  %v7222_v21 = vld [vmem:[#allocation5 + $0x92c] ss:$16 sps:$4 sm:$0xff]  }
 0x219   :  { %4538 = vmatprep.subr.bf16.mxu1 %v7171_v24  ;;  %v7225_v22 = vld [vmem:[#allocation5 + $0xa2c] ss:$16 sps:$4 sm:$0xff]   ;;  %v7220_v24 = vld [vmem:[#allocation5 + $0x928] ss:$16 sps:$4 sm:$0xff]  }
 0x21b   :  { %4512 = vmatpush2.bf16.msra.mxu0 %v7166_v25  ;;  %v7223_v25 = vld [vmem:[#allocation5 + $0xa28] ss:$16 sps:$4 sm:$0xff]  }
 0x21c   :  { %4539 = vmatpush1.bf16.msra.mxu1 %v7169_v26  ;;  %4513 = vmatprep.subr.bf16.mxu0 %v7174_v27  ;;  %v7228_v26 = vld [vmem:[#allocation5 + $0x90c] ss:$16 sps:$4 sm:$0xff]  }
 0x21d   :  { %4540 = vmatprep.subr.bf16.mxu1 %v7177_v28  ;;  %v7231_v27 = vld [vmem:[#allocation5 + $0xa0c] ss:$16 sps:$4 sm:$0xff]   ;;  %v7226_v28 = vld [vmem:[#allocation5 + $0x908] ss:$16 sps:$4 sm:$0xff]  }
 0x21f   :  { %4514 = vmatpush2.bf16.msra.mxu0 %v7172_v60  ;;  %v7229_v60 = vld [vmem:[#allocation5 + $0xa08] ss:$16 sps:$4 sm:$0xff]  }
 0x220   :  { %4541 = vmatpush1.bf16.msra.mxu1 %v7175_v29  ;;  %4515 = vmatprep.subr.bf16.mxu0 %v7180_v30  ;;  %v7234_v29 = vld [vmem:[#allocation5 + $0xbec] ss:$16 sps:$4 sm:$0xff]  }
 0x221   :  { %4542 = vmatprep.subr.bf16.mxu1 %v7183_v32  ;;  %v7237_v30 = vld [vmem:[#allocation5 + $0xcec] ss:$16 sps:$4 sm:$0xff]   ;;  %v7232_v32 = vld [vmem:[#allocation5 + $0xbe8] ss:$16 sps:$4 sm:$0xff]  }
 0x223   :  { %4516 = vmatpush2.bf16.msra.mxu0 %v7178_v33  ;;  %v7235_v33 = vld [vmem:[#allocation5 + $0xce8] ss:$16 sps:$4 sm:$0xff]  }
 0x224   :  { %4543 = vmatpush1.bf16.msra.mxu1 %v7181_v36  ;;  %4571 = vmatprep.subr.bf16.mxu0 %v7189_v4  ;;  %v7240_v36 = vld [vmem:[#allocation5 + $0xbcc] ss:$16 sps:$4 sm:$0xff]   ;;  %v7566_v4 = vld [vmem:[#allocation2 + $0x20] ss:$76 sps:$4 sm:$0xff]  }
 0x225   :  { %4544 = vmatprep.subr.bf16.mxu1 %v7186_v39  ;;  %v7243_v39 = vld [vmem:[#allocation5 + $0xccc] ss:$16 sps:$4 sm:$0xff]  }
 0x226   :  { %v4218_v49 = vpop.f32.mrf.mxu0  ;;  %4518 = vmatmul.mubr.bf16.vlgmr.msra.gmra.mxu0 %v7564_v51  ;;  %v7247_v51 = vld [vmem:[#allocation5 + $0xca8] ss:$16 sps:$4 sm:$0xff]  }
 0x227   :  { %v4261_v50 = vpop.f32.mrf.mxu1  ;;  %v4219_v52 = vadd.f32 %v4218_v49, %v7911_v23  ;;  %4572 = vmatpush1.bf16.msra.mxu0 %v7187_v41  ;;  %4603 = vmatprep.mubr.bf16.mxu0 %v7565_v63  ;;  %v7196_v23 = vld [vmem:[#allocation5 + $0x9a8] ss:$16 sps:$4 sm:$0xff]   ;;  %v7261_v63 = vld [vmem:[#allocation5 + $0xc6c] ss:$16 sps:$4 sm:$0xff]  }
 0x228   :  { %4545 = vmatpush2.bf16.msra.mxu1 %v7184_v40  ;;  %v7921_v55 = vpop.f32.mrf.mxu0  ;;  %4573 = vmatprep.subr.bf16.mxu0 %v7195_v45  ;;  %v7238_v40 = vld [vmem:[#allocation5 + $0xbc8] ss:$16 sps:$4 sm:$0xff]   ;;  %v7249_v45 = vld [vmem:[#allocation5 + $0xcac] ss:$16 sps:$4 sm:$0xff]  }
 0x229   :  { %v7923_v58 = vpop.f32.mrf.mxu1  ;;  %4546 = vmatprep.subr.bf16.mxu1 %v7192_v44  ;;  %v7925_v62 = vadd.f32 %v4261_v50, %v4219_v52  ;;  %v7241_v41 = vld [vmem:[#allocation5 + $0xcc8] ss:$16 sps:$4 sm:$0xff]   ;;  %v7246_v44 = vld [vmem:[#allocation5 + $0xbac] ss:$16 sps:$4 sm:$0xff]  }
 0x22a   :  { %v4222_v0 = vpop.f32.mrf.mxu0  ;;  %v7567_v49 = vld [vmem:[#allocation2 + $0x34] ss:$76 sps:$4 sm:$0xff]  }
 0x22b   :  { %v4223_v1 = vadd.f32 %v4222_v0, %v7914_v31  ;;  %4574 = vmatpush1.bf16.msra.mxu0 %v7193_v54  ;;  %v4265_v2 = vpop.f32.mrf.mxu1  ;;  %v7208_v31 = vld [vmem:[#allocation5 + $0x968] ss:$16 sps:$4 sm:$0xff]   ;;  %v7252_v52 = vld [vmem:[#allocation5 + $0xb8c] ss:$16 sps:$4 sm:$0xff]  }
 0x22c   :  { %4547 = vmatpush2.bf16.msra.mxu1 %v7190_v53  ;;  %4575 = vmatprep.subr.bf16.mxu0 %v7201_v61  ;;  %v7244_v50 = vld [vmem:[#allocation5 + $0xba8] ss:$16 sps:$4 sm:$0xff]   ;;  %v7255_v53 = vld [vmem:[#allocation5 + $0xc8c] ss:$16 sps:$4 sm:$0xff]  }
 0x22d   :  { %4548 = vmatprep.subr.bf16.mxu1 %v7198_v59  ;;  %v7928_v6 = vadd.f32 %v4265_v2, %v4223_v1  ;;  %v7250_v54 = vld [vmem:[#allocation5 + $0xb88] ss:$16 sps:$4 sm:$0xff]   ;;  %v7258_v61 = vld [vmem:[#allocation5 + $0xb6c] ss:$16 sps:$4 sm:$0xff]  }
 0x22e   :  { %v7253_v59 = vld [vmem:[#allocation5 + $0xc88] ss:$16 sps:$4 sm:$0xff]  }
 0x22f   :  { %4576 = vmatpush1.bf16.msra.mxu0 %v7199_v37  ;;  %v7256_v0 = vld [vmem:[#allocation5 + $0xb68] ss:$16 sps:$4 sm:$0xff]   ;;  %v7267_v37 = vld [vmem:[#allocation5 + $0xc4c] ss:$16 sps:$4 sm:$0xff]  }
 0x230   :  { %4549 = vmatpush2.bf16.msra.mxu1 %v7196_v23  ;;  %4577 = vmatprep.subr.bf16.mxu0 %v7207_v5  ;;  %v7259_v1 = vld [vmem:[#allocation5 + $0xc68] ss:$16 sps:$4 sm:$0xff]   ;;  %v7264_v23 = vld [vmem:[#allocation5 + $0xb4c] ss:$16 sps:$4 sm:$0xff]  }
 0x231   :  { %4550 = vmatprep.subr.bf16.mxu1 %v7204_v3  ;;  %v7262_v2 = vld [vmem:[#allocation5 + $0xb48] ss:$16 sps:$4 sm:$0xff]   ;;  %v7270_v5 = vld [vmem:[#allocation5 + $0xb2c] ss:$16 sps:$4 sm:$0xff]  }
 0x232   :  { %v7265_v3 = vld [vmem:[#allocation5 + $0xc48] ss:$16 sps:$4 sm:$0xff]  }
 0x233   :  { %4578 = vmatpush1.bf16.msra.mxu0 %v7205_v9  ;;  %v7268_v9 = vld [vmem:[#allocation5 + $0xb28] ss:$16 sps:$4 sm:$0xff]  }
 0x234   :  { %4551 = vmatpush2.bf16.msra.mxu1 %v7202_v7  ;;  %4579 = vmatprep.subr.bf16.mxu0 %v7213_v11  ;;  %v7273_v7 = vld [vmem:[#allocation5 + $0xc2c] ss:$16 sps:$4 sm:$0xff]  }
 0x235   :  { %4552 = vmatprep.subr.bf16.mxu1 %v7210_v10  ;;  %v7271_v10 = vld [vmem:[#allocation5 + $0xc28] ss:$16 sps:$4 sm:$0xff]   ;;  %v7276_v11 = vld [vmem:[#allocation5 + $0xb0c] ss:$16 sps:$4 sm:$0xff]  }
 0x237   :  { %4580 = vmatpush1.bf16.msra.mxu0 %v7211_v13  ;;  %v7274_v13 = vld [vmem:[#allocation5 + $0xb08] ss:$16 sps:$4 sm:$0xff]  }
 0x238   :  { %4553 = vmatpush2.bf16.msra.mxu1 %v7208_v31  ;;  %4581 = vmatprep.subr.bf16.mxu0 %v7219_v15  ;;  %v7279_v31 = vld [vmem:[#allocation5 + $0xc0c] ss:$16 sps:$4 sm:$0xff]  }
 0x239   :  { %4554 = vmatprep.subr.bf16.mxu1 %v7216_v14  ;;  %v7277_v14 = vld [vmem:[#allocation5 + $0xc08] ss:$16 sps:$4 sm:$0xff]   ;;  %v7282_v15 = vld [vmem:[#allocation5 + $0xdec] ss:$16 sps:$4 sm:$0xff]  }
 0x23b   :  { %4582 = vmatpush1.bf16.msra.mxu0 %v7217_v18  ;;  %v7930_v18 = vpop.f32.mrf.mxu1 }
 0x23c   :  { %4555 = vmatpush2.bf16.msra.mxu1 %v7214_v16  ;;  %4583 = vmatprep.subr.bf16.mxu0 %v7225_v22  ;;  %v7285_v16 = vld [vmem:[#allocation5 + $0xeec] ss:$16 sps:$4 sm:$0xff]   ;;  %v7283_v22 = vld [vmem:[#allocation5 + $0xee8] ss:$16 sps:$4 sm:$0xff]  }
 0x23d   :  { %4556 = vmatprep.subr.bf16.mxu1 %v7222_v21  ;;  %v7280_v21 = vld [vmem:[#allocation5 + $0xde8] ss:$16 sps:$4 sm:$0xff]  }
 0x23f   :  { %4584 = vmatpush1.bf16.msra.mxu0 %v7223_v25 }
 0x240   :  { %4557 = vmatpush2.bf16.msra.mxu1 %v7220_v24  ;;  %4585 = vmatprep.subr.bf16.mxu0 %v7231_v27  ;;  %v7932_v24 = vpop.f32.mrf.mxu0  ;;  %v7291_v27 = vld [vmem:[#allocation5 + $0xecc] ss:$16 sps:$4 sm:$0xff]  }
 0x241   :  { %4558 = vmatprep.subr.bf16.mxu1 %v7228_v26  ;;  %v7288_v26 = vld [vmem:[#allocation5 + $0xdcc] ss:$16 sps:$4 sm:$0xff]  }
 0x243   :  { %4586 = vmatpush1.bf16.msra.mxu0 %v7229_v60  ;;  %v7568_v60 = vld [vmem:[#allocation2 + $0x28] ss:$76 sps:$4 sm:$0xff]  }
 0x244   :  { %4559 = vmatpush2.bf16.msra.mxu1 %v7226_v28  ;;  %4587 = vmatprep.subr.bf16.mxu0 %v7234_v29 }
 0x245   :  { %4614 = vmatprep.subr.bf16.mxu1 %v7237_v30  ;;  %v7286_v30 = vld [vmem:[#allocation5 + $0xdc8] ss:$16 sps:$4 sm:$0xff]  }
 0x247   :  { %4561 = vmatmul.mubr.bf16.vlgmr.msra.gmra.mxu1 %v7566_v4  ;;  %4588 = vmatpush2.bf16.msra.mxu0 %v7232_v32  ;;  %v4347_v25 = vpop.f32.mrf.mxu1  ;;  %v7289_v32 = vld [vmem:[#allocation5 + $0xec8] ss:$16 sps:$4 sm:$0xff]   ;;  %v7297_v4 = vld [vmem:[#allocation5 + $0xeac] ss:$16 sps:$4 sm:$0xff]  }
 0x248   :  { %4615 = vmatpush1.bf16.msra.mxu1 %v7235_v33  ;;  %4589 = vmatprep.subr.bf16.mxu0 %v7240_v36 }
 0x249   :  { %4616 = vmatprep.subr.bf16.mxu1 %v7243_v39  ;;  %4646 = vmatprep.mubr.bf16.mxu1 %v7567_v49  ;;  %v7935_v33 = vpop.f32.mrf.mxu1  ;;  %v7294_v39 = vld [vmem:[#allocation5 + $0xdac] ss:$16 sps:$4 sm:$0xff]   ;;  %v7295_v49 = vld [vmem:[#allocation5 + $0xea8] ss:$16 sps:$4 sm:$0xff]  }
 0x24b   :  { %4590 = vmatpush2.bf16.msra.mxu0 %v7238_v40 }
 0x24c   :  { %4617 = vmatpush1.bf16.msra.mxu1 %v7241_v41  ;;  %4591 = vmatprep.subr.bf16.mxu0 %v7246_v44  ;;  %v7569_v41 = vld [vmem:[#allocation2 + $0x3c] ss:$76 sps:$4 sm:$0xff]  }
 0x24d   :  { %4618 = vmatprep.subr.bf16.mxu1 %v7249_v45 }
 0x24f   :  { %4592 = vmatpush2.bf16.msra.mxu0 %v7244_v50  ;;  %v4351_v50 = vpop.f32.mrf.mxu1 }
 0x250   :  { %4619 = vmatpush1.bf16.msra.mxu1 %v7247_v51  ;;  %4593 = vmatprep.subr.bf16.mxu0 %v7252_v52  ;;  %v7300_v51 = vld [vmem:[#allocation5 + $0xd8c] ss:$16 sps:$4 sm:$0xff]  }
 0x251   :  { %4620 = vmatprep.subr.bf16.mxu1 %v7255_v53  ;;  %v7303_v52 = vld [vmem:[#allocation5 + $0xe8c] ss:$16 sps:$4 sm:$0xff]  }
 0x253   :  { %4594 = vmatpush2.bf16.msra.mxu0 %v7250_v54 }
 0x254   :  { %4621 = vmatpush1.bf16.msra.mxu1 %v7253_v59  ;;  %4595 = vmatprep.subr.bf16.mxu0 %v7258_v61  ;;  %v7298_v61 = vld [vmem:[#allocation5 + $0xd88] ss:$16 sps:$4 sm:$0xff]  }
 0x255   :  { %4622 = vmatprep.subr.bf16.mxu1 %v7261_v63  ;;  %v7301_v63 = vld [vmem:[#allocation5 + $0xe88] ss:$16 sps:$4 sm:$0xff]  }
 0x257   :  { %4596 = vmatpush2.bf16.msra.mxu0 %v7256_v0  ;;  %v7306_v0 = vld [vmem:[#allocation5 + $0xd6c] ss:$16 sps:$4 sm:$0xff]  }
 0x258   :  { %4623 = vmatpush1.bf16.msra.mxu1 %v7259_v1  ;;  %4597 = vmatprep.subr.bf16.mxu0 %v7264_v23  ;;  %v7304_v23 = vld [vmem:[#allocation5 + $0xd68] ss:$16 sps:$4 sm:$0xff]  }
 0x259   :  { %4624 = vmatprep.subr.bf16.mxu1 %v7267_v37  ;;  %v7307_v37 = vld [vmem:[#allocation5 + $0xe68] ss:$16 sps:$4 sm:$0xff]  }
 0x25b   :  { %4598 = vmatpush2.bf16.msra.mxu0 %v7262_v2  ;;  %v7312_v2 = vld [vmem:[#allocation5 + $0xd4c] ss:$16 sps:$4 sm:$0xff]  }
 0x25c   :  { %4625 = vmatpush1.bf16.msra.mxu1 %v7265_v3  ;;  %4599 = vmatprep.subr.bf16.mxu0 %v7270_v5  ;;  %v7315_v3 = vld [vmem:[#allocation5 + $0xe4c] ss:$16 sps:$4 sm:$0xff]   ;;  %v7310_v5 = vld [vmem:[#allocation5 + $0xd48] ss:$16 sps:$4 sm:$0xff]  }
 0x25d   :  { %4626 = vmatprep.subr.bf16.mxu1 %v7273_v7  ;;  %v7313_v7 = vld [vmem:[#allocation5 + $0xe48] ss:$16 sps:$4 sm:$0xff]  }
 0x25f   :  { %4600 = vmatpush2.bf16.msra.mxu0 %v7268_v9  ;;  %v7318_v9 = vld [vmem:[#allocation5 + $0xd2c] ss:$16 sps:$4 sm:$0xff]  }
 0x260   :  { %4627 = vmatpush1.bf16.msra.mxu1 %v7271_v10  ;;  %4601 = vmatprep.subr.bf16.mxu0 %v7276_v11  ;;  %v7321_v10 = vld [vmem:[#allocation5 + $0xe2c] ss:$16 sps:$4 sm:$0xff]   ;;  %v7316_v11 = vld [vmem:[#allocation5 + $0xd28] ss:$16 sps:$4 sm:$0xff]  }
 0x261   :  { %4628 = vmatprep.subr.bf16.mxu1 %v7279_v31  ;;  %v7319_v31 = vld [vmem:[#allocation5 + $0xe28] ss:$16 sps:$4 sm:$0xff]  }
 0x263   :  { %4602 = vmatpush2.bf16.msra.mxu0 %v7274_v13  ;;  %v7324_v13 = vld [vmem:[#allocation5 + $0xd0c] ss:$16 sps:$4 sm:$0xff]  }
 0x264   :  { %4629 = vmatpush1.bf16.msra.mxu1 %v7277_v14  ;;  %4657 = vmatprep.subr.bf16.mxu0 %v7285_v16  ;;  %v7327_v14 = vld [vmem:[#allocation5 + $0xe0c] ss:$16 sps:$4 sm:$0xff]   ;;  %v7325_v16 = vld [vmem:[#allocation5 + $0xe08] ss:$16 sps:$4 sm:$0xff]  }
 0x265   :  { %4630 = vmatprep.subr.bf16.mxu1 %v7282_v15  ;;  %v7322_v15 = vld [vmem:[#allocation5 + $0xd08] ss:$16 sps:$4 sm:$0xff]  }
 0x266   :  { %v4304_v28 = vpop.f32.mrf.mxu0  ;;  %4604 = vmatmul.mubr.bf16.vlgmr.msra.gmra.mxu0 %v7568_v60  ;;  %v7570_v60 = vld [vmem:[#allocation2 + $0x30] ss:$76 sps:$4 sm:$0xff]  }
 0x267   :  { %v4305_v29 = vadd.f32 %v4304_v28, %v7925_v62  ;;  %4658 = vmatpush1.bf16.msra.mxu0 %v7283_v22  ;;  %4689 = vmatprep.mubr.bf16.mxu0 %v7569_v41  ;;  %v7292_v62 = vld [vmem:[#allocation5 + $0xda8] ss:$16 sps:$4 sm:$0xff]   ;;  %v7333_v22 = vld [vmem:[#allocation5 + $0x10ec] ss:$16 sps:$4 sm:$0xff]  }
 0x268   :  { %4631 = vmatpush2.bf16.msra.mxu1 %v7280_v21  ;;  %v7937_v36 = vpop.f32.mrf.mxu0  ;;  %4659 = vmatprep.subr.bf16.mxu0 %v7291_v27  ;;  %v7330_v21 = vld [vmem:[#allocation5 + $0xfec] ss:$16 sps:$4 sm:$0xff]   ;;  %v7343_v41 = vld [vmem:[#allocation5 + $0x10a8] ss:$16 sps:$4 sm:$0xff]  }
 0x269   :  { %4632 = vmatprep.subr.bf16.mxu1 %v7288_v26  ;;  %v4348_v40 = vadd.f32 %v4347_v25, %v4305_v29  ;;  %v7328_v25 = vld [vmem:[#allocation5 + $0xfe8] ss:$16 sps:$4 sm:$0xff]   ;;  %v7336_v27 = vld [vmem:[#allocation5 + $0xfcc] ss:$16 sps:$4 sm:$0xff]  }
 0x26a   :  { %v4308_v44 = vpop.f32.mrf.mxu0  ;;  %v7331_v26 = vld [vmem:[#allocation5 + $0x10e8] ss:$16 sps:$4 sm:$0xff]   ;;  %v7339_v28 = vld [vmem:[#allocation5 + $0x10cc] ss:$16 sps:$4 sm:$0xff]  }
 0x26b   :  { %v4309_v45 = vadd.f32 %v4308_v44, %v7928_v6  ;;  %4660 = vmatpush1.bf16.msra.mxu0 %v7289_v32  ;;  %v4786_v54 = vmax.f32 %v4348_v40, 0.0  ;;  %v7309_v6 = vld [vmem:[#allocation5 + $0xe6c] ss:$16 sps:$4 sm:$0xff]   ;;  %v7334_v29 = vld [vmem:[#allocation5 + $0xfc8] ss:$16 sps:$4 sm:$0xff]  }
 0x26c   :  { %4633 = vmatpush2.bf16.msra.mxu1 %v7286_v30  ;;  %4661 = vmatprep.subr.bf16.mxu0 %v7297_v4  ;;  %v7337_v30 = vld [vmem:[#allocation5 + $0x10c8] ss:$16 sps:$4 sm:$0xff]   ;;  %v7342_v32 = vld [vmem:[#allocation5 + $0xfac] ss:$16 sps:$4 sm:$0xff]  }
 0x26d   :  { %4634 = vmatprep.subr.bf16.mxu1 %v7294_v39  ;;  %v4352_v53 = vadd.f32 %v4351_v50, %v4309_v45  ;;  %v7345_v39 = vld [vmem:[#allocation5 + $0x10ac] ss:$16 sps:$4 sm:$0xff]   ;;  %v7340_v40 = vld [vmem:[#allocation5 + $0xfa8] ss:$16 sps:$4 sm:$0xff]  }
 0x26e   :  { %v7571_v4 = vld [vmem:[#allocation2 + $0x44] ss:$76 sps:$4 sm:$0xff]  }
 0x26f   :  { %v4790_v59 = vmax.f32 %v4352_v53, 0.0  ;;  %4662 = vmatpush1.bf16.msra.mxu0 %v7295_v49  ;;  %v7348_v44 = vld [vmem:[#allocation5 + $0xf8c] ss:$16 sps:$4 sm:$0xff]   ;;  %v7349_v49 = vld [vmem:[#allocation5 + $0x1088] ss:$16 sps:$4 sm:$0xff]  }
 0x270   :  { %4635 = vmatpush2.bf16.msra.mxu1 %v7292_v62  ;;  %4663 = vmatprep.subr.bf16.mxu0 %v7303_v52  ;;  %v7351_v45 = vld [vmem:[#allocation5 + $0x108c] ss:$16 sps:$4 sm:$0xff]   ;;  %v7346_v62 = vld [vmem:[#allocation5 + $0xf88] ss:$16 sps:$4 sm:$0xff]  }
 0x271   :  { %4636 = vmatprep.subr.bf16.mxu1 %v7300_v51  ;;  %v7940_v1 = vpack.c.bf16 %v4790_v59, %v4786_v54  ;;  %v7354_v50 = vld [vmem:[#allocation5 + $0xf6c] ss:$16 sps:$4 sm:$0xff]   ;;  %v7352_v52 = vld [vmem:[#allocation5 + $0xf68] ss:$16 sps:$4 sm:$0xff]  }
 0x272   :  { %v7357_v51 = vld [vmem:[#allocation5 + $0x106c] ss:$16 sps:$4 sm:$0xff]   ;;  %v7355_v53 = vld [vmem:[#allocation5 + $0x1068] ss:$16 sps:$4 sm:$0xff]  }
 0x273   :  { %4664 = vmatpush1.bf16.msra.mxu0 %v7301_v63  ;;  %v7360_v54 = vld [vmem:[#allocation5 + $0xf4c] ss:$16 sps:$4 sm:$0xff]   ;;  %v7361_v63 = vld [vmem:[#allocation5 + $0x1048] ss:$16 sps:$4 sm:$0xff]  }
 0x274   :  { %4637 = vmatpush2.bf16.msra.mxu1 %v7298_v61  ;;  %4665 = vmatprep.subr.bf16.mxu0 %v7309_v6  ;;  %v7363_v59 = vld [vmem:[#allocation5 + $0x104c] ss:$16 sps:$4 sm:$0xff]   ;;  %v7358_v61 = vld [vmem:[#allocation5 + $0xf48] ss:$16 sps:$4 sm:$0xff]  }
 0x275   :  { %4638 = vmatprep.subr.bf16.mxu1 %v7306_v0  ;;  %v7366_v0 = vld [vmem:[#allocation5 + $0xf2c] ss:$16 sps:$4 sm:$0xff]  }
 0x276   :  { %v7369_v6 = vld [vmem:[#allocation5 + $0x102c] ss:$16 sps:$4 sm:$0xff]  }
 0x277   :  { %4666 = vmatpush1.bf16.msra.mxu0 %v7307_v37  ;;  %v7364_v37 = vld [vmem:[#allocation5 + $0xf28] ss:$16 sps:$4 sm:$0xff]  }
 0x278   :  { %4639 = vmatpush2.bf16.msra.mxu1 %v7304_v23  ;;  %4667 = vmatprep.subr.bf16.mxu0 %v7315_v3  ;;  %v776_v23 = vsub.s32 1, %v7874_v12  ;;  %v7372_v3 = vld [vmem:[#allocation5 + $0xf0c] ss:$16 sps:$4 sm:$0xff]  }
 0x279   :  { %4640 = vmatprep.subr.bf16.mxu1 %v7312_v2  ;;  %v7367_v2 = vld [vmem:[#allocation5 + $0x1028] ss:$16 sps:$4 sm:$0xff]  }
 0x27b   :  { %4668 = vmatpush1.bf16.msra.mxu0 %v7313_v7  ;;  %v7943_v7 = vld [vmem:[#allocation7] sm:$0xf] }
 0x27c   :  { %4641 = vmatpush2.bf16.msra.mxu1 %v7310_v5  ;;  %4669 = vmatprep.subr.bf16.mxu0 %v7321_v10  ;;  %v7375_v5 = vld [vmem:[#allocation5 + $0x100c] ss:$16 sps:$4 sm:$0xff]   ;;  %v7370_v10 = vld [vmem:[#allocation5 + $0xf08] ss:$16 sps:$4 sm:$0xff]  }
 0x27d   :  { %4642 = vmatprep.subr.bf16.mxu1 %v7318_v9  ;;  %v777_v9 = vrot.slane %v7943_v7, %v776_v23 }
 0x27f   :  { %4670 = vmatpush1.bf16.msra.mxu0 %v7319_v31  ;;  %v7378_v31 = vld [vmem:[#allocation5 + $0x11ec] ss:$16 sps:$4 sm:$0xff]  }
 0x280   :  { %4643 = vmatpush2.bf16.msra.mxu1 %v7316_v11  ;;  %4671 = vmatprep.subr.bf16.mxu0 %v7327_v14  ;;  %v7373_v11 = vld [vmem:[#allocation5 + $0x1008] ss:$16 sps:$4 sm:$0xff]   ;;  %v3967_v14 = vadd.f32 %v7888_v47, %v777_v9 }
 0x281   :  { %4644 = vmatprep.subr.bf16.mxu1 %v7324_v13  ;;  %v7381_v13 = vld [vmem:[#allocation5 + $0x12ec] ss:$16 sps:$4 sm:$0xff]   ;;  %v7382_v47 = vld [vmem:[#allocation5 + $0x11c8] ss:$16 sps:$4 sm:$0xff]  }
 0x283   :  { %4672 = vmatpush1.bf16.msra.mxu0 %v7325_v16  ;;  %v7376_v16 = vld [vmem:[#allocation5 + $0x11e8] ss:$16 sps:$4 sm:$0xff]  }
 0x284   :  { %4645 = vmatpush2.bf16.msra.mxu1 %v7322_v15  ;;  %4673 = vmatprep.subr.bf16.mxu0 %v7330_v21  ;;  %v3963_v15 = vadd.f32 %v7879_v34, %v777_v9  ;;  %v7379_v21 = vld [vmem:[#allocation5 + $0x12e8] ss:$16 sps:$4 sm:$0xff]  }
 0x285   :  { %4700 = vmatprep.subr.bf16.mxu1 %v7333_v22  ;;  %v7384_v22 = vld [vmem:[#allocation5 + $0x11cc] ss:$16 sps:$4 sm:$0xff]   ;;  %v7385_v34 = vld [vmem:[#allocation5 + $0x12c8] ss:$16 sps:$4 sm:$0xff]  }
 0x286   :  { %v7418_v9 = vld [vmem:[#allocation5 + $0x1108] ss:$16 sps:$4 sm:$0xff]  }
 0x287   :  { %4647 = vmatmul.mubr.bf16.vlgmr.msra.gmra.mxu1 %v7570_v60  ;;  %4674 = vmatpush2.bf16.msra.mxu0 %v7328_v25  ;;  %v7387_v25 = vld [vmem:[#allocation5 + $0x12cc] ss:$16 sps:$4 sm:$0xff]  }
 0x288   :  { %4701 = vmatpush1.bf16.msra.mxu1 %v7331_v26  ;;  %4675 = vmatprep.subr.bf16.mxu0 %v7336_v27  ;;  %v4010_v26 = vadd.f32 %v7890_v48, %v3967_v14  ;;  %v7573_v27 = vld [vmem:[#allocation2 + $0x38] ss:$76 sps:$4 sm:$0xff]  }
 0x289   :  { %4702 = vmatprep.subr.bf16.mxu1 %v7339_v28  ;;  %4732 = vmatprep.mubr.bf16.mxu1 %v7571_v4  ;;  %v4006_v28 = vadd.f32 %v7881_v35, %v3963_v15  ;;  %v7391_v35 = vld [vmem:[#allocation5 + $0x12a8] ss:$16 sps:$4 sm:$0xff]   ;;  %v7399_v4 = vld [vmem:[#allocation5 + $0x128c] ss:$16 sps:$4 sm:$0xff]  }
 0x28a   :  { %v4053_v60 = vadd.f32 %v7902_v8, %v4010_v26  ;;  %v7396_v8 = vld [vmem:[#allocation5 + $0x118c] ss:$16 sps:$4 sm:$0xff]   ;;  %v7574_v15 = vld [vmem:[#allocation2 + $0x40] ss:$76 sps:$4 sm:$0xff]  }
 0x28b   :  { %4676 = vmatpush2.bf16.msra.mxu0 %v7334_v29  ;;  %v7390_v29 = vld [vmem:[#allocation5 + $0x11ac] ss:$16 sps:$4 sm:$0xff]  }
 0x28c   :  { %4703 = vmatpush1.bf16.msra.mxu1 %v7337_v30  ;;  %4677 = vmatprep.subr.bf16.mxu0 %v7342_v32  ;;  %v7393_v30 = vld [vmem:[#allocation5 + $0x12ac] ss:$16 sps:$4 sm:$0xff]   ;;  %v4049_v32 = vadd.f32 %v7893_v56, %v4006_v28  ;;  %v4096_v48 = vadd.f32 %v7904_v46, %v4053_v60  ;;  %v7394_v56 = vld [vmem:[#allocation5 + $0x1188] ss:$16 sps:$4 sm:$0xff]  }
 0x28d   :  { %4704 = vmatprep.subr.bf16.mxu1 %v7345_v39  ;;  %v7388_v39 = vld [vmem:[#allocation5 + $0x11a8] ss:$16 sps:$4 sm:$0xff]   ;;  %v7402_v46 = vld [vmem:[#allocation5 + $0x116c] ss:$16 sps:$4 sm:$0xff]  }
 0x28e   :  { %v7472_v26 = vld [vmem:[#allocation8 + $0x170] ss:$8 sps:$4 sm:$0xff]   ;;  %v7477_v28 = vld [vmem:[#allocation8 + $0x164] ss:$8 sps:$4 sm:$0xff]   ;;  %v7433_v60 = vld [vmem:[#allocation8 + $0x40] ss:$8 sps:$4 sm:$0xff]  }
 0x28f   :  { %4678 = vmatpush2.bf16.msra.mxu0 %v7340_v40  ;;  %v4092_v40 = vadd.f32 %v7895_v57, %v4049_v32  ;;  %v7400_v57 = vld [vmem:[#allocation5 + $0x1168] ss:$16 sps:$4 sm:$0xff]  }
 0x290   :  { %4705 = vmatpush1.bf16.msra.mxu1 %v7343_v41  ;;  %4679 = vmatprep.subr.bf16.mxu0 %v7348_v44  ;;  %v4139_v41 = vadd.f32 %v7916_v42, %v4096_v48  ;;  %v7403_v42 = vld [vmem:[#allocation5 + $0x1268] ss:$16 sps:$4 sm:$0xff]   ;;  %v7478_v48 = vld [vmem:[#allocation8 + $0x150] ss:$8 sps:$4 sm:$0xff]  }
 0x291   :  { %4706 = vmatprep.subr.bf16.mxu1 %v7351_v45  ;;  %v4135_v44 = vadd.f32 %v7907_v19, %v4092_v40  ;;  %v7405_v45 = vld [vmem:[#allocation5 + $0x126c] ss:$16 sps:$4 sm:$0xff]   ;;  %v7441_v32 = vld [vmem:[#allocation8 + $0x24] ss:$8 sps:$4 sm:$0xff]  }
 0x292   :  { %v7408_v19 = vld [vmem:[#allocation5 + $0x114c] ss:$16 sps:$4 sm:$0xff]  }
 0x293   :  { %4680 = vmatpush2.bf16.msra.mxu0 %v7346_v62  ;;  %v4182_v62 = vadd.f32 %v7918_v43, %v4139_v41  ;;  %v7406_v43 = vld [vmem:[#allocation5 + $0x1148] ss:$16 sps:$4 sm:$0xff]   ;;  %v7442_v40 = vld [vmem:[#allocation8 + $0x10] ss:$8 sps:$4 sm:$0xff]  }
 0x294   :  { %4707 = vmatpush1.bf16.msra.mxu1 %v7349_v49  ;;  %4681 = vmatprep.subr.bf16.mxu0 %v7354_v50  ;;  %v4178_v49 = vadd.f32 %v7909_v20, %v4135_v44  ;;  %v7414_v20 = vld [vmem:[#allocation5 + $0x112c] ss:$16 sps:$4 sm:$0xff]   ;;  %v7447_v41 = vld [vmem:[#allocation8 + $0x4] ss:$8 sps:$4 sm:$0xff]  }
 0x295   :  { %4708 = vmatprep.subr.bf16.mxu1 %v7357_v51  ;;  %v4225_v50 = vadd.f32 %v7932_v24, %v4182_v62  ;;  %v7411_v51 = vld [vmem:[#allocation5 + $0x124c] ss:$16 sps:$4 sm:$0xff]  }
 0x296   :  { %v7417_v24 = vld [vmem:[#allocation5 + $0x122c] ss:$16 sps:$4 sm:$0xff]  }
 0x297   :  { %4682 = vmatpush2.bf16.msra.mxu0 %v7352_v52  ;;  %v4221_v52 = vadd.f32 %v7921_v55, %v4178_v49  ;;  %v7415_v55 = vld [vmem:[#allocation5 + $0x1228] ss:$16 sps:$4 sm:$0xff]   ;;  %v7445_v44 = vld [vmem:[#allocation8] ss:$8 sps:$4 sm:$0xff]   ;;  %v7484_v62 = vld [vmem:[#allocation8 + $0x130] ss:$8 sps:$4 sm:$0xff]  }
 0x298   :  { %4709 = vmatpush1.bf16.msra.mxu1 %v7355_v53  ;;  %4683 = vmatprep.subr.bf16.mxu0 %v7360_v54  ;;  %v4310_v53 = vpop.f32.mrf.mxu0  ;;  %v4268_v54 = vadd.f32 %v7930_v18, %v4225_v50  ;;  %v7420_v18 = vld [vmem:[#allocation5 + $0x110c] ss:$16 sps:$4 sm:$0xff]   ;;  %v7456_v50 = vld [vmem:[#allocation8 + $0xd4] ss:$8 sps:$4 sm:$0xff]  }
 0x299   :  { %4710 = vmatprep.subr.bf16.mxu1 %v7363_v59  ;;  %v7409_v59 = vld [vmem:[#allocation5 + $0x1248] ss:$16 sps:$4 sm:$0xff]   ;;  %v7451_v49 = vld [vmem:[#allocation8 + $0xe0] ss:$8 sps:$4 sm:$0xff]  }
 0x29b   :  { %4684 = vmatpush2.bf16.msra.mxu0 %v7358_v61  ;;  %v4264_v61 = vadd.f32 %v7923_v58, %v4221_v52  ;;  %v7426_v58 = vld [vmem:[#allocation8 + $0x74] ss:$8 sps:$4 sm:$0xff]  }
 0x29c   :  { %4711 = vmatpush1.bf16.msra.mxu1 %v7361_v63  ;;  %4685 = vmatprep.subr.bf16.mxu0 %v7366_v0  ;;  %v4311_v63 = vadd.f32 %v4310_v53, %v4268_v54  ;;  %v7492_v52 = vld [vmem:[#allocation8 + $0x114] ss:$8 sps:$4 sm:$0xff]   ;;  %v7490_v53 = vld [vmem:[#allocation8 + $0x110] ss:$8 sps:$4 sm:$0xff]   ;;  %v7495_v54 = vld [vmem:[#allocation8 + $0x104] ss:$8 sps:$4 sm:$0xff]  }
 0x29d   :  { %4712 = vmatprep.subr.bf16.mxu1 %v7369_v6  ;;  %v4307_v0 = vadd.f32 %v7937_v36, %v4264_v61  ;;  %v7412_v6 = vld [vmem:[#allocation5 + $0x1128] ss:$16 sps:$4 sm:$0xff]   ;;  %v7460_v61 = vld [vmem:[#allocation8 + $0xb0] ss:$8 sps:$4 sm:$0xff]  }
 0x29f   :  { %4686 = vmatpush2.bf16.msra.mxu0 %v7364_v37  ;;  %v4353_v37 = vpop.f32.mrf.mxu1 }
 0x2a0   :  { %4713 = vmatpush1.bf16.msra.mxu1 %v7367_v2  ;;  %4687 = vmatprep.subr.bf16.mxu0 %v7372_v3  ;;  %v7423_v2 = vld [vmem:[#allocation5 + $0x120c] ss:$16 sps:$4 sm:$0xff]   ;;  %v4354_v3 = vadd.f32 %v4353_v37, %v4311_v63 }
 0x2a1   :  { %4714 = vmatprep.subr.bf16.mxu1 %v7375_v5  ;;  %v4350_v5 = vadd.f32 %v7935_v33, %v4307_v0  ;;  %v7427_v33 = vld [vmem:[#allocation8 + $0x60] ss:$8 sps:$4 sm:$0xff]   ;;  %v7496_v63 = vld [vmem:[#allocation8 + $0x1f0] ss:$8 sps:$4 sm:$0xff]   ;;  %v7465_v0 = vld [vmem:[#allocation8 + $0xa4] ss:$8 sps:$4 sm:$0xff]  }
 0x2a2   :  { %v4791_v36 = vmax.f32 %v4354_v3, 0.0  ;;  %v7499_v37 = vld [vmem:[#allocation8 + $0x1e0] ss:$8 sps:$4 sm:$0xff]   ;;  %v7466_v3 = vld [vmem:[#allocation8 + $0x90] ss:$8 sps:$4 sm:$0xff]  }
 0x2a3   :  { %4688 = vmatpush2.bf16.msra.mxu0 %v7370_v10  ;;  %v7421_v10 = vld [vmem:[#allocation5 + $0x1208] ss:$16 sps:$4 sm:$0xff]  }
 0x2a4   :  { %4715 = vmatpush1.bf16.msra.mxu1 %v7373_v11  ;;  %4743 = vmatprep.subr.bf16.mxu0 %v7381_v13  ;;  %v4787_v11 = vmax.f32 %v4350_v5, 0.0  ;;  %v7429_v13 = vld [vmem:[#allocation8 + $0x64] ss:$8 sps:$4 sm:$0xff]   ;;  %v7502_v5 = vld [vmem:[#allocation8 + $0x1d0] ss:$8 sps:$4 sm:$0xff]  }
 0x2a5   :  { %4716 = vmatprep.subr.bf16.mxu1 %v7378_v31  ;;  %v7424_v31 = vld [vmem:[#allocation8 + $0x70] ss:$8 sps:$4 sm:$0xff]  }
 0x2a6   :  { %4690 = vmatmul.mubr.bf16.vlgmr.msra.gmra.mxu0 %v7573_v27  ;;  %v4795_v14 = vpack.c.bf16 %v4791_v36, %v4787_v11  ;;  %v7474_v27 = vld [vmem:[#allocation8 + $0x174] ss:$8 sps:$4 sm:$0xff]   ;;  %v7505_v36 = vld [vmem:[#allocation8 + $0x1c0] ss:$8 sps:$4 sm:$0xff]  }
 0x2a7   :  { %4744 = vmatpush1.bf16.msra.mxu0 %v7379_v21  ;;  %4775 = vmatprep.mubr.bf16.mxu0 %v7782_v38  ;;  %v7397_v38 = vld [vmem:[#allocation5 + $0x1288] ss:$16 sps:$4 sm:$0xff]  }
 0x2a8   :  { %4717 = vmatpush2.bf16.msra.mxu1 %v7376_v16  ;;  %4745 = vmatprep.subr.bf16.mxu0 %v7387_v25  ;;  %v7575_v16 = vld [vmem:[#allocation2 + $0x48] ss:$76 sps:$4 sm:$0xff]   ;;  %v7432_v21 = vld [vmem:[#allocation8 + $0x54] ss:$8 sps:$4 sm:$0xff]  }
 0x2a9   :  { %4718 = vmatprep.subr.bf16.mxu1 %v7384_v22  ;;  %v7430_v22 = vld [vmem:[#allocation8 + $0x50] ss:$8 sps:$4 sm:$0xff]   ;;  %v7435_v25 = vld [vmem:[#allocation8 + $0x44] ss:$8 sps:$4 sm:$0xff]   ;;  %v7510_v11 = vld [vmem:[#allocation8 + $0x1b4] ss:$8 sps:$4 sm:$0xff]  }
 0x2ab   :  { %4746 = vmatpush1.bf16.msra.mxu0 %v7385_v34  ;;  %v7475_v34 = vld [vmem:[#allocation8 + $0x160] ss:$8 sps:$4 sm:$0xff]  }
 0x2ac   :  { %4719 = vmatpush2.bf16.msra.mxu1 %v7382_v47  ;;  %4747 = vmatprep.subr.bf16.mxu0 %v7393_v30  ;;  %v7438_v47 = vld [vmem:[#allocation8 + $0x34] ss:$8 sps:$4 sm:$0xff]   ;;  %v7436_v30 = vld [vmem:[#allocation8 + $0x30] ss:$8 sps:$4 sm:$0xff]  }
 0x2ad   :  { %4720 = vmatprep.subr.bf16.mxu1 %v7390_v29  ;;  %v7480_v29 = vld [vmem:[#allocation8 + $0x154] ss:$8 sps:$4 sm:$0xff]  }
 0x2af   :  { %4748 = vmatpush1.bf16.msra.mxu0 %v7391_v35  ;;  %v7439_v35 = vld [vmem:[#allocation8 + $0x20] ss:$8 sps:$4 sm:$0xff]  }
 0x2b0   :  { %4721 = vmatpush2.bf16.msra.mxu1 %v7388_v39  ;;  %4749 = vmatprep.subr.bf16.mxu0 %v7399_v4  ;;  %v7483_v39 = vld [vmem:[#allocation8 + $0x144] ss:$8 sps:$4 sm:$0xff]   ;;  %v7481_v4 = vld [vmem:[#allocation8 + $0x140] ss:$8 sps:$4 sm:$0xff]  }
 0x2b1   :  { %4722 = vmatprep.subr.bf16.mxu1 %v7396_v8  ;;  %v7444_v8 = vld [vmem:[#allocation8 + $0x14] ss:$8 sps:$4 sm:$0xff]  }
 0x2b3   :  { %4750 = vmatpush1.bf16.msra.mxu0 %v7397_v38  ;;  %v7448_v38 = vld [vmem:[#allocation8 + $0xf0] ss:$8 sps:$4 sm:$0xff]  }
 0x2b4   :  { %4723 = vmatpush2.bf16.msra.mxu1 %v7394_v56  ;;  %4751 = vmatprep.subr.bf16.mxu0 %v7405_v45  ;;  %v7450_v56 = vld [vmem:[#allocation8 + $0xf4] ss:$8 sps:$4 sm:$0xff]  }
 0x2b5   :  { %4724 = vmatprep.subr.bf16.mxu1 %v7402_v46  ;;  %v7453_v46 = vld [vmem:[#allocation8 + $0xe4] ss:$8 sps:$4 sm:$0xff]   ;;  %v7486_v45 = vld [vmem:[#allocation8 + $0x134] ss:$8 sps:$4 sm:$0xff]  }
 0x2b7   :  { %4752 = vmatpush1.bf16.msra.mxu0 %v7403_v42  ;;  %v7487_v42 = vld [vmem:[#allocation8 + $0x120] ss:$8 sps:$4 sm:$0xff]  }
 0x2b8   :  { %4725 = vmatpush2.bf16.msra.mxu1 %v7400_v57  ;;  %4753 = vmatprep.subr.bf16.mxu0 %v7411_v51  ;;  %v7489_v57 = vld [vmem:[#allocation8 + $0x124] ss:$8 sps:$4 sm:$0xff]  }
 0x2b9   :  { %4726 = vmatprep.subr.bf16.mxu1 %v7408_v19  ;;  %v7454_v19 = vld [vmem:[#allocation8 + $0xd0] ss:$8 sps:$4 sm:$0xff]   ;;  %v7459_v51 = vld [vmem:[#allocation8 + $0xc4] ss:$8 sps:$4 sm:$0xff]  }
 0x2bb   :  { %4754 = vmatpush1.bf16.msra.mxu0 %v7409_v59  ;;  %v7493_v59 = vld [vmem:[#allocation8 + $0x100] ss:$8 sps:$4 sm:$0xff]  }
 0x2bc   :  { %4727 = vmatpush2.bf16.msra.mxu1 %v7406_v43  ;;  %4755 = vmatprep.subr.bf16.mxu0 %v7417_v24  ;;  %v7457_v43 = vld [vmem:[#allocation8 + $0xc0] ss:$8 sps:$4 sm:$0xff]   ;;  %v7498_v24 = vld [vmem:[#allocation8 + $0x1f4] ss:$8 sps:$4 sm:$0xff]  }
 0x2bd   :  { %4728 = vmatprep.subr.bf16.mxu1 %v7414_v20  ;;  %v7462_v20 = vld [vmem:[#allocation8 + $0xb4] ss:$8 sps:$4 sm:$0xff]  }
 0x2bf   :  { %4756 = vmatpush1.bf16.msra.mxu0 %v7415_v55  ;;  %v7463_v55 = vld [vmem:[#allocation8 + $0xa0] ss:$8 sps:$4 sm:$0xff]  }
 0x2c0   :  { %4729 = vmatpush2.bf16.msra.mxu1 %v7412_v6  ;;  %4757 = vmatprep.subr.bf16.mxu0 %v7423_v2  ;;  %v7501_v6 = vld [vmem:[#allocation8 + $0x1e4] ss:$8 sps:$4 sm:$0xff]   ;;  %v7504_v2 = vld [vmem:[#allocation8 + $0x1d4] ss:$8 sps:$4 sm:$0xff]  }
 0x2c1   :  { %4730 = vmatprep.subr.bf16.mxu1 %v7420_v18  ;;  %v7468_v18 = vld [vmem:[#allocation8 + $0x94] ss:$8 sps:$4 sm:$0xff]  }
 0x2c3   :  { %4758 = vmatpush1.bf16.msra.mxu0 %v7421_v10  ;;  %v7507_v10 = vld [vmem:[#allocation8 + $0x1c4] ss:$8 sps:$4 sm:$0xff]  }
 0x2c4   :  { %4731 = vmatpush2.bf16.msra.mxu1 %v7418_v9  ;;  %5194 = vmatprep.subr.bf16.mxu0 %v7426_v58  ;;  %v7471_v9 = vld [vmem:[#allocation8 + $0x84] ss:$8 sps:$4 sm:$0xff]   ;;  %v7469_v58 = vld [vmem:[#allocation8 + $0x80] ss:$8 sps:$4 sm:$0xff]  }
 0x2c5   :  { %5237 = vmatprep.subr.bf16.mxu1 %v7474_v27  ;;  %v4433_v27 = vpop.f32.mrf.mxu0 }
 0x2c6   :  { %4776 = vmatmul.mubr.bf16.vlgmr.msra.gmra.mxu0 %v7575_v16  ;;  %v7514_v16 = vld [vmem:[#allocation8 + $0x190] ss:$8 sps:$4 sm:$0xff]  }
 0x2c7   :  { %4733 = vmatmul.mubr.bf16.vlgmr.msra.gmra.mxu1 %v7574_v15  ;;  %5195 = vmatpush1.bf16.msra.mxu0 %v7424_v31  ;;  %v7508_v31 = vld [vmem:[#allocation8 + $0x1b0] ss:$8 sps:$4 sm:$0xff]   ;;  %v7516_v15 = vld [vmem:[#allocation8 + $0x194] ss:$8 sps:$4 sm:$0xff]  }
 0x2c8   :  { %5226 = vmatprep.mubr.bf16.mxu0 %v4795_v14  ;;  %5196 = vmatprep.subr.bf16.mxu0 %v7429_v13  ;;  %v7513_v13 = vld [vmem:[#allocation8 + $0x1a4] ss:$8 sps:$4 sm:$0xff]   ;;  %v7511_v14 = vld [vmem:[#allocation8 + $0x1a0] ss:$8 sps:$4 sm:$0xff]  }
 0x2c9   :  { %5238 = vmatpush1.bf16.msra.mxu1 %v7472_v26  ;;  %v4390_v26 = vpop.f32.mrf.mxu1 }
 0x2ca   :  { %5239 = vmatprep.subr.bf16.mxu1 %v7477_v28  ;;  %v7524_v28 = vld [vmem:[%s8089_s5 + $0x70] sm:$0xff]  }
 0x2cb   :  { %5197 = vmatpush1.bf16.msra.mxu0 %v7427_v33  ;;  %v7519_v33 = vld [vmem:[#allocation8 + $0x184] ss:$8 sps:$4 sm:$0xff]  }
 0x2cc   :  { %5198 = vmatprep.subr.bf16.mxu0 %v7432_v21  ;;  %v7517_v21 = vld [vmem:[#allocation8 + $0x180] ss:$8 sps:$4 sm:$0xff]  }
 0x2cd   :  { %5240 = vmatpush1.bf16.msra.mxu1 %v7475_v34  ;;  %v4392_v34 = vpop.f32.mrf.mxu1 }
 0x2ce   :  { %5241 = vmatprep.subr.bf16.mxu1 %v7480_v29  ;;  %v4435_v29 = vpop.f32.mrf.mxu0 }
 0x2cf   :  { %5199 = vmatpush1.bf16.msra.mxu0 %v7430_v22  ;;  %v7520_v22 = vld [vmem:[%s8089_s5 + $0x78] sm:$0xff]  }
 0x2d0   :  { %5200 = vmatprep.subr.bf16.mxu0 %v7435_v25  ;;  %v7522_v25 = vld [vmem:[%s8089_s5 + $0x38] sm:$0xff]  }
 0x2d1   :  { %5242 = vmatpush1.bf16.msra.mxu1 %v7478_v48  ;;  %v4394_v48 = vpop.f32.mrf.mxu1 }
 0x2d2   :  { %5243 = vmatprep.subr.bf16.mxu1 %v7483_v39  ;;  %v4437_v39 = vpop.f32.mrf.mxu0 }
 0x2d3   :  { %5201 = vmatpush1.bf16.msra.mxu0 %v7433_v60  ;;  %v7526_v60 = vld [vmem:[%s8089_s5 + $0x30] sm:$0xff]  }
 0x2d4   :  { %5202 = vmatprep.subr.bf16.mxu0 %v7438_v47  ;;  %v7528_v47 = vld [vmem:[%s8089_s5 + $0x68] sm:$0xff]  }
 0x2d5   :  { %5244 = vmatpush1.bf16.msra.mxu1 %v7481_v4  ;;  %v4396_v4 = vpop.f32.mrf.mxu1 }
 0x2d6   :  { %5245 = vmatprep.subr.bf16.mxu1 %v7486_v45 }
 0x2d7   :  { %5203 = vmatpush1.bf16.msra.mxu0 %v7436_v30  ;;  %v7530_v30 = vld [vmem:[%s8089_s5 + $0x28] sm:$0xff]  }
 0x2d8   :  { %5204 = vmatprep.subr.bf16.mxu0 %v7441_v32  ;;  %v7532_v32 = vld [vmem:[%s8089_s5 + $0x60] sm:$0xff]  }
 0x2d9   :  { %5246 = vmatpush1.bf16.msra.mxu1 %v7484_v62 }
 0x2da   :  { %5247 = vmatprep.subr.bf16.mxu1 %v7489_v57 }
 0x2db   :  { %5205 = vmatpush1.bf16.msra.mxu0 %v7439_v35  ;;  %v7534_v35 = vld [vmem:[%s8089_s5 + $0x20] sm:$0xff]  }
 0x2dc   :  { %5206 = vmatprep.subr.bf16.mxu0 %v7444_v8  ;;  %v7536_v8 = vld [vmem:[%s8089_s5 + $0x58] sm:$0xff]  }
 0x2dd   :  { %5248 = vmatpush1.bf16.msra.mxu1 %v7487_v42 }
 0x2de   :  { %5249 = vmatprep.subr.bf16.mxu1 %v7492_v52  ;;  %v784_v52 = vsub.s32 3, %v7874_v12 }
 0x2df   :  { %5207 = vmatpush1.bf16.msra.mxu0 %v7442_v40  ;;  %v4439_v40 = vpop.f32.mrf.mxu0 }
 0x2e0   :  { %5208 = vmatprep.subr.bf16.mxu0 %v7447_v41  ;;  %v4476_v41 = vpop.f32.mrf.mxu1 }
 0x2e1   :  { %5250 = vmatpush1.bf16.msra.mxu1 %v7490_v53  ;;  %v780_v53 = vsub.s32 2, %v7874_v12 }
 0x2e2   :  { %5251 = vmatprep.subr.bf16.mxu1 %v7495_v54 }
 0x2e3   :  { %5209 = vmatpush1.bf16.msra.mxu0 %v7445_v44 }
 0x2e4   :  { %5210 = vmatprep.subr.bf16.mxu0 %v7450_v56  ;;  %v7538_v56 = vld [vmem:[%s8089_s5 + $0x18] sm:$0xff]  }
 0x2e5   :  { %5252 = vmatpush1.bf16.msra.mxu1 %v7493_v59  ;;  %v785_v59 = vrot.slane %v7943_v7, %v784_v52 }
 0x2e6   :  { %5253 = vmatprep.subr.bf16.mxu1 %v7498_v24  ;;  %v4519_v44 = vpop.f32.mrf.mxu0 }
 0x2e7   :  { %5211 = vmatpush2.bf16.msra.mxu0 %v7448_v38  ;;  %v4478_v38 = vpop.f32.mrf.mxu1 }
 0x2e8   :  { %5212 = vmatprep.subr.bf16.mxu0 %v7453_v46  ;;  %v4521_v46 = vpop.f32.mrf.mxu0 }
 0x2e9   :  { %5254 = vmatpush2.bf16.msra.mxu1 %v7496_v63  ;;  %v4480_v45 = vpop.f32.mrf.mxu1 }
 0x2ea   :  { %5255 = vmatprep.subr.bf16.mxu1 %v7501_v6  ;;  %v4523_v62 = vpop.f32.mrf.mxu0  ;;  %v4393_v6 = vadd.f32 %v4392_v34, %v785_v59 }
 0x2eb   :  { %5213 = vmatpush2.bf16.msra.mxu0 %v7451_v49  ;;  %v4482_v49 = vpop.f32.mrf.mxu1 }
 0x2ec   :  { %5214 = vmatprep.subr.bf16.mxu0 %v7456_v50  ;;  %v4525_v50 = vpop.f32.mrf.mxu0 }
 0x2ed   :  { %5256 = vmatpush2.bf16.msra.mxu1 %v7499_v37 }
 0x2ee   :  { %5257 = vmatprep.subr.bf16.mxu1 %v7504_v2 }
 0x2ef   :  { %5215 = vmatpush2.bf16.msra.mxu0 %v7454_v19 }
 0x2f0   :  { %5216 = vmatprep.subr.bf16.mxu0 %v7459_v51 }
 0x2f1   :  { %5258 = vmatpush2.bf16.msra.mxu1 %v7502_v5 }
 0x2f2   :  { %5259 = vmatprep.subr.bf16.mxu1 %v7507_v10 }
 0x2f3   :  { %5217 = vmatpush2.bf16.msra.mxu0 %v7457_v43 }
 0x2f4   :  { %5218 = vmatprep.subr.bf16.mxu0 %v7462_v20  ;;  %v781_v20 = vrot.slane %v7943_v7, %v780_v53 }
 0x2f5   :  { %5260 = vmatpush2.bf16.msra.mxu1 %v7505_v36 }
 0x2f6   :  { %5261 = vmatprep.subr.bf16.mxu1 %v7510_v11  ;;  %v4395_v37 = vadd.f32 %v4394_v48, %v781_v20 }
 0x2f7   :  { %5219 = vmatpush2.bf16.msra.mxu0 %v7460_v61 }
 0x2f8   :  { %5220 = vmatprep.subr.bf16.mxu0 %v7465_v0  ;;  %v4438_v10 = vadd.f32 %v4437_v39, %v4395_v37  ;;  %v7529_v37 = vld [vmem:[%s8091_s7 + $0x68] sm:$0xff]  }
 0x2f9   :  { %5262 = vmatpush2.bf16.msra.mxu1 %v7508_v31 }
 0x2fa   :  { %5263 = vmatprep.subr.bf16.mxu1 %v7513_v13  ;;  %v4481_v31 = vadd.f32 %v4480_v45, %v4438_v10  ;;  %v7540_v10 = vld [vmem:[%s8089_s5 + $0x50] sm:$0xff]  }
 0x2fb   :  { %5221 = vmatpush2.bf16.msra.mxu0 %v7463_v55  ;;  %v4391_v55 = vadd.f32 %v4390_v26, %v781_v20 }
 0x2fc   :  { %5222 = vmatprep.subr.bf16.mxu0 %v7468_v18  ;;  %v4436_v18 = vadd.f32 %v4435_v29, %v4393_v6  ;;  %v7525_v6 = vld [vmem:[%s8091_s7 + $0x70] sm:$0xff]  }
 0x2fd   :  { %5264 = vmatpush2.bf16.msra.mxu1 %v7511_v14  ;;  %v4434_v2 = vadd.f32 %v4433_v27, %v4391_v55  ;;  %v7527_v55 = vld [vmem:[%s8091_s7 + $0x30] sm:$0xff]  }
 0x2fe   :  { %5265 = vmatprep.subr.bf16.mxu1 %v7516_v15 }
 0x2ff   :  { %5223 = vmatpush2.bf16.msra.mxu0 %v7466_v3  ;;  %v4477_v36 = vadd.f32 %v4476_v41, %v4434_v2  ;;  %v7533_v2 = vld [vmem:[%s8091_s7 + $0x60] sm:$0xff]  }
 0x300   :  { %5224 = vmatprep.subr.bf16.mxu0 %v7471_v9  ;;  %v4397_v9 = vadd.f32 %v4396_v4, %v785_v59 }
 0x301   :  { %5266 = vmatpush2.bf16.msra.mxu1 %v7514_v16  ;;  %v4520_v14 = vadd.f32 %v4519_v44, %v4477_v36  ;;  %v7542_v36 = vld [vmem:[%s8089_s5 + $0x10] sm:$0xff]  }
 0x302   :  { %5267 = vmatprep.subr.bf16.mxu1 %v7519_v33  ;;  %v4440_v11 = vadd.f32 %v4439_v40, %v4397_v9  ;;  %v4524_v33 = vadd.f32 %v4523_v62, %v4481_v31  ;;  %v7539_v9 = vld [vmem:[%s8091_s7 + $0x18] sm:$0xff]   ;;  %v7544_v31 = vld [vmem:[%s8089_s5 + $0x48] sm:$0xff]  }
 0x303   :  { %5225 = vmatpush2.bf16.msra.mxu0 %v7469_v58  ;;  %v4479_v58 = vadd.f32 %v4478_v38, %v4436_v18  ;;  %v7531_v18 = vld [vmem:[%s8091_s7 + $0x28] sm:$0xff]  }
 0x304   :  { %6424 = vmatprep.subr.bf16.mxu0 %v7520_v22  ;;  %v4483_v16 = vadd.f32 %v4482_v49, %v4440_v11  ;;  %v7543_v11 = vld [vmem:[%s8091_s7 + $0x10] sm:$0xff]  }
 0x305   :  { %5268 = vmatpush2.bf16.msra.mxu1 %v7517_v21  ;;  %v4522_v13 = vadd.f32 %v4521_v46, %v4479_v58  ;;  %v7541_v58 = vld [vmem:[%s8091_s7 + $0x50] sm:$0xff]  }
 0x306   :  { %5227 = vmatmul.mubr.bf16.vlgmr.msra.gmra.mxu0 %v7940_v1  ;;  %v7521_v1 = vld [vmem:[%s8091_s7 + $0x78] sm:$0xff]  }
 0x307   :  { %6446 = vmatprep.subr.bf16.mxu1 %v7521_v1  ;;  %6425 = vmatpush3.bf16.msra.mxu0 %v7522_v25  ;;  %v4562_v57 = vpop.f32.mrf.mxu1  ;;  %v4526_v1 = vadd.f32 %v4525_v50, %v4483_v16  ;;  %v7549_v16 = vld [vmem:[%s8091_s7 + $0x40] sm:$0xff]  }
 0x308   :  { %6426 = vmatprep.subr.bf16.mxu0 %v7524_v28  ;;  %v4563_v22 = vadd.f32 %v4562_v57, %v4520_v14  ;;  %v7546_v14 = vld [vmem:[%s8089_s5 + $0x8] sm:$0xff]  }
 0x309   :  { %v4564_v19 = vpop.f32.mrf.mxu1 }
 0x30a   :  { %v4565_v21 = vadd.f32 %v4564_v19, %v4522_v13  ;;  %v7545_v13 = vld [vmem:[%s8091_s7 + $0x48] sm:$0xff]  }
 0x30b   :  { %6427 = vmatpush3.bf16.msra.mxu0 %v7526_v60  ;;  %v4566_v54 = vpop.f32.mrf.mxu1 }
 0x30c   :  { %6428 = vmatprep.subr.bf16.mxu0 %v7528_v47  ;;  %v4567_v25 = vadd.f32 %v4566_v54, %v4524_v33  ;;  %v7550_v33 = vld [vmem:[%s8089_s5] sm:$0xff]  }
 0x30d   :  { %v4568_v24 = vpop.f32.mrf.mxu1 }
 0x30e   :  { %v4569_v47 = vadd.f32 %v4568_v24, %v4526_v1 }
 0x30f   :  { %6429 = vmatpush3.bf16.msra.mxu0 %v7530_v30 }
 0x310   :  { %6430 = vmatprep.subr.bf16.mxu0 %v7532_v32 }
 0x313   :  { %6431 = vmatpush3.bf16.msra.mxu0 %v7534_v35 }
 0x314   :  { %6432 = vmatprep.subr.bf16.mxu0 %v7536_v8 }
 0x317   :  { %6433 = vmatpush3.bf16.msra.mxu0 %v7538_v56 }
 0x318   :  { %6434 = vmatprep.subr.bf16.mxu0 %v7540_v10 }
 0x31b   :  { %6435 = vmatpush3.bf16.msra.mxu0 %v7542_v36 }
 0x31c   :  { %6436 = vmatprep.subr.bf16.mxu0 %v7544_v31 }
 0x31f   :  { %6437 = vmatpush3.bf16.msra.mxu0 %v7546_v14 }
 0x326   :  { %v4605_v42 = vpop.f32.mrf.mxu0 }
 0x327   :  { %v4606_v27 = vadd.f32 %v4605_v42, %v4563_v22 }
 0x328   :  { %v4607_v51 = vpop.f32.mrf.mxu0 }
 0x329   :  { %v4608_v26 = vadd.f32 %v4607_v51, %v4565_v21  ;;  %v7551_v21 = vld [vmem:[%s8091_s7] sm:$0xff]  }
 0x32a   :  { %v4609_v43 = vpop.f32.mrf.mxu0 }
 0x32b   :  { %v4610_v34 = vadd.f32 %v4609_v43, %v4567_v25  ;;  %v4862_v25 = vld [vmem:[#allocation10] sm:$0x3] }
 0x32c   :  { %v4611_v61 = vpop.f32.mrf.mxu0 }
 0x32d   :  { %v4612_v39 = vadd.f32 %v4611_v61, %v4569_v47 }
 0x347   :  { %v4648_v63 = vpop.f32.mrf.mxu1 }
 0x348   :  { %v4649_v30 = vadd.f32 %v4648_v63, %v4606_v27  ;;  %v7523_v63 = vld [vmem:[%s8091_s7 + $0x38] sm:$0xff]   ;;  %v4871_v27 = vrot.slane %v4862_v25, %v776_v23 }
 0x349   :  { %v4650_v3 = vpop.f32.mrf.mxu1 }
 0x34a   :  { %v4651_v29 = vadd.f32 %v4650_v3, %v4608_v26  ;;  %v7535_v3 = vld [vmem:[%s8091_s7 + $0x20] sm:$0xff]  }
 0x34b   :  { %v4652_v7 = vpop.f32.mrf.mxu1 }
 0x34c   :  { %v4653_v35 = vadd.f32 %v4652_v7, %v4610_v34  ;;  %v7547_v7 = vld [vmem:[%s8091_s7 + $0x8] sm:$0xff]  }
 0x34d   :  { %v4654_v28 = vpop.f32.mrf.mxu1 }
 0x34e   :  { %v4655_v44 = vadd.f32 %v4654_v28, %v4612_v39  ;;  %v4867_v28 = vrot.slane %v4862_v25, %v772_v17 }
 0x366   :  { %v4691_v0 = vpop.f32.mrf.mxu0 }
 0x367   :  { %v4692_v4 = vadd.f32 %v4691_v0, %v4649_v30 }
 0x368   :  { %v4693_v5 = vpop.f32.mrf.mxu0 }
 0x369   :  { %v4694_v8 = vadd.f32 %v4693_v5, %v4651_v29  ;;  %v7537_v5 = vld [vmem:[%s8091_s7 + $0x58] sm:$0xff]  }
 0x36a   :  { %v4695_v15 = vpop.f32.mrf.mxu0 }
 0x36b   :  { %v4696_v56 = vadd.f32 %v4695_v15, %v4653_v35  ;;  %v7548_v15 = vld [vmem:[%s8089_s5 + $0x40] sm:$0xff]   ;;  %s7783_s5 = smov [#allocation16]  }
 0x36c   :  { %v4697_v60 = vpop.f32.mrf.mxu0  ;;  %6438 = vmatprep.subr.bf16.mxu0 %v7548_v15  ;;  %s5679_s7 = sshll.u32 %s7783_s5, 4  ;;  %s5680_s7 = int_to_ptr.vmem [resolvable:$true] %s5679_s7 }
 0x36d   :  { %v4698_v49 = vadd.f32 %v4697_v60, %v4655_v44  ;;  %6439 = vmatpush3.bf16.msra.mxu0 %v7550_v33  ;;  %s7736_s13 = scalar_lea.vmem %s5680_s7, 256  ;;  %p7741_p13 = scmp.lt.s32.totalorder %s5680_s7, %s5680_s7 }
 0x36e   :  { %p7737_p12 = scmp.ne.s32.totalorder %s5680_s7, %s7736_s13  ;;  %p7742_p0 = scmp.lt.s32.totalorder %s7736_s13, %s7736_s13 }
 0x370   :  { %p7743_p1 = por %p7742_p0, %p7741_p13 }
 0x372   :  { %p7744_p2 = pnand %p7743_p1, %p7737_p12 }
 0x386   :  { %v4777_v48 = vpop.f32.mrf.mxu0 }
 0x387   :  { %v4734_v32 = vpop.f32.mrf.mxu1 }
 0x388   :  { %v4779_v41 = vpop.f32.mrf.mxu0  ;;  %v4735_v46 = vadd.f32 %v4734_v32, %v4692_v4 }
 0x389   :  { %v4736_v40 = vpop.f32.mrf.mxu1 }
 0x38a   :  { %v4737_v38 = vadd.f32 %v4736_v40, %v4694_v8  ;;  %v4781_v62 = vpop.f32.mrf.mxu0  ;;  %v4778_v52 = vadd.f32 %v4777_v48, %v4735_v46 }
 0x38b   :  { %v4738_v45 = vpop.f32.mrf.mxu1 }
 0x38c   :  { %v4739_v50 = vadd.f32 %v4738_v45, %v4696_v56  ;;  %v4780_v42 = vadd.f32 %v4779_v41, %v4737_v38  ;;  %v4783_v53 = vpop.f32.mrf.mxu0  ;;  %v4788_v24 = vmax.f32 %v4778_v52, 0.0  ;;  %v6407_v45 = vld [vmem:[#allocation13] ss:$0 sm:$0xff] }
 0x38d   :  { %v4740_v57 = vpop.f32.mrf.mxu1 }
 0x38e   :  { %v4782_v19 = vadd.f32 %v4781_v62, %v4739_v50  ;;  %v4741_v51 = vadd.f32 %v4740_v57, %v4698_v49  ;;  %v4789_v59 = vmax.f32 %v4780_v42, 0.0 }
 0x390   :  { %v4784_v54 = vadd.f32 %v4783_v53, %v4741_v51  ;;  %v4792_v43 = vmax.f32 %v4782_v19, 0.0 }
 0x392   :  { %v4793_v20 = vmax.f32 %v4784_v54, 0.0  ;;  %v4796_v0 = vpack.c.bf16 %v4792_v43, %v4788_v24 }
 0x394   :  { %v4797_v61 = vpack.c.bf16 %v4793_v20, %v4789_v59 }
 0x396   :  { %5269 = vmatprep.mubr.bf16.mxu1 %v4797_v61  ;;  %v6390_v61 = vld [vmem:[#allocation11] ss:$0 sm:$0xff] }
 0x397   :  { %5270 = vmatmul.mubr.bf16.vlgmr.msra.gmra.mxu1 %v4796_v0 }
 0x398   :  { %6447 = vmatpush3.bf16.msra.mxu1 %v7523_v63 }
 0x399   :  { %6448 = vmatprep.subr.bf16.mxu1 %v7525_v6 }
 0x39c   :  { %6449 = vmatpush3.bf16.msra.mxu1 %v7527_v55 }
 0x39d   :  { %6450 = vmatprep.subr.bf16.mxu1 %v7529_v37 }
 0x3a0   :  { %6451 = vmatpush3.bf16.msra.mxu1 %v7531_v18 }
 0x3a1   :  { %6452 = vmatprep.subr.bf16.mxu1 %v7533_v2 }
 0x3a4   :  { %6453 = vmatpush3.bf16.msra.mxu1 %v7535_v3  ;;  %v5666_v3 = vld [vmem:[#allocation14] sm:$0xff] }
 0x3a5   :  { %6454 = vmatprep.subr.bf16.mxu1 %v7537_v5 }
 0x3a8   :  { %6455 = vmatpush3.bf16.msra.mxu1 %v7539_v9 }
 0x3a9   :  { %6456 = vmatprep.subr.bf16.mxu1 %v7541_v58 }
 0x3ac   :  { %6457 = vmatpush3.bf16.msra.mxu1 %v7543_v11 }
 0x3ad   :  { %6458 = vmatprep.subr.bf16.mxu1 %v7545_v13  ;;  %v5667_v13 = vld [vmem:[#allocation14 + $0x8] sm:$0xff] }
 0x3b0   :  { %6459 = vmatpush3.bf16.msra.mxu1 %v7547_v7 }
 0x3b1   :  { %6460 = vmatprep.subr.bf16.mxu1 %v7549_v16 }
 0x3b4   :  { %6461 = vmatpush3.bf16.msra.mxu1 %v7551_v21 }
 0x3c6   :  { %v5228_v22 = vpop.f32.mrf.mxu0 }
 0x3c7   :  { %v5229_v32 = vadd.f32 %v5228_v22, %v4867_v28 }
 0x3c8   :  { %v5230_v1 = vpop.f32.mrf.mxu0 }
 0x3c9   :  { %v5231_v29 = vadd.f32 %v5230_v1, %v4871_v27 }
 0x3ca   :  { %v5232_v26 = vpop.f32.mrf.mxu0 }
 0x3cb   :  { %v5233_v30 = vadd.f32 %v5232_v26, %v4867_v28 }
 0x3cc   :  { %v5234_v47 = vpop.f32.mrf.mxu0 }
 0x3cd   :  { %v5235_v39 = vadd.f32 %v5234_v47, %v4871_v27 }
 0x457   :  { %v5271_v60 = vpop.f32.mrf.mxu1 }
 0x458   :  { %v5272_v4 = vadd.f32 %v5271_v60, %v5229_v32 }
 0x459   :  { %v5273_v34 = vpop.f32.mrf.mxu1 }
 0x45a   :  { %v5274_v35 = vadd.f32 %v5273_v34, %v5231_v29  ;;  %v5280_v23 = vmax.f32 %v5272_v4, 0.0 }
 0x45b   :  { %v5275_v48 = vpop.f32.mrf.mxu1 }
 0x45c   :  { %v5276_v8 = vadd.f32 %v5275_v48, %v5233_v30  ;;  %v5281_v56 = vmax.f32 %v5274_v35, 0.0 }
 0x45d   :  { %v5277_v40 = vpop.f32.mrf.mxu1 }
 0x45e   :  { %v5278_v41 = vadd.f32 %v5277_v40, %v5235_v39  ;;  %v5282_v44 = vmax.f32 %v5276_v8, 0.0 }
 0x460   :  { %v5283_v38 = vmax.f32 %v5278_v41, 0.0  ;;  %v5284_v12 = vpack.c.bf16 %v5282_v44, %v5280_v23 }
 0x462   :  { %v5285_v46 = vpack.c.bf16 %v5283_v38, %v5281_v56 }
 0x464   :  { %5453 = vmatprep.mubr.bf16.mxu0 %v5285_v46  ;;  %5629 = vmatprep.mubr.bf16.mxu1 %v5285_v46 }
 0x465   :  { %5454 = vmatmul.mubr.bf16.vlgmr.msra.gmra.mxu0 %v5284_v12  ;;  %5630 = vmatmul.mubr.bf16.vlgmr.msra.gmra.mxu1 %v5284_v12 }
 0x525   :  { %v6462_v17 = vpop.f32.mrf.mxu1  ;;  %v6440_v49 = vpop.f32.mrf.mxu0 }
 0x527   :  { %v6463_v62 = vpop.f32.mrf.mxu1  ;;  %v6441_v51 = vpop.f32.mrf.mxu0 }
 0x528   :  { %v6464_v50 = vadd.f32 %v6463_v62, %v6462_v17  ;;  %v6442_v24 = vadd.f32 %v6441_v51, %v6440_v49 }
 0x529   :  { %v6465_v57 = vpop.f32.mrf.mxu1  ;;  %v6443_v59 = vpop.f32.mrf.mxu0 }
 0x52a   :  { %v5632_v42 = vadd.f32 %v6464_v50, %v6407_v45  ;;  %v5456_v6 = vadd.f32 %v6442_v24, %v6390_v61 }
 0x52b   :  { %v6466_v19 = vpop.f32.mrf.mxu1  ;;  %v6444_v0 = vpop.f32.mrf.mxu0 }
 0x52c   :  { %v5638_v52 = vmul.f32 0.5, %v5632_v42  ;;  %v6467_v53 = vadd.f32 %v6466_v19, %v6465_v57  ;;  %v6445_v55 = vadd.f32 %v6444_v0, %v6443_v59  ;;  %v5648_v37 = vmul.f32 %v5456_v6, %v5456_v6 }
 0x52d   :  { %v5646_v18 = vadd.f32 1.0, %v5632_v42 }
 0x52e   :  { %v5640_v54 = vmul.f32 1.442695, %v5638_v52  ;;  %v5635_v43 = vadd.f32 %v6467_v53, %v6407_v45  ;;  %v5459_v2 = vadd.f32 %v6445_v55, %v6390_v61 }
 0x52f   :  { %v5650_v10 = vsub.f32 %v5646_v18, %v5648_v37 }
 0x530   :  { %7552 = vpow2.f32 %v5640_v54  ;;  %v5639_v20 = vmul.f32 0.5, %v5635_v43  ;;  %v5649_v36 = vmul.f32 %v5459_v2, %v5459_v2  ;;  %v5647_v11 = vadd.f32 1.0, %v5635_v43 }
 0x532   :  { %v5642_v63 = vmul.f32 1.442695, %v5639_v20  ;;  %v5651_v33 = vsub.f32 %v5647_v11, %v5649_v36 }
 0x534   :  { %7554 = vpow2.f32 %v5642_v63 }
 0x53d   :  { %v7553_v5 = vpop.eup %7552 }
 0x53e   :  { %v5644_v9 = vmul.f32 %v7553_v5, %v7553_v5  ;;  %v5668_v58 = vmul.f32 %v7553_v5, %v5666_v3 }
 0x540   :  { %v5652_v31 = vsub.f32 %v5650_v10, %v5644_v9  ;;  %v5670_v14 = vadd.f32 %v5668_v58, %v5456_v6 }
 0x541   :  { %v7555_v7 = vpop.eup %7554 }
 0x542   :  { %v5655_v15 = vsel %vm5654_vm0, %v5652_v31, 0.0  ;;  %5672 = vst.msk [vmem:[#allocation16] sm:$0xff] %vm5654_vm0, %v5670_v14  ;;  %v5645_v16 = vmul.f32 %v7555_v7, %v7555_v7  ;;  %v5669_v21 = vmul.f32 %v7555_v7, %v5667_v13 }
 0x543   :  { %5656 = vadd.xlane.f32.xlu0 %v5655_v15 }
 0x544   :  { %v5653_v22 = vsub.f32 %v5651_v33, %v5645_v16  ;;  %v5671_v1 = vadd.f32 %v5669_v21, %v5459_v2 }
 0x546   :  { %v5658_v25 = vsel %vm5654_vm0, %v5653_v22, 0.0  ;;  %5673 = vst.msk [vmem:[#allocation16 + $0x8] sm:$0xff] %vm5654_vm0, %v5671_v1 }
 0x547   :  { %5659 = vadd.xlane.f32.xlu0 %v5658_v25 }
 0x548   :  { %7747 = shalt.err (!%p7744_p2)
}
 0x549   :  { %5685 = dma.vmem_to_hbm [thread:$0]  %s5680_s7, 256, %s8094_s10, [#allocation4], %s7772_s27, %s7772_s27, %s7773_s28   ;;  %vm5663_vm1 = vcmask 7168  }
 0x5cc   :  { %v5657_v26 = vpop.xlane.xlu0 %5656 }
 0x5cd   :  { %v5661_v27 = vmul.f32 -0.5, %v5657_v26 }
 0x5cf   :  { %5664 = vst.msk [vmem:[%s8095_s11] sm:$0xff] %vm5663_vm1, %v5661_v27 }
 0x5d0   :  { %v5660_v28 = vpop.xlane.xlu0 %5659 }
 0x5d1   :  { %v5662_v60 = vmul.f32 -0.5, %v5660_v28 }
 0x5d3   :  { %5665 = vst.msk [vmem:[%s8095_s11 + $0x8] sm:$0xff] %vm5663_vm1, %v5662_v60 }
 0x5d4   :  { %7766 = dma.done.wait [#allocation4], 256  }
 0x5d5   :  { %7767 = vsyncadd [#allocation4], 4294967040 }
 0x5d6   :  { %5693 = vsyncpa [#allocation3], 1 }
 0x5d7   :  { %5694 = vsyncpa [#allocation6], 1 }
 0x5d8   :  { %5695 = vsyncpa [#allocation9], 1 }
 0x5d9   :  { %5696 = vsyncpa [#allocation12], 1 }
 0x5da   :  { %5697 = vsyncpa [#allocation15], 1 }
 0x5db   :  { %5698 = vsyncpa [#allocation4], 1 }

</bundles_post_ra>
